<compile_context>
chip_gen: v7x
topology: tpu7x:2x2x1
jax: 0.10.0
libtpu: 0.0.40
codegen_flags: <defaults>
</compile_context>

<pallas_src>
import functools

import jax
import jax.numpy as jnp
from jax import lax
from jax.experimental import pallas as pl
from jax.experimental.pallas import tpu as pltpu


# ----------------------------- helpers -----------------------------

def _round_up(x, m):
    return ((x + m - 1) // m) * m


def _pick_batch_block(batch, cap):
    """Pick a batch block size and the padded batch it tiles."""
    if batch <= cap:
        return batch, batch
    bb = max(8, (cap // 8) * 8)     # >= 8 keeps (bb, lanes) output blocks legal
    return bb, _round_up(batch, bb)


def _pad_batch(x, padded_batch):
    b = x.shape[0]
    if padded_batch == b:
        return x
    pad = [(0, padded_batch - b)] + [(0, 0)] * (x.ndim - 1)
    return jnp.pad(x, pad)


# ----------------------------- Pallas kernels -----------------------------

def _conv_pool_relu_kernel(p_ref, w_ref, b_ref, o_ref):
    # p_ref: (bB, 4, R, Kp)  im2col patches; axis 1 = the four 2x2 pooling phases,
    #                        R = padded pooled positions, Kp = padded kh*kw*cin.
    # w_ref: (Kp, Cout)      flattened conv weight (zero rows in the K padding)
    # b_ref: (1, Cout)
    # o_ref: (bB, R, Cout)   relu(maxpool2x2(conv(x))), NHWC-flattened spatial dim
    bB, _, R, Kp = p_ref.shape
    cout = w_ref.shape[1]
    pats = p_ref[...].reshape(bB * 4 * R, Kp)           # one big MXU matmul
    y = jnp.dot(pats, w_ref[...], preferred_element_type=jnp.float32)
    y = y.reshape(bB, 4, R, cout)
    m = jnp.maximum(jnp.maximum(y[:, 0], y[:, 1]),      # 2x2 max-pool == max over phases
                    jnp.maximum(y[:, 2], y[:, 3]))
    o_ref[...] = jnp.maximum(m + b_ref[...], 0.0).astype(o_ref.dtype)


def _conv2_fc_kernel(p_ref, w2_ref, b2_ref, w1p_ref, b1_ref, w3_ref, b3_ref,
                     o_ref, feat_ref, *, n_hw):
    # Fused: conv2(+maxpool+relu) -> flatten -> fc1+relu -> fc2 -> log_softmax.
    # p_ref:   (bB, 4, R2, Kp2)  conv2 im2col patches (phases, padded rows / K)
    # w2_ref:  (Kp2, C2); b2_ref: (1, C2)
    # w1p_ref: (Fp, 50)  fc1 weight permuted to NHWC-flatten order, zero-padded rows
    # b1_ref:  (1, 50); w3_ref: (50, 10); b3_ref: (1, 10)
    # o_ref:   (bB, 10)  log-probabilities
    # feat_ref: VMEM scratch (bB, Fp) for the flattened features
    bB, _, R, Kp = p_ref.shape
    c2ch = w2_ref.shape[1]

    pats = p_ref[...].reshape(bB * 4 * R, Kp)
    y = jnp.dot(pats, w2_ref[...], preferred_element_type=jnp.float32)
    y = y.reshape(bB, 4, R, c2ch)
    m = jnp.maximum(jnp.maximum(y[:, 0], y[:, 1]), jnp.maximum(y[:, 2], y[:, 3]))
    c2 = jnp.maximum(m + b2_ref[...], 0.0)              # (bB, R, C2)

    # NHWC flatten (hw-major, channel-minor) into a lane-dense padded slab.
    # fc1's weight rows were permuted offline, so this equals torch's NCHW
    # x.view(-1, 500) followed by the original fc1.
    feat_ref[...] = jnp.zeros_like(feat_ref)
    for hw in range(n_hw):                              # static unroll (n_hw = 25)
        feat_ref[:, hw * c2ch:(hw + 1) * c2ch] = c2[:, hw, :]

    h = jnp.dot(feat_ref[...], w1p_ref[...],
                preferred_element_type=jnp.float32) + b1_ref[...]
    h = jnp.maximum(h, 0.0)
    # F.dropout(x, training=self.training) -> identity in inference mode
    logits = jnp.dot(h, w3_ref[...], preferred_element_type=jnp.float32) + b3_ref[...]
    mx = jnp.max(logits, axis=-1, keepdims=True)
    s = logits - mx
    lse = jnp.log(jnp.sum(jnp.exp(s), axis=-1, keepdims=True))
    o_ref[...] = (s - lse).astype(o_ref.dtype)


# ----------------------------- kernel wrappers -----------------------------

def conv_pool_relu(patches, w_flat, bias, *, batch_cap=8):
    """patches: (B, 4, R, Kp); w_flat: (Kp, Cout); bias: (1, Cout) -> (B, R, Cout)."""
    B = patches.shape[0]
    bB, Bp = _pick_batch_block(B, batch_cap)
    patches = _pad_batch(patches, Bp)
    _, p4, R, Kp = patches.shape
    cout = w_flat.shape[1]
    out = pl.pallas_call(
        _conv_pool_relu_kernel,
        out_shape=jax.ShapeDtypeStruct((Bp, R, cout), jnp.float32),
        grid=(Bp // bB,),
        in_specs=[
            pl.BlockSpec((bB, p4, R, Kp), lambda i: (i, 0, 0, 0)),
            pl.BlockSpec(w_flat.shape, lambda i: (0, 0)),
            pl.BlockSpec(bias.shape, lambda i: (0, 0)),
        ],
        out_specs=pl.BlockSpec((bB, R, cout), lambda i: (i, 0, 0)),
        compiler_params=pltpu.CompilerParams(dimension_semantics=("parallel",)),
    )(patches, w_flat, bias)
    return out[:B]


def conv2_fc_fused(patches, w2f, b2, fc1_wp, fc1_b, fc2_w, fc2_b, *,
                   n_hw, batch_cap=32):
    """Fused conv2+pool+relu+flatten+fc1+relu+fc2+log_softmax.  -> (B, 10)."""
    B = patches.shape[0]
    bB, Bp = _pick_batch_block(B, batch_cap)
    patches = _pad_batch(patches, Bp)
    _, p4, R, Kp = patches.shape
    feat_pad = fc1_wp.shape[0]
    kern = functools.partial(_conv2_fc_kernel, n_hw=n_hw)
    out = pl.pallas_call(
        kern,
        out_shape=jax.ShapeDtypeStruct((Bp, 10), jnp.float32),
        grid=(Bp // bB,),
        in_specs=[
            pl.BlockSpec((bB, p4, R, Kp), lambda i: (i, 0, 0, 0)),
            pl.BlockSpec(w2f.shape, lambda i: (0, 0)),
            pl.BlockSpec(b2.shape, lambda i: (0, 0)),
            pl.BlockSpec(fc1_wp.shape, lambda i: (0, 0)),
            pl.BlockSpec(fc1_b.shape, lambda i: (0, 0)),
            pl.BlockSpec(fc2_w.shape, lambda i: (0, 0)),
            pl.BlockSpec(fc2_b.shape, lambda i: (0, 0)),
        ],
        out_specs=pl.BlockSpec((bB, 10), lambda i: (i, 0)),
        scratch_shapes=[pltpu.VMEM((bB, feat_pad), jnp.float32)],
        compiler_params=pltpu.CompilerParams(dimension_semantics=("parallel",)),
    )(patches, w2f, b2, fc1_wp, fc1_b, fc2_w, fc2_b)
    return out[:B]


# ----------------------------- JAX glue -----------------------------

def _im2col_pool_phases(x_nhwc, ksize, pool=2):
    """im2col patches grouped by the 4 (2x2) pooling phases, padded for TPU tiling.

    Returns (B, 4, R_pad, K_pad), Hp, Wp where R_pad = Hp*Wp rounded up to 8 and
    K_pad = ksize*ksize*C rounded up to 128 (zero padding; contributes nothing to
    the dot).  Patch feature order is (kh, kw, cin), matching
    w.transpose(2, 3, 1, 0).reshape(K, Cout).
    """
    B, H, W, C = x_nhwc.shape
    Ho, Wo = H - ksize + 1, W - ksize + 1
    cols = [x_nhwc[:, kh:kh + Ho, kw:kw + Wo, :]
            for kh in range(ksize) for kw in range(ksize)]
    patches = jnp.concatenate(cols, axis=-1)                 # (B, Ho, Wo, K)
    K = ksize * ksize * C
    Hp, Wp = Ho // pool, Wo // pool
    patches = patches.reshape(B, Hp, pool, Wp, pool, K)
    patches = patches.transpose(0, 2, 4, 1, 3, 5).reshape(B, pool * pool, Hp * Wp, K)
    r_pad = _round_up(Hp * Wp, 8)
    k_pad = _round_up(K, 128)
    patches = jnp.pad(patches, ((0, 0), (0, 0), (0, r_pad - Hp * Wp), (0, k_pad - K)))
    return patches, Hp, Wp


def init_torch_params(key):
    """Random parameters in the original PyTorch layouts."""
    ks = jax.random.split(key, 8)
    return dict(
        conv1_w=jax.random.normal(ks[0], (10, 3, 5, 5), jnp.float32) * 0.10,
        conv1_b=jax.random.normal(ks[1], (10,), jnp.float32) * 0.10,
        conv2_w=jax.random.normal(ks[2], (20, 10, 5, 5), jnp.float32) * 0.10,
        conv2_b=jax.random.normal(ks[3], (20,), jnp.float32) * 0.10,
        fc1_w=jax.random.normal(ks[4], (50, 500), jnp.float32) * 0.05,
        fc1_b=jax.random.normal(ks[5], (50,), jnp.float32) * 0.05,
        fc2_w=jax.random.normal(ks[6], (10, 50), jnp.float32) * 0.05,
        fc2_b=jax.random.normal(ks[7], (10,), jnp.float32) * 0.05,
    )


def prepare_params(tp):
    """Repack torch-layout params into the kernel layouts (padded / permuted)."""
    w1f = jnp.transpose(tp["conv1_w"], (2, 3, 1, 0)).reshape(75, 10)
    w1f = jnp.pad(w1f, ((0, 128 - 75), (0, 0)))
    w2f = jnp.transpose(tp["conv2_w"], (2, 3, 1, 0)).reshape(250, 20)
    w2f = jnp.pad(w2f, ((0, 256 - 250), (0, 0)))
    # torch's x.view(-1, 500) flattens NCHW (index c*25 + hw); the kernel flattens
    # NHWC (index hw*20 + c).  Permute fc1's input dimension to match, pad 500->512.
    fc1_wp = tp["fc1_w"].reshape(50, 20, 25).transpose(2, 1, 0).reshape(500, 50)
    fc1_wp = jnp.pad(fc1_wp, ((0, 512 - 500), (0, 0)))
    return dict(
        w1f=w1f, b1=tp["conv1_b"].reshape(1, 10),
        w2f=w2f, b2=tp["conv2_b"].reshape(1, 20),
        fc1_wp=fc1_wp, fc1_b=tp["fc1_b"].reshape(1, 50),
        fc2_w=tp["fc2_w"].T, fc2_b=tp["fc2_b"].reshape(1, 10),
    )


@jax.jit
def net_forward(x_nchw, params):
    B = x_nchw.shape[0]
    x = jnp.transpose(x_nchw, (0, 2, 3, 1))                      # NCHW -> NHWC

    # x = relu(max_pool2d(conv1(x), 2))
    p1, hp1, wp1 = _im2col_pool_phases(x, 5)                     # (B, 4, 200, 128)
    c1 = conv_pool_relu(p1, params["w1f"], params["b1"])         # (B, 200, 10)
    c1 = c1[:, :hp1 * wp1, :].reshape(B, hp1, wp1, 10)           # (B, 14, 14, 10)

    # conv2 (+Dropout2d identity) + pool + relu + view(-1,500) + fc1 + relu
    # + dropout(identity) + fc2 + log_softmax, fused into one pallas_call.
    p2, hp2, wp2 = _im2col_pool_phases(c1, 5)                    # (B, 4, 32, 256)
    return conv2_fc_fused(p2, params["w2f"], params["b2"],
                          params["fc1_wp"], params["fc1_b"],
                          params["fc2_w"], params["fc2_b"],
                          n_hw=hp2 * wp2)


def reference_forward(x_nchw, tp):
    """Pure-JAX (XLA) reference identical to the PyTorch forward in eval mode."""
    dn = ("NCHW", "OIHW", "NCHW")
    y = lax.conv_general_dilated(x_nchw, tp["conv1_w"], (1, 1), "VALID",
                                 dimension_numbers=dn)
    y = y + tp["conv1_b"][None, :, None, None]
    y = lax.reduce_window(y, -jnp.inf, lax.max, (1, 1, 2, 2), (1, 1, 2, 2), "VALID")
    y = jnp.maximum(y, 0.0)
    y = lax.conv_general_dilated(y, tp["conv2_w"], (1, 1), "VALID",
                                 dimension_numbers=dn)
    y = y + tp["conv2_b"][None, :, None, None]
    y = lax.reduce_window(y, -jnp.inf, lax.max, (1, 1, 2, 2), (1, 1, 2, 2), "VALID")
    y = jnp.maximum(y, 0.0)
    feat = y.reshape(y.shape[0], -1)                             # NCHW view(-1, 500)
    h = jnp.maximum(feat @ tp["fc1_w"].T + tp["fc1_b"], 0.0)
    logits = h @ tp["fc2_w"].T + tp["fc2_b"]
    return jax.nn.log_softmax(logits, axis=-1)


if __name__ == "__main__":
    key = jax.random.PRNGKey(0)
    kx, kp = jax.random.split(key)
    # Module geometry forces 3x32x32 inputs (20*5*5 == 500 after two conv+pool stages).
    x = jax.random.normal(kx, (2, 3, 32, 32), jnp.float32)
    torch_params = init_torch_params(kp)
    params = prepare_params(torch_params)

    out = jax.block_until_ready(net_forward(x, params))
    assert out.shape == (2, 10)

    ref = jax.block_until_ready(reference_forward(x, torch_params))
    max_err = float(jnp.max(jnp.abs(out - ref)))
    assert max_err < 1e-1, f"Pallas output deviates from reference: {max_err}"
    print("KERNEL_OK")
</pallas_src>

<mosaic_0001>
module attributes {stable_mosaic.version = 11 : i64} {
  func.func @_conv_pool_relu_kernel(%arg0: i32, %arg1: memref<2x4x200x128xf32, #tpu.memory_space<vmem>>, %arg2: memref<128x10xf32, #tpu.memory_space<vmem>>, %arg3: memref<1x10xf32, #tpu.memory_space<vmem>>, %arg4: memref<2x200x10xf32, #tpu.memory_space<vmem>>) attributes {dimension_semantics = [#tpu.dimension_semantics<parallel>], iteration_bounds = array<i64: 1>, scalar_prefetch = 0 : i64, scratch_operands = 0 : i64, tpu.core_type = #tpu.core_type<tc>, window_params = [{transform_indices = @transform_0, window_bounds = array<i64: 2, 4, 200, 128>}, {pipeline_mode = #tpu.pipeline_mode<synchronous>, transform_indices = @transform_1, window_bounds = array<i64: 128, 10>}, {pipeline_mode = #tpu.pipeline_mode<synchronous>, transform_indices = @transform_2, window_bounds = array<i64: 1, 10>}, {transform_indices = @transform_3, window_bounds = array<i64: 2, 200, 10>}]} {
    %c0 = arith.constant 0 : index
    %c0_0 = arith.constant 0 : index
    %c0_1 = arith.constant 0 : index
    %c0_2 = arith.constant 0 : index
    %0 = vector.load %arg1[%c0, %c0_0, %c0_1, %c0_2] : memref<2x4x200x128xf32, #tpu.memory_space<vmem>>, vector<2x4x200x128xf32>
    %1 = vector.shape_cast %0 : vector<2x4x200x128xf32> to vector<1600x128xf32>
    %c0_3 = arith.constant 0 : index
    %c0_4 = arith.constant 0 : index
    %2 = vector.load %arg2[%c0_3, %c0_4] : memref<128x10xf32, #tpu.memory_space<vmem>>, vector<128x10xf32>
    %cst = arith.constant dense<0.000000e+00> : vector<1600x10xf32>
    %3 = tpu.matmul %1, %2, %cst {dimension_numbers = #tpu.dot_dimension_numbers<[1], [0], [0], [1], [0, 0, 1, 1], [], []>} : vector<1600x128xf32>, vector<128x10xf32>, vector<1600x10xf32> -> vector<1600x10xf32>
    %4 = vector.shape_cast %3 : vector<1600x10xf32> to vector<2x4x200x10xf32>
    %5 = vector.extract_strided_slice %4 {offsets = [0, 0, 0, 0], sizes = [2, 1, 200, 10], strides = [1, 1, 1, 1]} : vector<2x4x200x10xf32> to vector<2x1x200x10xf32>
    %6 = vector.shape_cast %5 : vector<2x1x200x10xf32> to vector<2x200x10xf32>
    %7 = vector.extract_strided_slice %4 {offsets = [0, 1, 0, 0], sizes = [2, 1, 200, 10], strides = [1, 1, 1, 1]} : vector<2x4x200x10xf32> to vector<2x1x200x10xf32>
    %8 = vector.shape_cast %7 : vector<2x1x200x10xf32> to vector<2x200x10xf32>
    %9 = arith.maximumf %6, %8 : vector<2x200x10xf32>
    %10 = vector.extract_strided_slice %4 {offsets = [0, 2, 0, 0], sizes = [2, 1, 200, 10], strides = [1, 1, 1, 1]} : vector<2x4x200x10xf32> to vector<2x1x200x10xf32>
    %11 = vector.shape_cast %10 : vector<2x1x200x10xf32> to vector<2x200x10xf32>
    %12 = vector.extract_strided_slice %4 {offsets = [0, 3, 0, 0], sizes = [2, 1, 200, 10], strides = [1, 1, 1, 1]} : vector<2x4x200x10xf32> to vector<2x1x200x10xf32>
    %13 = vector.shape_cast %12 : vector<2x1x200x10xf32> to vector<2x200x10xf32>
    %14 = arith.maximumf %11, %13 : vector<2x200x10xf32>
    %15 = arith.maximumf %9, %14 : vector<2x200x10xf32>
    %c0_5 = arith.constant 0 : index
    %c0_6 = arith.constant 0 : index
    %16 = vector.load %arg3[%c0_5, %c0_6] : memref<1x10xf32, #tpu.memory_space<vmem>>, vector<1x10xf32>
    %17 = vector.shape_cast %16 : vector<1x10xf32> to vector<1x1x10xf32>
    %18 = vector.broadcast %17 : vector<1x1x10xf32> to vector<2x200x10xf32>
    %19 = arith.addf %15, %18 : vector<2x200x10xf32>
    %cst_7 = arith.constant 0.000000e+00 : f32
    %20 = vector.broadcast %cst_7 : f32 to vector<2x200x10xf32>
    %21 = arith.maximumf %19, %20 : vector<2x200x10xf32>
    %c0_8 = arith.constant 0 : index
    %c0_9 = arith.constant 0 : index
    %c0_10 = arith.constant 0 : index
    %22 = vector.load %arg4[%c0_8, %c0_9, %c0_10] : memref<2x200x10xf32, #tpu.memory_space<vmem>>, vector<2x200x10xf32>
    tpu.vector_store %arg4[%c0_8, %c0_9, %c0_10], %21 {strides = array<i32>} : memref<2x200x10xf32, #tpu.memory_space<vmem>>, vector<2x200x10xf32>,
    return
  }
  func.func @transform_0(%arg0: i32) -> (i32, i32, i32, i32) {
    %c0_i32 = arith.constant 0 : i32
    %c0_i32_0 = arith.constant 0 : i32
    %c0_i32_1 = arith.constant 0 : i32
    %c0_i32_2 = arith.constant 0 : i32
    return %arg0, %c0_i32, %c0_i32_0, %c0_i32_1 : i32, i32, i32, i32
  }
  func.func @transform_1(%arg0: i32) -> (i32, i32) {
    %c0_i32 = arith.constant 0 : i32
    %c0_i32_0 = arith.constant 0 : i32
    %c0_i32_1 = arith.constant 0 : i32
    return %c0_i32, %c0_i32_0 : i32, i32
  }
  func.func @transform_2(%arg0: i32) -> (i32, i32) {
    %c0_i32 = arith.constant 0 : i32
    %c0_i32_0 = arith.constant 0 : i32
    %c0_i32_1 = arith.constant 0 : i32
    return %c0_i32, %c0_i32_0 : i32, i32
  }
  func.func @transform_3(%arg0: i32) -> (i32, i32, i32) {
    %c0_i32 = arith.constant 0 : i32
    %c0_i32_0 = arith.constant 0 : i32
    %c0_i32_1 = arith.constant 0 : i32
    return %arg0, %c0_i32, %c0_i32_0 : i32, i32, i32
  }
}

module attributes {stable_mosaic.version = 11 : i64} {
  func.func @_conv2_fc_kernel(%arg0: i32, %arg1: memref<2x4x32x256xf32, #tpu.memory_space<vmem>>, %arg2: memref<256x20xf32, #tpu.memory_space<vmem>>, %arg3: memref<1x20xf32, #tpu.memory_space<vmem>>, %arg4: memref<512x50xf32, #tpu.memory_space<vmem>>, %arg5: memref<1x50xf32, #tpu.memory_space<vmem>>, %arg6: memref<50x10xf32, #tpu.memory_space<vmem>>, %arg7: memref<1x10xf32, #tpu.memory_space<vmem>>, %arg8: memref<2x10xf32, #tpu.memory_space<vmem>>, %arg9: memref<2x512xf32, #tpu.memory_space<vmem>>) attributes {dimension_semantics = [#tpu.dimension_semantics<parallel>], iteration_bounds = array<i64: 1>, scalar_prefetch = 0 : i64, scratch_operands = 1 : i64, tpu.core_type = #tpu.core_type<tc>, window_params = [{transform_indices = @transform_0, window_bounds = array<i64: 2, 4, 32, 256>}, {pipeline_mode = #tpu.pipeline_mode<synchronous>, transform_indices = @transform_1, window_bounds = array<i64: 256, 20>}, {pipeline_mode = #tpu.pipeline_mode<synchronous>, transform_indices = @transform_2, window_bounds = array<i64: 1, 20>}, {pipeline_mode = #tpu.pipeline_mode<synchronous>, transform_indices = @transform_3, window_bounds = array<i64: 512, 50>}, {pipeline_mode = #tpu.pipeline_mode<synchronous>, transform_indices = @transform_4, window_bounds = array<i64: 1, 50>}, {pipeline_mode = #tpu.pipeline_mode<synchronous>, transform_indices = @transform_5, window_bounds = array<i64: 50, 10>}, {pipeline_mode = #tpu.pipeline_mode<synchronous>, transform_indices = @transform_6, window_bounds = array<i64: 1, 10>}, {transform_indices = @transform_7, window_bounds = array<i64: 2, 10>}]} {
    %c0 = arith.constant 0 : index
    %c0_0 = arith.constant 0 : index
    %c0_1 = arith.constant 0 : index
    %c0_2 = arith.constant 0 : index
    %0 = vector.load %arg1[%c0, %c0_0, %c0_1, %c0_2] : memref<2x4x32x256xf32, #tpu.memory_space<vmem>>, vector<2x4x32x256xf32>
    %1 = vector.shape_cast %0 : vector<2x4x32x256xf32> to vector<256x256xf32>
    %c0_3 = arith.constant 0 : index
    %c0_4 = arith.constant 0 : index
    %2 = vector.load %arg2[%c0_3, %c0_4] : memref<256x20xf32, #tpu.memory_space<vmem>>, vector<256x20xf32>
    %cst = arith.constant dense<0.000000e+00> : vector<256x20xf32>
    %3 = tpu.matmul %1, %2, %cst {dimension_numbers = #tpu.dot_dimension_numbers<[1], [0], [0], [1], [0, 0, 1, 1], [], []>} : vector<256x256xf32>, vector<256x20xf32>, vector<256x20xf32> -> vector<256x20xf32>
    %4 = vector.shape_cast %3 : vector<256x20xf32> to vector<2x4x32x20xf32>
    %5 = vector.extract_strided_slice %4 {offsets = [0, 0, 0, 0], sizes = [2, 1, 32, 20], strides = [1, 1, 1, 1]} : vector<2x4x32x20xf32> to vector<2x1x32x20xf32>
    %6 = vector.shape_cast %5 : vector<2x1x32x20xf32> to vector<2x32x20xf32>
    %7 = vector.extract_strided_slice %4 {offsets = [0, 1, 0, 0], sizes = [2, 1, 32, 20], strides = [1, 1, 1, 1]} : vector<2x4x32x20xf32> to vector<2x1x32x20xf32>
    %8 = vector.shape_cast %7 : vector<2x1x32x20xf32> to vector<2x32x20xf32>
    %9 = arith.maximumf %6, %8 : vector<2x32x20xf32>
    %10 = vector.extract_strided_slice %4 {offsets = [0, 2, 0, 0], sizes = [2, 1, 32, 20], strides = [1, 1, 1, 1]} : vector<2x4x32x20xf32> to vector<2x1x32x20xf32>
    %11 = vector.shape_cast %10 : vector<2x1x32x20xf32> to vector<2x32x20xf32>
    %12 = vector.extract_strided_slice %4 {offsets = [0, 3, 0, 0], sizes = [2, 1, 32, 20], strides = [1, 1, 1, 1]} : vector<2x4x32x20xf32> to vector<2x1x32x20xf32>
    %13 = vector.shape_cast %12 : vector<2x1x32x20xf32> to vector<2x32x20xf32>
    %14 = arith.maximumf %11, %13 : vector<2x32x20xf32>
    %15 = arith.maximumf %9, %14 : vector<2x32x20xf32>
    %c0_5 = arith.constant 0 : index
    %c0_6 = arith.constant 0 : index
    %16 = vector.load %arg3[%c0_5, %c0_6] : memref<1x20xf32, #tpu.memory_space<vmem>>, vector<1x20xf32>
    %17 = vector.shape_cast %16 : vector<1x20xf32> to vector<1x1x20xf32>
    %18 = vector.broadcast %17 : vector<1x1x20xf32> to vector<2x32x20xf32>
    %19 = arith.addf %15, %18 : vector<2x32x20xf32>
    %cst_7 = arith.constant 0.000000e+00 : f32
    %20 = vector.broadcast %cst_7 : f32 to vector<2x32x20xf32>
    %21 = arith.maximumf %19, %20 : vector<2x32x20xf32>
    %cst_8 = arith.constant 0.000000e+00 : f32
    %22 = vector.broadcast %cst_8 : f32 to vector<2x512xf32>
    %c0_9 = arith.constant 0 : index
    %c0_10 = arith.constant 0 : index
    %23 = vector.load %arg9[%c0_9, %c0_10] : memref<2x512xf32, #tpu.memory_space<vmem>>, vector<2x512xf32>
    tpu.vector_store %arg9[%c0_9, %c0_10], %22 {strides = array<i32>} : memref<2x512xf32, #tpu.memory_space<vmem>>, vector<2x512xf32>,
    %24 = vector.extract_strided_slice %21 {offsets = [0, 0, 0], sizes = [2, 1, 20], strides = [1, 1, 1]} : vector<2x32x20xf32> to vector<2x1x20xf32>
    %25 = vector.shape_cast %24 : vector<2x1x20xf32> to vector<2x20xf32>
    %c0_11 = arith.constant 0 : index
    %c0_12 = arith.constant 0 : index
    %26 = vector.load %arg9[%c0_11, %c0_12] : memref<2x512xf32, #tpu.memory_space<vmem>>, vector<2x20xf32>
    tpu.vector_store %arg9[%c0_11, %c0_12], %25 {strides = array<i32>} : memref<2x512xf32, #tpu.memory_space<vmem>>, vector<2x20xf32>,
    %27 = vector.extract_strided_slice %21 {offsets = [0, 1, 0], sizes = [2, 1, 20], strides = [1, 1, 1]} : vector<2x32x20xf32> to vector<2x1x20xf32>
    %28 = vector.shape_cast %27 : vector<2x1x20xf32> to vector<2x20xf32>
    %c0_13 = arith.constant 0 : index
    %c20 = arith.constant 20 : index
    %29 = vector.load %arg9[%c0_13, %c20] : memref<2x512xf32, #tpu.memory_space<vmem>>, vector<2x20xf32>
    tpu.vector_store %arg9[%c0_13, %c20], %28 {strides = array<i32>} : memref<2x512xf32, #tpu.memory_space<vmem>>, vector<2x20xf32>,
    %30 = vector.extract_strided_slice %21 {offsets = [0, 2, 0], sizes = [2, 1, 20], strides = [1, 1, 1]} : vector<2x32x20xf32> to vector<2x1x20xf32>
    %31 = vector.shape_cast %30 : vector<2x1x20xf32> to vector<2x20xf32>
    %c0_14 = arith.constant 0 : index
    %c40 = arith.constant 40 : index
    %32 = vector.load %arg9[%c0_14, %c40] : memref<2x512xf32, #tpu.memory_space<vmem>>, vector<2x20xf32>
    tpu.vector_store %arg9[%c0_14, %c40], %31 {strides = array<i32>} : memref<2x512xf32, #tpu.memory_space<vmem>>, vector<2x20xf32>,
    %33 = vector.extract_strided_slice %21 {offsets = [0, 3, 0], sizes = [2, 1, 20], strides = [1, 1, 1]} : vector<2x32x20xf32> to vector<2x1x20xf32>
    %34 = vector.shape_cast %33 : vector<2x1x20xf32> to vector<2x20xf32>
    %c0_15 = arith.constant 0 : index
    %c60 = arith.constant 60 : index
    %35 = vector.load %arg9[%c0_15, %c60] : memref<2x512xf32, #tpu.memory_space<vmem>>, vector<2x20xf32>
    tpu.vector_store %arg9[%c0_15, %c60], %34 {strides = array<i32>} : memref<2x512xf32, #tpu.memory_space<vmem>>, vector<2x20xf32>,
    %36 = vector.extract_strided_slice %21 {offsets = [0, 4, 0], sizes = [2, 1, 20], strides = [1, 1, 1]} : vector<2x32x20xf32> to vector<2x1x20xf32>
    %37 = vector.shape_cast %36 : vector<2x1x20xf32> to vector<2x20xf32>
    %c0_16 = arith.constant 0 : index
    %c80 = arith.constant 80 : index
    %38 = vector.load %arg9[%c0_16, %c80] : memref<2x512xf32, #tpu.memory_space<vmem>>, vector<2x20xf32>
    tpu.vector_store %arg9[%c0_16, %c80], %37 {strides = array<i32>} : memref<2x512xf32, #tpu.memory_space<vmem>>, vector<2x20xf32>,
    %39 = vector.extract_strided_slice %21 {offsets = [0, 5, 0], sizes = [2, 1, 20], strides = [1, 1, 1]} : vector<2x32x20xf32> to vector<2x1x20xf32>
    %40 = vector.shape_cast %39 : vector<2x1x20xf32> to vector<2x20xf32>
    %c0_17 = arith.constant 0 : index
    %c100 = arith.constant 100 : index
    %41 = vector.load %arg9[%c0_17, %c100] : memref<2x512xf32, #tpu.memory_space<vmem>>, vector<2x20xf32>
    tpu.vector_store %arg9[%c0_17, %c100], %40 {strides = array<i32>} : memref<2x512xf32, #tpu.memory_space<vmem>>, vector<2x20xf32>,
    %42 = vector.extract_strided_slice %21 {offsets = [0, 6, 0], sizes = [2, 1, 20], strides = [1, 1, 1]} : vector<2x32x20xf32> to vector<2x1x20xf32>
    %43 = vector.shape_cast %42 : vector<2x1x20xf32> to vector<2x20xf32>
    %c0_18 = arith.constant 0 : index
    %c120 = arith.constant 120 : index
    %44 = vector.load %arg9[%c0_18, %c120] : memref<2x512xf32, #tpu.memory_space<vmem>>, vector<2x20xf32>
    tpu.vector_store %arg9[%c0_18, %c120], %43 {strides = array<i32>} : memref<2x512xf32, #tpu.memory_space<vmem>>, vector<2x20xf32>,
    %45 = vector.extract_strided_slice %21 {offsets = [0, 7, 0], sizes = [2, 1, 20], strides = [1, 1, 1]} : vector<2x32x20xf32> to vector<2x1x20xf32>
    %46 = vector.shape_cast %45 : vector<2x1x20xf32> to vector<2x20xf32>
    %c0_19 = arith.constant 0 : index
    %c140 = arith.constant 140 : index
    %47 = vector.load %arg9[%c0_19, %c140] : memref<2x512xf32, #tpu.memory_space<vmem>>, vector<2x20xf32>
    tpu.vector_store %arg9[%c0_19, %c140], %46 {strides = array<i32>} : memref<2x512xf32, #tpu.memory_space<vmem>>, vector<2x20xf32>,
    %48 = vector.extract_strided_slice %21 {offsets = [0, 8, 0], sizes = [2, 1, 20], strides = [1, 1, 1]} : vector<2x32x20xf32> to vector<2x1x20xf32>
    %49 = vector.shape_cast %48 : vector<2x1x20xf32> to vector<2x20xf32>
    %c0_20 = arith.constant 0 : index
    %c160 = arith.constant 160 : index
    %50 = vector.load %arg9[%c0_20, %c160] : memref<2x512xf32, #tpu.memory_space<vmem>>, vector<2x20xf32>
    tpu.vector_store %arg9[%c0_20, %c160], %49 {strides = array<i32>} : memref<2x512xf32, #tpu.memory_space<vmem>>, vector<2x20xf32>,
    %51 = vector.extract_strided_slice %21 {offsets = [0, 9, 0], sizes = [2, 1, 20], strides = [1, 1, 1]} : vector<2x32x20xf32> to vector<2x1x20xf32>
    %52 = vector.shape_cast %51 : vector<2x1x20xf32> to vector<2x20xf32>
    %c0_21 = arith.constant 0 : index
    %c180 = arith.constant 180 : index
    %53 = vector.load %arg9[%c0_21, %c180] : memref<2x512xf32, #tpu.memory_space<vmem>>, vector<2x20xf32>
    tpu.vector_store %arg9[%c0_21, %c180], %52 {strides = array<i32>} : memref<2x512xf32, #tpu.memory_space<vmem>>, vector<2x20xf32>,
    %54 = vector.extract_strided_slice %21 {offsets = [0, 10, 0], sizes = [2, 1, 20], strides = [1, 1, 1]} : vector<2x32x20xf32> to vector<2x1x20xf32>
    %55 = vector.shape_cast %54 : vector<2x1x20xf32> to vector<2x20xf32>
    %c0_22 = arith.constant 0 : index
    %c200 = arith.constant 200 : index
    %56 = vector.load %arg9[%c0_22, %c200] : memref<2x512xf32, #tpu.memory_space<vmem>>, vector<2x20xf32>
    tpu.vector_store %arg9[%c0_22, %c200], %55 {strides = array<i32>} : memref<2x512xf32, #tpu.memory_space<vmem>>, vector<2x20xf32>,
    %57 = vector.extract_strided_slice %21 {offsets = [0, 11, 0], sizes = [2, 1, 20], strides = [1, 1, 1]} : vector<2x32x20xf32> to vector<2x1x20xf32>
    %58 = vector.shape_cast %57 : vector<2x1x20xf32> to vector<2x20xf32>
    %c0_23 = arith.constant 0 : index
    %c220 = arith.constant 220 : index
    %59 = vector.load %arg9[%c0_23, %c220] : memref<2x512xf32, #tpu.memory_space<vmem>>, vector<2x20xf32>
    tpu.vector_store %arg9[%c0_23, %c220], %58 {strides = array<i32>} : memref<2x512xf32, #tpu.memory_space<vmem>>, vector<2x20xf32>,
    %60 = vector.extract_strided_slice %21 {offsets = [0, 12, 0], sizes = [2, 1, 20], strides = [1, 1, 1]} : vector<2x32x20xf32> to vector<2x1x20xf32>
    %61 = vector.shape_cast %60 : vector<2x1x20xf32> to vector<2x20xf32>
    %c0_24 = arith.constant 0 : index
    %c240 = arith.constant 240 : index
    %62 = vector.load %arg9[%c0_24, %c240] : memref<2x512xf32, #tpu.memory_space<vmem>>, vector<2x20xf32>
    tpu.vector_store %arg9[%c0_24, %c240], %61 {strides = array<i32>} : memref<2x512xf32, #tpu.memory_space<vmem>>, vector<2x20xf32>,
    %63 = vector.extract_strided_slice %21 {offsets = [0, 13, 0], sizes = [2, 1, 20], strides = [1, 1, 1]} : vector<2x32x20xf32> to vector<2x1x20xf32>
    %64 = vector.shape_cast %63 : vector<2x1x20xf32> to vector<2x20xf32>
    %c0_25 = arith.constant 0 : index
    %c260 = arith.constant 260 : index
    %65 = vector.load %arg9[%c0_25, %c260] : memref<2x512xf32, #tpu.memory_space<vmem>>, vector<2x20xf32>
    tpu.vector_store %arg9[%c0_25, %c260], %64 {strides = array<i32>} : memref<2x512xf32, #tpu.memory_space<vmem>>, vector<2x20xf32>,
    %66 = vector.extract_strided_slice %21 {offsets = [0, 14, 0], sizes = [2, 1, 20], strides = [1, 1, 1]} : vector<2x32x20xf32> to vector<2x1x20xf32>
    %67 = vector.shape_cast %66 : vector<2x1x20xf32> to vector<2x20xf32>
    %c0_26 = arith.constant 0 : index
    %c280 = arith.constant 280 : index
    %68 = vector.load %arg9[%c0_26, %c280] : memref<2x512xf32, #tpu.memory_space<vmem>>, vector<2x20xf32>
    tpu.vector_store %arg9[%c0_26, %c280], %67 {strides = array<i32>} : memref<2x512xf32, #tpu.memory_space<vmem>>, vector<2x20xf32>,
    %69 = vector.extract_strided_slice %21 {offsets = [0, 15, 0], sizes = [2, 1, 20], strides = [1, 1, 1]} : vector<2x32x20xf32> to vector<2x1x20xf32>
    %70 = vector.shape_cast %69 : vector<2x1x20xf32> to vector<2x20xf32>
    %c0_27 = arith.constant 0 : index
    %c300 = arith.constant 300 : index
    %71 = vector.load %arg9[%c0_27, %c300] : memref<2x512xf32, #tpu.memory_space<vmem>>, vector<2x20xf32>
    tpu.vector_store %arg9[%c0_27, %c300], %70 {strides = array<i32>} : memref<2x512xf32, #tpu.memory_space<vmem>>, vector<2x20xf32>,
    %72 = vector.extract_strided_slice %21 {offsets = [0, 16, 0], sizes = [2, 1, 20], strides = [1, 1, 1]} : vector<2x32x20xf32> to vector<2x1x20xf32>
    %73 = vector.shape_cast %72 : vector<2x1x20xf32> to vector<2x20xf32>
    %c0_28 = arith.constant 0 : index
    %c320 = arith.constant 320 : index
    %74 = vector.load %arg9[%c0_28, %c320] : memref<2x512xf32, #tpu.memory_space<vmem>>, vector<2x20xf32>
    tpu.vector_store %arg9[%c0_28, %c320], %73 {strides = array<i32>} : memref<2x512xf32, #tpu.memory_space<vmem>>, vector<2x20xf32>,
    %75 = vector.extract_strided_slice %21 {offsets = [0, 17, 0], sizes = [2, 1, 20], strides = [1, 1, 1]} : vector<2x32x20xf32> to vector<2x1x20xf32>
    %76 = vector.shape_cast %75 : vector<2x1x20xf32> to vector<2x20xf32>
    %c0_29 = arith.constant 0 : index
    %c340 = arith.constant 340 : index
    %77 = vector.load %arg9[%c0_29, %c340] : memref<2x512xf32, #tpu.memory_space<vmem>>, vector<2x20xf32>
    tpu.vector_store %arg9[%c0_29, %c340], %76 {strides = array<i32>} : memref<2x512xf32, #tpu.memory_space<vmem>>, vector<2x20xf32>,
    %78 = vector.extract_strided_slice %21 {offsets = [0, 18, 0], sizes = [2, 1, 20], strides = [1, 1, 1]} : vector<2x32x20xf32> to vector<2x1x20xf32>
    %79 = vector.shape_cast %78 : vector<2x1x20xf32> to vector<2x20xf32>
    %c0_30 = arith.constant 0 : index
    %c360 = arith.constant 360 : index
    %80 = vector.load %arg9[%c0_30, %c360] : memref<2x512xf32, #tpu.memory_space<vmem>>, vector<2x20xf32>
    tpu.vector_store %arg9[%c0_30, %c360], %79 {strides = array<i32>} : memref<2x512xf32, #tpu.memory_space<vmem>>, vector<2x20xf32>,
    %81 = vector.extract_strided_slice %21 {offsets = [0, 19, 0], sizes = [2, 1, 20], strides = [1, 1, 1]} : vector<2x32x20xf32> to vector<2x1x20xf32>
    %82 = vector.shape_cast %81 : vector<2x1x20xf32> to vector<2x20xf32>
    %c0_31 = arith.constant 0 : index
    %c380 = arith.constant 380 : index
    %83 = vector.load %arg9[%c0_31, %c380] : memref<2x512xf32, #tpu.memory_space<vmem>>, vector<2x20xf32>
    tpu.vector_store %arg9[%c0_31, %c380], %82 {strides = array<i32>} : memref<2x512xf32, #tpu.memory_space<vmem>>, vector<2x20xf32>,
    %84 = vector.extract_strided_slice %21 {offsets = [0, 20, 0], sizes = [2, 1, 20], strides = [1, 1, 1]} : vector<2x32x20xf32> to vector<2x1x20xf32>
    %85 = vector.shape_cast %84 : vector<2x1x20xf32> to vector<2x20xf32>
    %c0_32 = arith.constant 0 : index
    %c400 = arith.constant 400 : index
    %86 = vector.load %arg9[%c0_32, %c400] : memref<2x512xf32, #tpu.memory_space<vmem>>, vector<2x20xf32>
    tpu.vector_store %arg9[%c0_32, %c400], %85 {strides = array<i32>} : memref<2x512xf32, #tpu.memory_space<vmem>>, vector<2x20xf32>,
    %87 = vector.extract_strided_slice %21 {offsets = [0, 21, 0], sizes = [2, 1, 20], strides = [1, 1, 1]} : vector<2x32x20xf32> to vector<2x1x20xf32>
    %88 = vector.shape_cast %87 : vector<2x1x20xf32> to vector<2x20xf32>
    %c0_33 = arith.constant 0 : index
    %c420 = arith.constant 420 : index
    %89 = vector.load %arg9[%c0_33, %c420] : memref<2x512xf32, #tpu.memory_space<vmem>>, vector<2x20xf32>
    tpu.vector_store %arg9[%c0_33, %c420], %88 {strides = array<i32>} : memref<2x512xf32, #tpu.memory_space<vmem>>, vector<2x20xf32>,
    %90 = vector.extract_strided_slice %21 {offsets = [0, 22, 0], sizes = [2, 1, 20], strides = [1, 1, 1]} : vector<2x32x20xf32> to vector<2x1x20xf32>
    %91 = vector.shape_cast %90 : vector<2x1x20xf32> to vector<2x20xf32>
    %c0_34 = arith.constant 0 : index
    %c440 = arith.constant 440 : index
    %92 = vector.load %arg9[%c0_34, %c440] : memref<2x512xf32, #tpu.memory_space<vmem>>, vector<2x20xf32>
    tpu.vector_store %arg9[%c0_34, %c440], %91 {strides = array<i32>} : memref<2x512xf32, #tpu.memory_space<vmem>>, vector<2x20xf32>,
    %93 = vector.extract_strided_slice %21 {offsets = [0, 23, 0], sizes = [2, 1, 20], strides = [1, 1, 1]} : vector<2x32x20xf32> to vector<2x1x20xf32>
    %94 = vector.shape_cast %93 : vector<2x1x20xf32> to vector<2x20xf32>
    %c0_35 = arith.constant 0 : index
    %c460 = arith.constant 460 : index
    %95 = vector.load %arg9[%c0_35, %c460] : memref<2x512xf32, #tpu.memory_space<vmem>>, vector<2x20xf32>
    tpu.vector_store %arg9[%c0_35, %c460], %94 {strides = array<i32>} : memref<2x512xf32, #tpu.memory_space<vmem>>, vector<2x20xf32>,
    %96 = vector.extract_strided_slice %21 {offsets = [0, 24, 0], sizes = [2, 1, 20], strides = [1, 1, 1]} : vector<2x32x20xf32> to vector<2x1x20xf32>
    %97 = vector.shape_cast %96 : vector<2x1x20xf32> to vector<2x20xf32>
    %c0_36 = arith.constant 0 : index
    %c480 = arith.constant 480 : index
    %98 = vector.load %arg9[%c0_36, %c480] : memref<2x512xf32, #tpu.memory_space<vmem>>, vector<2x20xf32>
    tpu.vector_store %arg9[%c0_36, %c480], %97 {strides = array<i32>} : memref<2x512xf32, #tpu.memory_space<vmem>>, vector<2x20xf32>,
    %c0_37 = arith.constant 0 : index
    %c0_38 = arith.constant 0 : index
    %99 = vector.load %arg9[%c0_37, %c0_38] : memref<2x512xf32, #tpu.memory_space<vmem>>, vector<2x512xf32>
    %c0_39 = arith.constant 0 : index
    %c0_40 = arith.constant 0 : index
    %100 = vector.load %arg4[%c0_39, %c0_40] : memref<512x50xf32, #tpu.memory_space<vmem>>, vector<512x50xf32>
    %cst_41 = arith.constant dense<0.000000e+00> : vector<2x50xf32>
    %101 = tpu.matmul %99, %100, %cst_41 {dimension_numbers = #tpu.dot_dimension_numbers<[1], [0], [0], [1], [0, 0, 1, 1], [], []>} : vector<2x512xf32>, vector<512x50xf32>, vector<2x50xf32> -> vector<2x50xf32>
    %c0_42 = arith.constant 0 : index
    %c0_43 = arith.constant 0 : index
    %102 = vector.load %arg5[%c0_42, %c0_43] : memref<1x50xf32, #tpu.memory_space<vmem>>, vector<1x50xf32>
    %103 = vector.broadcast %102 : vector<1x50xf32> to vector<2x50xf32>
    %104 = arith.addf %101, %103 : vector<2x50xf32>
    %cst_44 = arith.constant 0.000000e+00 : f32
    %105 = vector.broadcast %cst_44 : f32 to vector<2x50xf32>
    %106 = arith.maximumf %104, %105 : vector<2x50xf32>
    %c0_45 = arith.constant 0 : index
    %c0_46 = arith.constant 0 : index
    %107 = vector.load %arg6[%c0_45, %c0_46] : memref<50x10xf32, #tpu.memory_space<vmem>>, vector<50x10xf32>
    %cst_47 = arith.constant dense<0.000000e+00> : vector<2x10xf32>
    %108 = tpu.matmul %106, %107, %cst_47 {dimension_numbers = #tpu.dot_dimension_numbers<[1], [0], [0], [1], [0, 0, 1, 1], [], []>} : vector<2x50xf32>, vector<50x10xf32>, vector<2x10xf32> -> vector<2x10xf32>
    %c0_48 = arith.constant 0 : index
    %c0_49 = arith.constant 0 : index
    %109 = vector.load %arg7[%c0_48, %c0_49] : memref<1x10xf32, #tpu.memory_space<vmem>>, vector<1x10xf32>
    %110 = vector.broadcast %109 : vector<1x10xf32> to vector<2x10xf32>
    %111 = arith.addf %108, %110 : vector<2x10xf32>
    %cst_50 = arith.constant dense<0xFF800000> : vector<2xf32>
    %112 = vector.multi_reduction <maximumf>, %111, %cst_50 [1] : vector<2x10xf32> to vector<2xf32>
    %113 = vector.shape_cast %112 : vector<2xf32> to vector<2x1xf32>
    %114 = vector.broadcast %113 : vector<2x1xf32> to vector<2x10xf32>
    %115 = arith.subf %111, %114 : vector<2x10xf32>
    %116 = math.exp %115 : vector<2x10xf32>
    %cst_51 = arith.constant dense<0.000000e+00> : vector<2xf32>
    %117 = vector.multi_reduction <add>, %116, %cst_51 [1] : vector<2x10xf32> to vector<2xf32>
    %118 = vector.shape_cast %117 : vector<2xf32> to vector<2x1xf32>
    %119 = math.log %118 : vector<2x1xf32>
    %120 = vector.broadcast %119 : vector<2x1xf32> to vector<2x10xf32>
    %121 = arith.subf %115, %120 : vector<2x10xf32>
    %c0_52 = arith.constant 0 : index
    %c0_53 = arith.constant 0 : index
    %122 = vector.load %arg8[%c0_52, %c0_53] : memref<2x10xf32, #tpu.memory_space<vmem>>, vector<2x10xf32>
    tpu.vector_store %arg8[%c0_52, %c0_53], %121 {strides = array<i32>} : memref<2x10xf32, #tpu.memory_space<vmem>>, vector<2x10xf32>,
    return
  }
  func.func @transform_0(%arg0: i32) -> (i32, i32, i32, i32) {
    %c0_i32 = arith.constant 0 : i32
    %c0_i32_0 = arith.constant 0 : i32
    %c0_i32_1 = arith.constant 0 : i32
    %c0_i32_2 = arith.constant 0 : i32
    return %arg0, %c0_i32, %c0_i32_0, %c0_i32_1 : i32, i32, i32, i32
  }
  func.func @transform_1(%arg0: i32) -> (i32, i32) {
    %c0_i32 = arith.constant 0 : i32
    %c0_i32_0 = arith.constant 0 : i32
    %c0_i32_1 = arith.constant 0 : i32
    return %c0_i32, %c0_i32_0 : i32, i32
  }
  func.func @transform_2(%arg0: i32) -> (i32, i32) {
    %c0_i32 = arith.constant 0 : i32
    %c0_i32_0 = arith.constant 0 : i32
    %c0_i32_1 = arith.constant 0 : i32
    return %c0_i32, %c0_i32_0 : i32, i32
  }
  func.func @transform_3(%arg0: i32) -> (i32, i32) {
    %c0_i32 = arith.constant 0 : i32
    %c0_i32_0 = arith.constant 0 : i32
    %c0_i32_1 = arith.constant 0 : i32
    return %c0_i32, %c0_i32_0 : i32, i32
  }
  func.func @transform_4(%arg0: i32) -> (i32, i32) {
    %c0_i32 = arith.constant 0 : i32
    %c0_i32_0 = arith.constant 0 : i32
    %c0_i32_1 = arith.constant 0 : i32
    return %c0_i32, %c0_i32_0 : i32, i32
  }
  func.func @transform_5(%arg0: i32) -> (i32, i32) {
    %c0_i32 = arith.constant 0 : i32
    %c0_i32_0 = arith.constant 0 : i32
    %c0_i32_1 = arith.constant 0 : i32
    return %c0_i32, %c0_i32_0 : i32, i32
  }
  func.func @transform_6(%arg0: i32) -> (i32, i32) {
    %c0_i32 = arith.constant 0 : i32
    %c0_i32_0 = arith.constant 0 : i32
    %c0_i32_1 = arith.constant 0 : i32
    return %c0_i32, %c0_i32_0 : i32, i32
  }
  func.func @transform_7(%arg0: i32) -> (i32, i32) {
    %c0_i32 = arith.constant 0 : i32
    %c0_i32_0 = arith.constant 0 : i32
    return %arg0, %c0_i32 : i32, i32
  }
}

</mosaic_0001>

<bundles_post_ra>
// kernel: net_forward.2
= control target key start
LH: loop header
LB: loop body
LE: loop exit
PB: predicated region body
PF: predicated region fallthrough
CT: control target
= control target key end

     0   :  { %vm1552_vm0 = vcmask 80896   ;;  %s3721_s1 = inlined_call_operand.vmem [shape: f32[128,10], index: 1, kind: input, shape index: {}]   ;;  %s3722_s0 = inlined_call_operand.vmem [shape: f32[2,4,200,128], index: 0, kind: input, shape index: {}]   ;;  %s3723_s2 = inlined_call_operand.vmem [shape: f32[1,10], index: 2, kind: input, shape index: {}]   ;;  %s3724_s3 = inlined_call_operand.vmem [shape: f32[2,200,10], index: 3, kind: output, shape index: {}]  }
   0x1   :  { %v214_v0 = vld [vmem:[%s3721_s1] sm:$0xff]  ;;  %v215_v1 = vld [vmem:[%s3721_s1 + $0x8] sm:$0xff]  ;;  %v216_v2 = vld [vmem:[%s3721_s1 + $0x10] sm:$0xff] }
   0x2   :  { %v2156_v3 = vpack.c.bf16 %v215_v1, %v214_v0  ;;  %v217_v4 = vld [vmem:[%s3721_s1 + $0x18] sm:$0xff]  ;;  %v218_v6 = vld [vmem:[%s3721_s1 + $0x20] sm:$0xff]  ;;  %v219_v7 = vld [vmem:[%s3721_s1 + $0x28] sm:$0xff] }
   0x3   :  { %v2160_v5 = vpack.c.bf16 %v217_v4, %v216_v2  ;;  %v2164_v8 = vpack.c.bf16 %v219_v7, %v218_v6  ;;  %v14_v9 = vld [vmem:[%s3722_s0] sm:$0xff]  ;;  %v220_v11 = vld [vmem:[%s3721_s1 + $0x30] sm:$0xff]  ;;  %v221_v12 = vld [vmem:[%s3721_s1 + $0x38] sm:$0xff] }
   0x4   :  { %2157 = vmatprep.subr.bf16.mxu0 %v2156_v3  ;;  %2188 = vmatprep.subr.bf16.mxu1 %v2156_v3  ;;  %v114_v10 = vld [vmem:[%s3722_s0 + $0x320] sm:$0xff]  ;;  %v2168_v13 = vpack.c.bf16 %v221_v12, %v220_v11  ;;  %v223_v15 = vld [vmem:[%s3721_s1 + $0x48] sm:$0xff]  ;;  %v224_v17 = vld [vmem:[%s3721_s1 + $0x50] sm:$0xff] }
   0x5   :  { %2159 = vmatpush3.bf16.msra.mxu0 %v2156_v3  ;;  %2196 = vmatpush3.bf16.msra.mxu1 %v2156_v3  ;;  %v222_v14 = vld [vmem:[%s3721_s1 + $0x40] sm:$0xff]  ;;  %v225_v18 = vld [vmem:[%s3721_s1 + $0x58] sm:$0xff]  ;;  %v227_v21 = vld [vmem:[%s3721_s1 + $0x68] sm:$0xff] }
   0x6   :  { %2161 = vmatprep.subr.bf16.mxu0 %v2160_v5  ;;  %2189 = vmatprep.subr.bf16.mxu1 %v2160_v5  ;;  %v2172_v16 = vpack.c.bf16 %v223_v15, %v222_v14  ;;  %v2176_v19 = vpack.c.bf16 %v225_v18, %v224_v17  ;;  %v226_v20 = vld [vmem:[%s3721_s1 + $0x60] sm:$0xff]  ;;  %v228_v23 = vld [vmem:[%s3721_s1 + $0x70] sm:$0xff]  ;;  %v229_v24 = vld [vmem:[%s3721_s1 + $0x78] sm:$0xff] }
   0x7   :  { %1856 = vmatprep.mubr.f32.mxu0 %v14_v9  ;;  %2006 = vmatprep.mubr.f32.mxu1 %v114_v10  ;;  %v2180_v22 = vpack.c.bf16 %v227_v21, %v226_v20  ;;  %v2184_v25 = vpack.c.bf16 %v229_v24, %v228_v23  ;;  %v15_v26 = vld [vmem:[%s3722_s0 + $0x8] sm:$0xff]  ;;  %v16_v28 = vld [vmem:[%s3722_s0 + $0x10] sm:$0xff]  ;;  %v17_v30 = vld [vmem:[%s3722_s0 + $0x18] sm:$0xff] }
   0x8   :  { %v115_v27 = vld [vmem:[%s3722_s0 + $0x328] sm:$0xff]  ;;  %v116_v29 = vld [vmem:[%s3722_s0 + $0x330] sm:$0xff]  ;;  %v117_v31 = vld [vmem:[%s3722_s0 + $0x338] sm:$0xff] }
   0x9   :  { %2163 = vmatpush3.bf16.msra.mxu0 %v2160_v5  ;;  %2197 = vmatpush3.bf16.msra.mxu1 %v2160_v5  ;;  %v18_v32 = vld [vmem:[%s3722_s0 + $0x20] sm:$0xff]  ;;  %v19_v34 = vld [vmem:[%s3722_s0 + $0x28] sm:$0xff]  ;;  %v20_v36 = vld [vmem:[%s3722_s0 + $0x30] sm:$0xff] }
   0xa   :  { %2165 = vmatprep.subr.bf16.mxu0 %v2164_v8  ;;  %2190 = vmatprep.subr.bf16.mxu1 %v2164_v8  ;;  %v118_v33 = vld [vmem:[%s3722_s0 + $0x340] sm:$0xff]  ;;  %v119_v35 = vld [vmem:[%s3722_s0 + $0x348] sm:$0xff]  ;;  %v120_v37 = vld [vmem:[%s3722_s0 + $0x350] sm:$0xff] }
   0xb   :  { %v21_v38 = vld [vmem:[%s3722_s0 + $0x38] sm:$0xff]  ;;  %v22_v40 = vld [vmem:[%s3722_s0 + $0x40] sm:$0xff]  ;;  %v23_v42 = vld [vmem:[%s3722_s0 + $0x48] sm:$0xff] }
   0xc   :  { %v121_v39 = vld [vmem:[%s3722_s0 + $0x358] sm:$0xff]  ;;  %v122_v41 = vld [vmem:[%s3722_s0 + $0x360] sm:$0xff]  ;;  %v123_v43 = vld [vmem:[%s3722_s0 + $0x368] sm:$0xff] }
   0xd   :  { %2167 = vmatpush3.bf16.msra.mxu0 %v2164_v8  ;;  %2198 = vmatpush3.bf16.msra.mxu1 %v2164_v8  ;;  %v24_v44 = vld [vmem:[%s3722_s0 + $0x50] sm:$0xff]  ;;  %v25_v46 = vld [vmem:[%s3722_s0 + $0x58] sm:$0xff]  ;;  %v26_v48 = vld [vmem:[%s3722_s0 + $0x60] sm:$0xff] }
   0xe   :  { %2169 = vmatprep.subr.bf16.mxu0 %v2168_v13  ;;  %2191 = vmatprep.subr.bf16.mxu1 %v2168_v13  ;;  %v124_v45 = vld [vmem:[%s3722_s0 + $0x370] sm:$0xff]  ;;  %v125_v47 = vld [vmem:[%s3722_s0 + $0x378] sm:$0xff]  ;;  %v126_v49 = vld [vmem:[%s3722_s0 + $0x380] sm:$0xff] }
   0xf   :  { %v27_v50 = vld [vmem:[%s3722_s0 + $0x68] sm:$0xff]  ;;  %v28_v52 = vld [vmem:[%s3722_s0 + $0x70] sm:$0xff]  ;;  %v29_v54 = vld [vmem:[%s3722_s0 + $0x78] sm:$0xff] }
  0x10   :  { %v127_v51 = vld [vmem:[%s3722_s0 + $0x388] sm:$0xff]  ;;  %v128_v53 = vld [vmem:[%s3722_s0 + $0x390] sm:$0xff]  ;;  %v129_v55 = vld [vmem:[%s3722_s0 + $0x398] sm:$0xff] }
  0x11   :  { %2171 = vmatpush3.bf16.msra.mxu0 %v2168_v13  ;;  %2199 = vmatpush3.bf16.msra.mxu1 %v2168_v13  ;;  %v30_v56 = vld [vmem:[%s3722_s0 + $0x80] sm:$0xff]  ;;  %v31_v58 = vld [vmem:[%s3722_s0 + $0x88] sm:$0xff]  ;;  %v32_v60 = vld [vmem:[%s3722_s0 + $0x90] sm:$0xff] }
  0x12   :  { %2173 = vmatprep.subr.bf16.mxu0 %v2172_v16  ;;  %2192 = vmatprep.subr.bf16.mxu1 %v2172_v16  ;;  %v130_v57 = vld [vmem:[%s3722_s0 + $0x3a0] sm:$0xff]  ;;  %v131_v59 = vld [vmem:[%s3722_s0 + $0x3a8] sm:$0xff]  ;;  %v132_v61 = vld [vmem:[%s3722_s0 + $0x3b0] sm:$0xff] }
  0x13   :  { %v33_v62 = vld [vmem:[%s3722_s0 + $0x98] sm:$0xff]  ;;  %v34_v0 = vld [vmem:[%s3722_s0 + $0xa0] sm:$0xff]  ;;  %v35_v2 = vld [vmem:[%s3722_s0 + $0xa8] sm:$0xff] }
  0x14   :  { %v133_v63 = vld [vmem:[%s3722_s0 + $0x3b8] sm:$0xff]  ;;  %v134_v1 = vld [vmem:[%s3722_s0 + $0x3c0] sm:$0xff]  ;;  %v135_v3 = vld [vmem:[%s3722_s0 + $0x3c8] sm:$0xff] }
  0x15   :  { %2175 = vmatpush3.bf16.msra.mxu0 %v2172_v16  ;;  %2200 = vmatpush3.bf16.msra.mxu1 %v2172_v16  ;;  %v36_v4 = vld [vmem:[%s3722_s0 + $0xb0] sm:$0xff]  ;;  %v37_v6 = vld [vmem:[%s3722_s0 + $0xb8] sm:$0xff]  ;;  %v38_v8 = vld [vmem:[%s3722_s0 + $0xc0] sm:$0xff] }
  0x16   :  { %2177 = vmatprep.subr.bf16.mxu0 %v2176_v19  ;;  %2193 = vmatprep.subr.bf16.mxu1 %v2176_v19  ;;  %v136_v5 = vld [vmem:[%s3722_s0 + $0x3d0] sm:$0xff]  ;;  %v137_v7 = vld [vmem:[%s3722_s0 + $0x3d8] sm:$0xff]  ;;  %v138_v9 = vld [vmem:[%s3722_s0 + $0x3e0] sm:$0xff] }
  0x17   :  { %v39_v10 = vld [vmem:[%s3722_s0 + $0xc8] sm:$0xff]  ;;  %v40_v12 = vld [vmem:[%s3722_s0 + $0xd0] sm:$0xff]  ;;  %v41_v14 = vld [vmem:[%s3722_s0 + $0xd8] sm:$0xff] }
  0x18   :  { %v139_v11 = vld [vmem:[%s3722_s0 + $0x3e8] sm:$0xff]  ;;  %v140_v13 = vld [vmem:[%s3722_s0 + $0x3f0] sm:$0xff]  ;;  %v141_v15 = vld [vmem:[%s3722_s0 + $0x3f8] sm:$0xff] }
  0x19   :  { %2179 = vmatpush3.bf16.msra.mxu0 %v2176_v19  ;;  %2201 = vmatpush3.bf16.msra.mxu1 %v2176_v19  ;;  %v42_v16 = vld [vmem:[%s3722_s0 + $0xe0] sm:$0xff]  ;;  %v43_v18 = vld [vmem:[%s3722_s0 + $0xe8] sm:$0xff]  ;;  %v44_v20 = vld [vmem:[%s3722_s0 + $0xf0] sm:$0xff] }
  0x1a   :  { %2181 = vmatprep.subr.bf16.mxu0 %v2180_v22  ;;  %2194 = vmatprep.subr.bf16.mxu1 %v2180_v22  ;;  %v142_v17 = vld [vmem:[%s3722_s0 + $0x400] sm:$0xff]  ;;  %v143_v19 = vld [vmem:[%s3722_s0 + $0x408] sm:$0xff]  ;;  %v144_v21 = vld [vmem:[%s3722_s0 + $0x410] sm:$0xff] }
  0x1b   :  { %v145_v23 = vld [vmem:[%s3722_s0 + $0x418] sm:$0xff]  ;;  %v46_v24 = vld [vmem:[%s3722_s0 + $0x100] sm:$0xff] }
  0x1d   :  { %2183 = vmatpush3.bf16.msra.mxu0 %v2180_v22  ;;  %2202 = vmatpush3.bf16.msra.mxu1 %v2180_v22  ;;  %v45_v22 = vld [vmem:[%s3722_s0 + $0xf8] sm:$0xff] }
  0x1e   :  { %2185 = vmatprep.subr.bf16.mxu0 %v2184_v25  ;;  %2195 = vmatprep.subr.bf16.mxu1 %v2184_v25 }
  0x21   :  { %2187 = vmatpush3.bf16.msra.mxu0 %v2184_v25  ;;  %2203 = vmatpush3.bf16.msra.mxu1 %v2184_v25  ;;  %v146_v25 = vld [vmem:[%s3722_s0 + $0x420] sm:$0xff] }
  0x24   :  { %1857 = vmatmul.mubr.f32.vlgmr.msra.gmra.mrb[0].mxu0 %v15_v26  ;;  %2007 = vmatmul.mubr.f32.vlgmr.msra.gmra.mrb[0].mxu1 %v115_v27  ;;  %v47_v26 = vld [vmem:[%s3722_s0 + $0x108] sm:$0xff] }
  0x25   :  { %1859 = vmatprep.mubr.f32.mxu0 %v16_v28  ;;  %2009 = vmatprep.mubr.f32.mxu1 %v116_v29  ;;  %v147_v27 = vld [vmem:[%s3722_s0 + $0x428] sm:$0xff]  ;;  %v48_v28 = vld [vmem:[%s3722_s0 + $0x110] sm:$0xff] }
  0x26   :  { %v148_v29 = vld [vmem:[%s3722_s0 + $0x430] sm:$0xff] }
  0x28   :  { %1860 = vmatmul.mubr.f32.gmra.mrb[2].mxu0 %v17_v30  ;;  %2010 = vmatmul.mubr.f32.gmra.mrb[2].mxu1 %v117_v31  ;;  %v49_v30 = vld [vmem:[%s3722_s0 + $0x118] sm:$0xff] }
  0x29   :  { %1862 = vmatprep.mubr.f32.mxu0 %v18_v32  ;;  %2012 = vmatprep.mubr.f32.mxu1 %v118_v33  ;;  %v149_v31 = vld [vmem:[%s3722_s0 + $0x438] sm:$0xff]  ;;  %v50_v32 = vld [vmem:[%s3722_s0 + $0x120] sm:$0xff] }
  0x2a   :  { %v150_v33 = vld [vmem:[%s3722_s0 + $0x440] sm:$0xff] }
  0x2c   :  { %1863 = vmatmul.mubr.f32.gmra.mrb[4].mxu0 %v19_v34  ;;  %2013 = vmatmul.mubr.f32.gmra.mrb[4].mxu1 %v119_v35  ;;  %v51_v34 = vld [vmem:[%s3722_s0 + $0x128] sm:$0xff] }
  0x2d   :  { %1865 = vmatprep.mubr.f32.mxu0 %v20_v36  ;;  %2015 = vmatprep.mubr.f32.mxu1 %v120_v37  ;;  %v151_v35 = vld [vmem:[%s3722_s0 + $0x448] sm:$0xff]  ;;  %v52_v36 = vld [vmem:[%s3722_s0 + $0x130] sm:$0xff] }
  0x2e   :  { %v152_v37 = vld [vmem:[%s3722_s0 + $0x450] sm:$0xff] }
  0x30   :  { %1866 = vmatmul.mubr.f32.gmra.mrb[6].mxu0 %v21_v38  ;;  %2016 = vmatmul.mubr.f32.gmra.mrb[6].mxu1 %v121_v39  ;;  %v53_v38 = vld [vmem:[%s3722_s0 + $0x138] sm:$0xff] }
  0x31   :  { %1868 = vmatprep.mubr.f32.mxu0 %v22_v40  ;;  %2018 = vmatprep.mubr.f32.mxu1 %v122_v41  ;;  %v153_v39 = vld [vmem:[%s3722_s0 + $0x458] sm:$0xff]  ;;  %v54_v40 = vld [vmem:[%s3722_s0 + $0x140] sm:$0xff] }
  0x32   :  { %v154_v41 = vld [vmem:[%s3722_s0 + $0x460] sm:$0xff] }
  0x34   :  { %1869 = vmatmul.mubr.f32.gmra.mrb[8].mxu0 %v23_v42  ;;  %2019 = vmatmul.mubr.f32.gmra.mrb[8].mxu1 %v123_v43  ;;  %v55_v42 = vld [vmem:[%s3722_s0 + $0x148] sm:$0xff] }
  0x35   :  { %1871 = vmatprep.mubr.f32.mxu0 %v24_v44  ;;  %2021 = vmatprep.mubr.f32.mxu1 %v124_v45  ;;  %v155_v43 = vld [vmem:[%s3722_s0 + $0x468] sm:$0xff]  ;;  %v56_v44 = vld [vmem:[%s3722_s0 + $0x150] sm:$0xff] }
  0x36   :  { %v156_v45 = vld [vmem:[%s3722_s0 + $0x470] sm:$0xff] }
  0x38   :  { %1872 = vmatmul.mubr.f32.gmra.mrb[10].mxu0 %v25_v46  ;;  %2022 = vmatmul.mubr.f32.gmra.mrb[10].mxu1 %v125_v47  ;;  %v57_v46 = vld [vmem:[%s3722_s0 + $0x158] sm:$0xff] }
  0x39   :  { %1874 = vmatprep.mubr.f32.mxu0 %v26_v48  ;;  %2024 = vmatprep.mubr.f32.mxu1 %v126_v49  ;;  %v157_v47 = vld [vmem:[%s3722_s0 + $0x478] sm:$0xff]  ;;  %v58_v48 = vld [vmem:[%s3722_s0 + $0x160] sm:$0xff] }
  0x3a   :  { %v158_v49 = vld [vmem:[%s3722_s0 + $0x480] sm:$0xff] }
  0x3c   :  { %1875 = vmatmul.mubr.f32.gmra.mrb[12].mxu0 %v27_v50  ;;  %2025 = vmatmul.mubr.f32.gmra.mrb[12].mxu1 %v127_v51  ;;  %v59_v50 = vld [vmem:[%s3722_s0 + $0x168] sm:$0xff] }
  0x3d   :  { %1877 = vmatprep.mubr.f32.mxu0 %v28_v52  ;;  %2027 = vmatprep.mubr.f32.mxu1 %v128_v53  ;;  %v159_v51 = vld [vmem:[%s3722_s0 + $0x488] sm:$0xff]  ;;  %v60_v52 = vld [vmem:[%s3722_s0 + $0x170] sm:$0xff] }
  0x3e   :  { %v160_v53 = vld [vmem:[%s3722_s0 + $0x490] sm:$0xff] }
  0x40   :  { %1878 = vmatmul.mubr.f32.gmra.mrb[14].mxu0 %v29_v54  ;;  %2028 = vmatmul.mubr.f32.gmra.mrb[14].mxu1 %v129_v55  ;;  %v61_v54 = vld [vmem:[%s3722_s0 + $0x178] sm:$0xff] }
  0x41   :  { %1880 = vmatprep.mubr.f32.mxu0 %v30_v56  ;;  %2030 = vmatprep.mubr.f32.mxu1 %v130_v57  ;;  %v161_v55 = vld [vmem:[%s3722_s0 + $0x498] sm:$0xff]  ;;  %v62_v56 = vld [vmem:[%s3722_s0 + $0x180] sm:$0xff] }
  0x42   :  { %v162_v57 = vld [vmem:[%s3722_s0 + $0x4a0] sm:$0xff] }
  0x44   :  { %1881 = vmatmul.mubr.f32.gmra.mrb[16].mxu0 %v31_v58  ;;  %2031 = vmatmul.mubr.f32.gmra.mrb[16].mxu1 %v131_v59  ;;  %v63_v58 = vld [vmem:[%s3722_s0 + $0x188] sm:$0xff] }
  0x45   :  { %1883 = vmatprep.mubr.f32.mxu0 %v32_v60  ;;  %2033 = vmatprep.mubr.f32.mxu1 %v132_v61  ;;  %v163_v59 = vld [vmem:[%s3722_s0 + $0x4a8] sm:$0xff]  ;;  %v64_v60 = vld [vmem:[%s3722_s0 + $0x190] sm:$0xff] }
  0x46   :  { %v164_v61 = vld [vmem:[%s3722_s0 + $0x4b0] sm:$0xff] }
  0x48   :  { %1884 = vmatmul.mubr.f32.gmra.mrb[18].mxu0 %v33_v62  ;;  %2034 = vmatmul.mubr.f32.gmra.mrb[18].mxu1 %v133_v63  ;;  %v65_v62 = vld [vmem:[%s3722_s0 + $0x198] sm:$0xff] }
  0x49   :  { %1886 = vmatprep.mubr.f32.mxu0 %v34_v0  ;;  %2036 = vmatprep.mubr.f32.mxu1 %v134_v1  ;;  %v165_v63 = vld [vmem:[%s3722_s0 + $0x4b8] sm:$0xff]  ;;  %v66_v0 = vld [vmem:[%s3722_s0 + $0x1a0] sm:$0xff] }
  0x4a   :  { %v166_v1 = vld [vmem:[%s3722_s0 + $0x4c0] sm:$0xff] }
  0x4c   :  { %1887 = vmatmul.mubr.f32.gmra.mrb[20].mxu0 %v35_v2  ;;  %2037 = vmatmul.mubr.f32.gmra.mrb[20].mxu1 %v135_v3  ;;  %v67_v2 = vld [vmem:[%s3722_s0 + $0x1a8] sm:$0xff] }
  0x4d   :  { %1889 = vmatprep.mubr.f32.mxu0 %v36_v4  ;;  %2039 = vmatprep.mubr.f32.mxu1 %v136_v5  ;;  %v167_v3 = vld [vmem:[%s3722_s0 + $0x4c8] sm:$0xff]  ;;  %v68_v4 = vld [vmem:[%s3722_s0 + $0x1b0] sm:$0xff] }
  0x4e   :  { %v168_v5 = vld [vmem:[%s3722_s0 + $0x4d0] sm:$0xff] }
  0x50   :  { %1890 = vmatmul.mubr.f32.gmra.mrb[22].mxu0 %v37_v6  ;;  %2040 = vmatmul.mubr.f32.gmra.mrb[22].mxu1 %v137_v7  ;;  %v69_v6 = vld [vmem:[%s3722_s0 + $0x1b8] sm:$0xff] }
  0x51   :  { %1892 = vmatprep.mubr.f32.mxu0 %v38_v8  ;;  %2042 = vmatprep.mubr.f32.mxu1 %v138_v9  ;;  %v169_v7 = vld [vmem:[%s3722_s0 + $0x4d8] sm:$0xff]  ;;  %v70_v8 = vld [vmem:[%s3722_s0 + $0x1c0] sm:$0xff] }
  0x52   :  { %v170_v9 = vld [vmem:[%s3722_s0 + $0x4e0] sm:$0xff] }
  0x54   :  { %1893 = vmatmul.mubr.f32.gmra.mrb[24].mxu0 %v39_v10  ;;  %2043 = vmatmul.mubr.f32.gmra.mrb[24].mxu1 %v139_v11  ;;  %v71_v10 = vld [vmem:[%s3722_s0 + $0x1c8] sm:$0xff] }
  0x55   :  { %1895 = vmatprep.mubr.f32.mxu0 %v40_v12  ;;  %2045 = vmatprep.mubr.f32.mxu1 %v140_v13  ;;  %v171_v11 = vld [vmem:[%s3722_s0 + $0x4e8] sm:$0xff]  ;;  %v72_v12 = vld [vmem:[%s3722_s0 + $0x1d0] sm:$0xff] }
  0x56   :  { %v172_v13 = vld [vmem:[%s3722_s0 + $0x4f0] sm:$0xff] }
  0x58   :  { %1896 = vmatmul.mubr.f32.gmra.mrb[26].mxu0 %v41_v14  ;;  %2046 = vmatmul.mubr.f32.gmra.mrb[26].mxu1 %v141_v15  ;;  %v73_v14 = vld [vmem:[%s3722_s0 + $0x1d8] sm:$0xff] }
  0x59   :  { %1898 = vmatprep.mubr.f32.mxu0 %v42_v16  ;;  %2048 = vmatprep.mubr.f32.mxu1 %v142_v17  ;;  %v173_v15 = vld [vmem:[%s3722_s0 + $0x4f8] sm:$0xff]  ;;  %v74_v16 = vld [vmem:[%s3722_s0 + $0x1e0] sm:$0xff] }
  0x5a   :  { %v174_v17 = vld [vmem:[%s3722_s0 + $0x500] sm:$0xff] }
  0x5c   :  { %1899 = vmatmul.mubr.f32.gmra.mrb[28].mxu0 %v43_v18  ;;  %2049 = vmatmul.mubr.f32.gmra.mrb[28].mxu1 %v143_v19  ;;  %v75_v18 = vld [vmem:[%s3722_s0 + $0x1e8] sm:$0xff] }
  0x5d   :  { %1901 = vmatprep.mubr.f32.mxu0 %v44_v20  ;;  %2051 = vmatprep.mubr.f32.mxu1 %v144_v21  ;;  %v175_v19 = vld [vmem:[%s3722_s0 + $0x508] sm:$0xff]  ;;  %v76_v20 = vld [vmem:[%s3722_s0 + $0x1f0] sm:$0xff] }
  0x5e   :  { %v176_v21 = vld [vmem:[%s3722_s0 + $0x510] sm:$0xff] }
  0x60   :  { %1902 = vmatmul.mubr.f32.gmra.mrb[30].mxu0 %v45_v22  ;;  %2052 = vmatmul.mubr.f32.gmra.mrb[30].mxu1 %v145_v23  ;;  %v77_v22 = vld [vmem:[%s3722_s0 + $0x1f8] sm:$0xff] }
  0x61   :  { %1904 = vmatprep.mubr.f32.mxu0 %v46_v24  ;;  %2054 = vmatprep.mubr.f32.mxu1 %v146_v25  ;;  %v177_v23 = vld [vmem:[%s3722_s0 + $0x518] sm:$0xff]  ;;  %v78_v24 = vld [vmem:[%s3722_s0 + $0x200] sm:$0xff] }
  0x62   :  { %v178_v25 = vld [vmem:[%s3722_s0 + $0x520] sm:$0xff] }
  0x64   :  { %1905 = vmatmul.mubr.f32.gmra.mrb[32].mxu0 %v47_v26  ;;  %2055 = vmatmul.mubr.f32.gmra.mrb[32].mxu1 %v147_v27  ;;  %v79_v26 = vld [vmem:[%s3722_s0 + $0x208] sm:$0xff] }
  0x65   :  { %1907 = vmatprep.mubr.f32.mxu0 %v48_v28  ;;  %2057 = vmatprep.mubr.f32.mxu1 %v148_v29  ;;  %v179_v27 = vld [vmem:[%s3722_s0 + $0x528] sm:$0xff]  ;;  %v80_v28 = vld [vmem:[%s3722_s0 + $0x210] sm:$0xff] }
  0x66   :  { %v180_v29 = vld [vmem:[%s3722_s0 + $0x530] sm:$0xff] }
  0x68   :  { %1908 = vmatmul.mubr.f32.gmra.mrb[34].mxu0 %v49_v30  ;;  %2058 = vmatmul.mubr.f32.gmra.mrb[34].mxu1 %v149_v31  ;;  %v81_v30 = vld [vmem:[%s3722_s0 + $0x218] sm:$0xff] }
  0x69   :  { %1910 = vmatprep.mubr.f32.mxu0 %v50_v32  ;;  %2060 = vmatprep.mubr.f32.mxu1 %v150_v33  ;;  %v181_v31 = vld [vmem:[%s3722_s0 + $0x538] sm:$0xff]  ;;  %v82_v32 = vld [vmem:[%s3722_s0 + $0x220] sm:$0xff] }
  0x6a   :  { %v182_v33 = vld [vmem:[%s3722_s0 + $0x540] sm:$0xff] }
  0x6c   :  { %1911 = vmatmul.mubr.f32.gmra.mrb[36].mxu0 %v51_v34  ;;  %2061 = vmatmul.mubr.f32.gmra.mrb[36].mxu1 %v151_v35  ;;  %v83_v34 = vld [vmem:[%s3722_s0 + $0x228] sm:$0xff] }
  0x6d   :  { %1913 = vmatprep.mubr.f32.mxu0 %v52_v36  ;;  %2063 = vmatprep.mubr.f32.mxu1 %v152_v37  ;;  %v183_v35 = vld [vmem:[%s3722_s0 + $0x548] sm:$0xff]  ;;  %v84_v36 = vld [vmem:[%s3722_s0 + $0x230] sm:$0xff] }
  0x6e   :  { %v184_v37 = vld [vmem:[%s3722_s0 + $0x550] sm:$0xff] }
  0x70   :  { %1914 = vmatmul.mubr.f32.gmra.mrb[38].mxu0 %v53_v38  ;;  %2064 = vmatmul.mubr.f32.gmra.mrb[38].mxu1 %v153_v39  ;;  %v85_v38 = vld [vmem:[%s3722_s0 + $0x238] sm:$0xff] }
  0x71   :  { %1916 = vmatprep.mubr.f32.mxu0 %v54_v40  ;;  %2066 = vmatprep.mubr.f32.mxu1 %v154_v41  ;;  %v185_v39 = vld [vmem:[%s3722_s0 + $0x558] sm:$0xff]  ;;  %v86_v40 = vld [vmem:[%s3722_s0 + $0x240] sm:$0xff] }
  0x72   :  { %v186_v41 = vld [vmem:[%s3722_s0 + $0x560] sm:$0xff] }
  0x74   :  { %1917 = vmatmul.mubr.f32.gmra.mrb[40].mxu0 %v55_v42  ;;  %2067 = vmatmul.mubr.f32.gmra.mrb[40].mxu1 %v155_v43  ;;  %v87_v42 = vld [vmem:[%s3722_s0 + $0x248] sm:$0xff] }
  0x75   :  { %1919 = vmatprep.mubr.f32.mxu0 %v56_v44  ;;  %2069 = vmatprep.mubr.f32.mxu1 %v156_v45  ;;  %v187_v43 = vld [vmem:[%s3722_s0 + $0x568] sm:$0xff]  ;;  %v88_v44 = vld [vmem:[%s3722_s0 + $0x250] sm:$0xff] }
  0x76   :  { %v188_v45 = vld [vmem:[%s3722_s0 + $0x570] sm:$0xff] }
  0x78   :  { %1920 = vmatmul.mubr.f32.gmra.mrb[42].mxu0 %v57_v46  ;;  %2070 = vmatmul.mubr.f32.gmra.mrb[42].mxu1 %v157_v47  ;;  %v89_v46 = vld [vmem:[%s3722_s0 + $0x258] sm:$0xff] }
  0x79   :  { %1922 = vmatprep.mubr.f32.mxu0 %v58_v48  ;;  %2072 = vmatprep.mubr.f32.mxu1 %v158_v49  ;;  %v189_v47 = vld [vmem:[%s3722_s0 + $0x578] sm:$0xff]  ;;  %v90_v48 = vld [vmem:[%s3722_s0 + $0x260] sm:$0xff] }
  0x7a   :  { %v190_v49 = vld [vmem:[%s3722_s0 + $0x580] sm:$0xff] }
  0x7c   :  { %1923 = vmatmul.mubr.f32.gmra.mrb[44].mxu0 %v59_v50  ;;  %2073 = vmatmul.mubr.f32.gmra.mrb[44].mxu1 %v159_v51  ;;  %v91_v50 = vld [vmem:[%s3722_s0 + $0x268] sm:$0xff] }
  0x7d   :  { %1925 = vmatprep.mubr.f32.mxu0 %v60_v52  ;;  %2075 = vmatprep.mubr.f32.mxu1 %v160_v53  ;;  %v191_v51 = vld [vmem:[%s3722_s0 + $0x588] sm:$0xff]  ;;  %v92_v52 = vld [vmem:[%s3722_s0 + $0x270] sm:$0xff] }
  0x7e   :  { %v192_v53 = vld [vmem:[%s3722_s0 + $0x590] sm:$0xff] }
  0x80   :  { %1926 = vmatmul.mubr.f32.gmra.mrb[46].mxu0 %v61_v54  ;;  %2076 = vmatmul.mubr.f32.gmra.mrb[46].mxu1 %v161_v55  ;;  %v93_v54 = vld [vmem:[%s3722_s0 + $0x278] sm:$0xff] }
  0x81   :  { %1928 = vmatprep.mubr.f32.mxu0 %v62_v56  ;;  %2078 = vmatprep.mubr.f32.mxu1 %v162_v57  ;;  %v193_v55 = vld [vmem:[%s3722_s0 + $0x598] sm:$0xff]  ;;  %v94_v56 = vld [vmem:[%s3722_s0 + $0x280] sm:$0xff] }
  0x82   :  { %v194_v57 = vld [vmem:[%s3722_s0 + $0x5a0] sm:$0xff] }
  0x84   :  { %1929 = vmatmul.mubr.f32.gmra.mrb[48].mxu0 %v63_v58  ;;  %2079 = vmatmul.mubr.f32.gmra.mrb[48].mxu1 %v163_v59  ;;  %v95_v58 = vld [vmem:[%s3722_s0 + $0x288] sm:$0xff] }
  0x85   :  { %1931 = vmatprep.mubr.f32.mxu0 %v64_v60  ;;  %2081 = vmatprep.mubr.f32.mxu1 %v164_v61  ;;  %v195_v59 = vld [vmem:[%s3722_s0 + $0x5a8] sm:$0xff]  ;;  %v96_v60 = vld [vmem:[%s3722_s0 + $0x290] sm:$0xff] }
  0x86   :  { %v196_v61 = vld [vmem:[%s3722_s0 + $0x5b0] sm:$0xff] }
  0x88   :  { %1932 = vmatmul.mubr.f32.gmra.mrb[50].mxu0 %v65_v62  ;;  %2082 = vmatmul.mubr.f32.gmra.mrb[50].mxu1 %v165_v63  ;;  %v97_v62 = vld [vmem:[%s3722_s0 + $0x298] sm:$0xff] }
  0x89   :  { %1934 = vmatprep.mubr.f32.mxu0 %v66_v0  ;;  %2084 = vmatprep.mubr.f32.mxu1 %v166_v1  ;;  %v197_v63 = vld [vmem:[%s3722_s0 + $0x5b8] sm:$0xff]  ;;  %v98_v0 = vld [vmem:[%s3722_s0 + $0x2a0] sm:$0xff] }
  0x8a   :  { %v198_v1 = vld [vmem:[%s3722_s0 + $0x5c0] sm:$0xff] }
  0x8c   :  { %1935 = vmatmul.mubr.f32.gmra.mrb[52].mxu0 %v67_v2  ;;  %2085 = vmatmul.mubr.f32.gmra.mrb[52].mxu1 %v167_v3  ;;  %v99_v2 = vld [vmem:[%s3722_s0 + $0x2a8] sm:$0xff] }
  0x8d   :  { %1937 = vmatprep.mubr.f32.mxu0 %v68_v4  ;;  %2087 = vmatprep.mubr.f32.mxu1 %v168_v5  ;;  %v199_v3 = vld [vmem:[%s3722_s0 + $0x5c8] sm:$0xff]  ;;  %v100_v4 = vld [vmem:[%s3722_s0 + $0x2b0] sm:$0xff] }
  0x8e   :  { %v200_v5 = vld [vmem:[%s3722_s0 + $0x5d0] sm:$0xff] }
  0x90   :  { %1938 = vmatmul.mubr.f32.gmra.mrb[54].mxu0 %v69_v6  ;;  %2088 = vmatmul.mubr.f32.gmra.mrb[54].mxu1 %v169_v7  ;;  %v101_v6 = vld [vmem:[%s3722_s0 + $0x2b8] sm:$0xff] }
  0x91   :  { %1940 = vmatprep.mubr.f32.mxu0 %v70_v8  ;;  %2090 = vmatprep.mubr.f32.mxu1 %v170_v9  ;;  %v201_v7 = vld [vmem:[%s3722_s0 + $0x5d8] sm:$0xff]  ;;  %v102_v8 = vld [vmem:[%s3722_s0 + $0x2c0] sm:$0xff] }
  0x92   :  { %v202_v9 = vld [vmem:[%s3722_s0 + $0x5e0] sm:$0xff] }
  0x94   :  { %1941 = vmatmul.mubr.f32.gmra.mrb[56].mxu0 %v71_v10  ;;  %2091 = vmatmul.mubr.f32.gmra.mrb[56].mxu1 %v171_v11  ;;  %v103_v10 = vld [vmem:[%s3722_s0 + $0x2c8] sm:$0xff] }
  0x95   :  { %1943 = vmatprep.mubr.f32.mxu0 %v72_v12  ;;  %2093 = vmatprep.mubr.f32.mxu1 %v172_v13  ;;  %v203_v11 = vld [vmem:[%s3722_s0 + $0x5e8] sm:$0xff]  ;;  %v104_v12 = vld [vmem:[%s3722_s0 + $0x2d0] sm:$0xff] }
  0x96   :  { %v204_v13 = vld [vmem:[%s3722_s0 + $0x5f0] sm:$0xff] }
  0x98   :  { %1944 = vmatmul.mubr.f32.gmra.mrb[58].mxu0 %v73_v14  ;;  %2094 = vmatmul.mubr.f32.gmra.mrb[58].mxu1 %v173_v15  ;;  %v105_v14 = vld [vmem:[%s3722_s0 + $0x2d8] sm:$0xff] }
  0x99   :  { %1946 = vmatprep.mubr.f32.mxu0 %v74_v16  ;;  %2096 = vmatprep.mubr.f32.mxu1 %v174_v17  ;;  %v205_v15 = vld [vmem:[%s3722_s0 + $0x5f8] sm:$0xff]  ;;  %v106_v16 = vld [vmem:[%s3722_s0 + $0x2e0] sm:$0xff] }
  0x9a   :  { %v206_v17 = vld [vmem:[%s3722_s0 + $0x600] sm:$0xff] }
  0x9c   :  { %1947 = vmatmul.mubr.f32.gmra.mrb[60].mxu0 %v75_v18  ;;  %2097 = vmatmul.mubr.f32.gmra.mrb[60].mxu1 %v175_v19  ;;  %v107_v18 = vld [vmem:[%s3722_s0 + $0x2e8] sm:$0xff] }
  0x9d   :  { %1949 = vmatprep.mubr.f32.mxu0 %v76_v20  ;;  %2099 = vmatprep.mubr.f32.mxu1 %v176_v21  ;;  %v207_v19 = vld [vmem:[%s3722_s0 + $0x608] sm:$0xff]  ;;  %v108_v20 = vld [vmem:[%s3722_s0 + $0x2f0] sm:$0xff] }
  0x9e   :  { %v208_v21 = vld [vmem:[%s3722_s0 + $0x610] sm:$0xff] }
  0xa0   :  { %1950 = vmatmul.mubr.f32.gmra.mrb[62].mxu0 %v77_v22  ;;  %2100 = vmatmul.mubr.f32.gmra.mrb[62].mxu1 %v177_v23  ;;  %v109_v22 = vld [vmem:[%s3722_s0 + $0x2f8] sm:$0xff] }
  0xa1   :  { %1952 = vmatprep.mubr.f32.mxu0 %v78_v24  ;;  %2102 = vmatprep.mubr.f32.mxu1 %v178_v25  ;;  %v209_v23 = vld [vmem:[%s3722_s0 + $0x618] sm:$0xff]  ;;  %v110_v24 = vld [vmem:[%s3722_s0 + $0x300] sm:$0xff] }
  0xa2   :  { %v210_v25 = vld [vmem:[%s3722_s0 + $0x620] sm:$0xff] }
  0xa4   :  { %1953 = vmatmul.mubr.f32.gmra.mrb[64].mxu0 %v79_v26  ;;  %2103 = vmatmul.mubr.f32.gmra.mrb[64].mxu1 %v179_v27  ;;  %v111_v26 = vld [vmem:[%s3722_s0 + $0x308] sm:$0xff] }
  0xa5   :  { %1955 = vmatprep.mubr.f32.mxu0 %v80_v28  ;;  %2105 = vmatprep.mubr.f32.mxu1 %v180_v29  ;;  %v211_v27 = vld [vmem:[%s3722_s0 + $0x628] sm:$0xff]  ;;  %v112_v28 = vld [vmem:[%s3722_s0 + $0x310] sm:$0xff] }
  0xa6   :  { %v212_v29 = vld [vmem:[%s3722_s0 + $0x630] sm:$0xff] }
  0xa8   :  { %1956 = vmatmul.mubr.f32.gmra.mrb[66].mxu0 %v81_v30  ;;  %2106 = vmatmul.mubr.f32.gmra.mrb[66].mxu1 %v181_v31  ;;  %v113_v30 = vld [vmem:[%s3722_s0 + $0x318] sm:$0xff] }
  0xa9   :  { %1958 = vmatprep.mubr.f32.mxu0 %v82_v32  ;;  %2108 = vmatprep.mubr.f32.mxu1 %v182_v33  ;;  %v213_v31 = vld [vmem:[%s3722_s0 + $0x638] sm:$0xff] }
  0xac   :  { %1959 = vmatmul.mubr.f32.gmra.mrb[68].mxu0 %v83_v34  ;;  %2109 = vmatmul.mubr.f32.gmra.mrb[68].mxu1 %v183_v35 }
  0xad   :  { %1961 = vmatprep.mubr.f32.mxu0 %v84_v36  ;;  %2111 = vmatprep.mubr.f32.mxu1 %v184_v37 }
  0xb0   :  { %1962 = vmatmul.mubr.f32.gmra.mrb[70].mxu0 %v85_v38  ;;  %2112 = vmatmul.mubr.f32.gmra.mrb[70].mxu1 %v185_v39 }
  0xb1   :  { %1964 = vmatprep.mubr.f32.mxu0 %v86_v40  ;;  %2114 = vmatprep.mubr.f32.mxu1 %v186_v41 }
  0xb4   :  { %1965 = vmatmul.mubr.f32.gmra.mrb[72].mxu0 %v87_v42  ;;  %2115 = vmatmul.mubr.f32.gmra.mrb[72].mxu1 %v187_v43 }
  0xb5   :  { %1967 = vmatprep.mubr.f32.mxu0 %v88_v44  ;;  %2117 = vmatprep.mubr.f32.mxu1 %v188_v45 }
  0xb8   :  { %1968 = vmatmul.mubr.f32.gmra.mrb[74].mxu0 %v89_v46  ;;  %2118 = vmatmul.mubr.f32.gmra.mrb[74].mxu1 %v189_v47 }
  0xb9   :  { %1970 = vmatprep.mubr.f32.mxu0 %v90_v48  ;;  %2120 = vmatprep.mubr.f32.mxu1 %v190_v49 }
  0xbc   :  { %1971 = vmatmul.mubr.f32.gmra.mrb[76].mxu0 %v91_v50  ;;  %2121 = vmatmul.mubr.f32.gmra.mrb[76].mxu1 %v191_v51 }
  0xbd   :  { %1973 = vmatprep.mubr.f32.mxu0 %v92_v52  ;;  %2123 = vmatprep.mubr.f32.mxu1 %v192_v53 }
  0xc0   :  { %1974 = vmatmul.mubr.f32.gmra.mrb[78].mxu0 %v93_v54  ;;  %2124 = vmatmul.mubr.f32.gmra.mrb[78].mxu1 %v193_v55 }
  0xc1   :  { %1976 = vmatprep.mubr.f32.mxu0 %v94_v56  ;;  %2126 = vmatprep.mubr.f32.mxu1 %v194_v57 }
  0xc4   :  { %1977 = vmatmul.mubr.f32.gmra.mrb[80].mxu0 %v95_v58  ;;  %2127 = vmatmul.mubr.f32.gmra.mrb[80].mxu1 %v195_v59 }
  0xc5   :  { %1979 = vmatprep.mubr.f32.mxu0 %v96_v60  ;;  %2129 = vmatprep.mubr.f32.mxu1 %v196_v61 }
  0xc8   :  { %1980 = vmatmul.mubr.f32.gmra.mrb[82].mxu0 %v97_v62  ;;  %2130 = vmatmul.mubr.f32.gmra.mrb[82].mxu1 %v197_v63 }
  0xc9   :  { %1982 = vmatprep.mubr.f32.mxu0 %v98_v0  ;;  %2132 = vmatprep.mubr.f32.mxu1 %v198_v1 }
  0xcc   :  { %1983 = vmatmul.mubr.f32.gmra.mrb[84].mxu0 %v99_v2  ;;  %2133 = vmatmul.mubr.f32.gmra.mrb[84].mxu1 %v199_v3 }
  0xcd   :  { %1985 = vmatprep.mubr.f32.mxu0 %v100_v4  ;;  %2135 = vmatprep.mubr.f32.mxu1 %v200_v5 }
  0xd0   :  { %1986 = vmatmul.mubr.f32.gmra.mrb[86].mxu0 %v101_v6  ;;  %2136 = vmatmul.mubr.f32.gmra.mrb[86].mxu1 %v201_v7 }
  0xd1   :  { %1988 = vmatprep.mubr.f32.mxu0 %v102_v8  ;;  %2138 = vmatprep.mubr.f32.mxu1 %v202_v9 }
  0xd4   :  { %1989 = vmatmul.mubr.f32.gmra.mrb[88].mxu0 %v103_v10  ;;  %2139 = vmatmul.mubr.f32.gmra.mrb[88].mxu1 %v203_v11 }
  0xd5   :  { %1991 = vmatprep.mubr.f32.mxu0 %v104_v12  ;;  %2141 = vmatprep.mubr.f32.mxu1 %v204_v13 }
  0xd8   :  { %1992 = vmatmul.mubr.f32.gmra.mrb[90].mxu0 %v105_v14  ;;  %2142 = vmatmul.mubr.f32.gmra.mrb[90].mxu1 %v205_v15 }
  0xd9   :  { %1994 = vmatprep.mubr.f32.mxu0 %v106_v16  ;;  %2144 = vmatprep.mubr.f32.mxu1 %v206_v17 }
  0xdc   :  { %1995 = vmatmul.mubr.f32.gmra.mrb[92].mxu0 %v107_v18  ;;  %2145 = vmatmul.mubr.f32.gmra.mrb[92].mxu1 %v207_v19 }
  0xdd   :  { %1997 = vmatprep.mubr.f32.mxu0 %v108_v20  ;;  %2147 = vmatprep.mubr.f32.mxu1 %v208_v21 }
  0xe0   :  { %1998 = vmatmul.mubr.f32.gmra.mrb[94].mxu0 %v109_v22  ;;  %2148 = vmatmul.mubr.f32.gmra.mrb[94].mxu1 %v209_v23 }
  0xe1   :  { %2000 = vmatprep.mubr.f32.mxu0 %v110_v24  ;;  %2150 = vmatprep.mubr.f32.mxu1 %v210_v25 }
  0xe4   :  { %2001 = vmatmul.mubr.f32.gmra.mrb[96].mxu0 %v111_v26  ;;  %2151 = vmatmul.mubr.f32.gmra.mrb[96].mxu1 %v211_v27 }
  0xe5   :  { %2003 = vmatprep.mubr.f32.mxu0 %v112_v28  ;;  %2153 = vmatprep.mubr.f32.mxu1 %v212_v29 }
  0xe8   :  { %2004 = vmatmul.mubr.f32.gmra.mrb[98].mxu0 %v113_v30  ;;  %2154 = vmatmul.mubr.f32.gmra.mrb[98].mxu1 %v213_v31 }
  0xf7   :  { %v2872_v32 = vpop.f32.mrb[0].mxu0  ;;  %v2874_v33 = vpop.f32.mrb[0].mxu1 }
  0xf8   :  { %3799 = vst [vmem:[#allocation2_spill] sm:$0xff] %v2874_v33  ;;  %v2876_v34 = vpop.f32.mrb[1].mxu0  ;;  %v2878_v35 = vpop.f32.mrb[1].mxu1 }
  0xfb   :  { %v2880_v36 = vpop.f32.mrb[2].mxu0  ;;  %v2882_v37 = vpop.f32.mrb[2].mxu1 }
  0xfc   :  { %3800 = vst [vmem:[#allocation3_spill] sm:$0xff] %v2882_v37  ;;  %v2884_v38 = vpop.f32.mrb[3].mxu0  ;;  %v2886_v39 = vpop.f32.mrb[3].mxu1 }
  0xff   :  { %v2888_v40 = vpop.f32.mrb[4].mxu0  ;;  %v2890_v41 = vpop.f32.mrb[4].mxu1 }
 0x100   :  { %3801 = vst [vmem:[#allocation4_spill] sm:$0xff] %v2890_v41  ;;  %v2892_v42 = vpop.f32.mrb[5].mxu0  ;;  %v2894_v43 = vpop.f32.mrb[5].mxu1 }
 0x101   :  { %3802 = vst [vmem:[#allocation5_spill] sm:$0xff] %v2894_v43 }
 0x103   :  { %v2896_v44 = vpop.f32.mrb[6].mxu0  ;;  %v2898_v45 = vpop.f32.mrb[6].mxu1 }
 0x104   :  { %3803 = vst [vmem:[#allocation6_spill] sm:$0xff] %v2898_v45  ;;  %v2900_v46 = vpop.f32.mrb[7].mxu0  ;;  %v2902_v47 = vpop.f32.mrb[7].mxu1 }
 0x105   :  { %3804 = vst [vmem:[#allocation7_spill] sm:$0xff] %v2902_v47 }
 0x107   :  { %v2904_v48 = vpop.f32.mrb[8].mxu0  ;;  %v2906_v49 = vpop.f32.mrb[8].mxu1 }
 0x108   :  { %3805 = vst [vmem:[#allocation8_spill] sm:$0xff] %v2906_v49  ;;  %v2908_v50 = vpop.f32.mrb[9].mxu0  ;;  %v2910_v51 = vpop.f32.mrb[9].mxu1 }
 0x109   :  { %3806 = vst [vmem:[#allocation9_spill] sm:$0xff] %v2910_v51 }
 0x10b   :  { %v2912_v52 = vpop.f32.mrb[10].mxu0  ;;  %v2914_v53 = vpop.f32.mrb[10].mxu1 }
 0x10c   :  { %3807 = vst [vmem:[#allocation10_spill] sm:$0xff] %v2912_v52  ;;  %3808 = vst [vmem:[#allocation11_spill] sm:$0xff] %v2914_v53  ;;  %v2916_v54 = vpop.f32.mrb[11].mxu0  ;;  %v2918_v55 = vpop.f32.mrb[11].mxu1 }
 0x10d   :  { %3809 = vst [vmem:[#allocation12_spill] sm:$0xff] %v2918_v55 }
 0x10f   :  { %v2920_v56 = vpop.f32.mrb[12].mxu0  ;;  %v2922_v57 = vpop.f32.mrb[12].mxu1 }
 0x110   :  { %3810 = vst [vmem:[#allocation13_spill] sm:$0xff] %v2920_v56  ;;  %3811 = vst [vmem:[#allocation14_spill] sm:$0xff] %v2922_v57  ;;  %v2924_v58 = vpop.f32.mrb[13].mxu0  ;;  %v2926_v59 = vpop.f32.mrb[13].mxu1 }
 0x111   :  { %3812 = vst [vmem:[#allocation15_spill] sm:$0xff] %v2924_v58  ;;  %3813 = vst [vmem:[#allocation16_spill] sm:$0xff] %v2926_v59 }
 0x113   :  { %v2928_v60 = vpop.f32.mrb[14].mxu0  ;;  %v2930_v61 = vpop.f32.mrb[14].mxu1 }
 0x114   :  { %3814 = vst [vmem:[#allocation17_spill] sm:$0xff] %v2928_v60  ;;  %3815 = vst [vmem:[#allocation18_spill] sm:$0xff] %v2930_v61  ;;  %v2932_v62 = vpop.f32.mrb[15].mxu0  ;;  %v2934_v63 = vpop.f32.mrb[15].mxu1 }
 0x115   :  { %3816 = vst [vmem:[#allocation19_spill] sm:$0xff] %v2932_v62  ;;  %3817 = vst [vmem:[#allocation20_spill] sm:$0xff] %v2934_v63 }
 0x117   :  { %v2936_v0 = vpop.f32.mrb[16].mxu0  ;;  %v2938_v1 = vpop.f32.mrb[16].mxu1 }
 0x118   :  { %3818 = vst [vmem:[#allocation21_spill] sm:$0xff] %v2936_v0  ;;  %3819 = vst [vmem:[#allocation22_spill] sm:$0xff] %v2938_v1  ;;  %v2940_v2 = vpop.f32.mrb[17].mxu0  ;;  %v2942_v3 = vpop.f32.mrb[17].mxu1 }
 0x119   :  { %3820 = vst [vmem:[#allocation23_spill] sm:$0xff] %v2940_v2  ;;  %3821 = vst [vmem:[#allocation24_spill] sm:$0xff] %v2942_v3 }
 0x11b   :  { %v2944_v4 = vpop.f32.mrb[18].mxu0  ;;  %v2946_v5 = vpop.f32.mrb[18].mxu1 }
 0x11c   :  { %3822 = vst [vmem:[#allocation25_spill] sm:$0xff] %v2944_v4  ;;  %3823 = vst [vmem:[#allocation26_spill] sm:$0xff] %v2946_v5  ;;  %v2948_v6 = vpop.f32.mrb[19].mxu0  ;;  %v2950_v7 = vpop.f32.mrb[19].mxu1 }
 0x11d   :  { %3824 = vst [vmem:[#allocation27_spill] sm:$0xff] %v2948_v6  ;;  %3825 = vst [vmem:[#allocation28_spill] sm:$0xff] %v2950_v7 }
 0x11f   :  { %v2952_v8 = vpop.f32.mrb[20].mxu0  ;;  %v2954_v9 = vpop.f32.mrb[20].mxu1 }
 0x120   :  { %3826 = vst [vmem:[#allocation29_spill] sm:$0xff] %v2952_v8  ;;  %3827 = vst [vmem:[#allocation30_spill] sm:$0xff] %v2954_v9  ;;  %v2956_v10 = vpop.f32.mrb[21].mxu0  ;;  %v2958_v11 = vpop.f32.mrb[21].mxu1 }
 0x121   :  { %3828 = vst [vmem:[#allocation31_spill] sm:$0xff] %v2956_v10  ;;  %3829 = vst [vmem:[#allocation32_spill] sm:$0xff] %v2958_v11 }
 0x123   :  { %v2960_v12 = vpop.f32.mrb[22].mxu0  ;;  %v2962_v13 = vpop.f32.mrb[22].mxu1 }
 0x124   :  { %3830 = vst [vmem:[#allocation33_spill] sm:$0xff] %v2960_v12  ;;  %3831 = vst [vmem:[#allocation34_spill] sm:$0xff] %v2962_v13  ;;  %v2964_v14 = vpop.f32.mrb[23].mxu0  ;;  %v2966_v15 = vpop.f32.mrb[23].mxu1 }
 0x125   :  { %3832 = vst [vmem:[#allocation35_spill] sm:$0xff] %v2964_v14  ;;  %3833 = vst [vmem:[#allocation36_spill] sm:$0xff] %v2966_v15 }
 0x127   :  { %v2968_v16 = vpop.f32.mrb[24].mxu0  ;;  %v2970_v17 = vpop.f32.mrb[24].mxu1 }
 0x128   :  { %v2976_v20 = vpop.f32.mrb[25].mxu0  ;;  %v2978_v21 = vpop.f32.mrb[25].mxu1 }
 0x129   :  { %3834 = vst [vmem:[#allocation37_spill] sm:$0xff] %v2976_v20  ;;  %3835 = vst [vmem:[#allocation38_spill] sm:$0xff] %v2978_v21 }
 0x12b   :  { %v2980_v22 = vpop.f32.mrb[26].mxu0  ;;  %v2982_v23 = vpop.f32.mrb[26].mxu1 }
 0x12c   :  { %v2988_v26 = vpop.f32.mrb[27].mxu0  ;;  %v2990_v27 = vpop.f32.mrb[27].mxu1 }
 0x12d   :  { %3836 = vst [vmem:[#allocation39_spill] sm:$0xff] %v2990_v27 }
 0x12f   :  { %v2996_v30 = vpop.f32.mrb[28].mxu0  ;;  %v2998_v31 = vpop.f32.mrb[28].mxu1 }
 0x130   :  { %3837 = vst [vmem:[#allocation40_spill] sm:$0xff] %v2998_v31  ;;  %v3004_v19 = vpop.f32.mrb[29].mxu0  ;;  %v3006_v18 = vpop.f32.mrb[29].mxu1 }
 0x131   :  { %3838 = vst [vmem:[#allocation41_spill] sm:$0xff] %v3006_v18 }
 0x133   :  { %v3012_v27 = vpop.f32.mrb[30].mxu0  ;;  %v3014_v33 = vpop.f32.mrb[30].mxu1 }
 0x134   :  { %3839 = vst [vmem:[#allocation42_spill] sm:$0xff] %v3014_v33  ;;  %v3020_v31 = vpop.f32.mrb[31].mxu0  ;;  %v3022_v43 = vpop.f32.mrb[31].mxu1 }
 0x135   :  { %3840 = vst [vmem:[#allocation43_spill] sm:$0xff] %v3022_v43 }
 0x137   :  { %v3028_v18 = vpop.f32.mrb[32].mxu0  ;;  %v3030_v37 = vpop.f32.mrb[32].mxu1 }
 0x138   :  { %3841 = vst [vmem:[#allocation44_spill] sm:$0xff] %v3030_v37  ;;  %v3036_v33 = vpop.f32.mrb[33].mxu0  ;;  %v3038_v47 = vpop.f32.mrb[33].mxu1 }
 0x139   :  { %3842 = vst [vmem:[#allocation45_spill] sm:$0xff] %v3038_v47 }
 0x13b   :  { %v3044_v43 = vpop.f32.mrb[34].mxu0  ;;  %v3046_v41 = vpop.f32.mrb[34].mxu1 }
 0x13c   :  { %3843 = vst [vmem:[#allocation46_spill] sm:$0xff] %v3046_v41  ;;  %v3052_v37 = vpop.f32.mrb[35].mxu0  ;;  %v3054_v51 = vpop.f32.mrb[35].mxu1 }
 0x13d   :  { %3844 = vst [vmem:[#allocation47_spill] sm:$0xff] %v3054_v51 }
 0x13f   :  { %v3060_v47 = vpop.f32.mrb[36].mxu0  ;;  %v3062_v45 = vpop.f32.mrb[36].mxu1 }
 0x140   :  { %3845 = vst [vmem:[#allocation48_spill] sm:$0xff] %v3060_v47  ;;  %3846 = vst [vmem:[#allocation49_spill] sm:$0xff] %v3062_v45  ;;  %v3068_v41 = vpop.f32.mrb[37].mxu0  ;;  %v3070_v55 = vpop.f32.mrb[37].mxu1 }
 0x141   :  { %3847 = vst [vmem:[#allocation50_spill] sm:$0xff] %v3068_v41  ;;  %3848 = vst [vmem:[#allocation51_spill] sm:$0xff] %v3070_v55 }
 0x143   :  { %v3076_v51 = vpop.f32.mrb[38].mxu0  ;;  %v3078_v49 = vpop.f32.mrb[38].mxu1 }
 0x144   :  { %3849 = vst [vmem:[#allocation52_spill] sm:$0xff] %v3076_v51  ;;  %3850 = vst [vmem:[#allocation53_spill] sm:$0xff] %v3078_v49  ;;  %v3084_v45 = vpop.f32.mrb[39].mxu0  ;;  %v3086_v59 = vpop.f32.mrb[39].mxu1 }
 0x145   :  { %3851 = vst [vmem:[#allocation54_spill] sm:$0xff] %v3084_v45  ;;  %3852 = vst [vmem:[#allocation55_spill] sm:$0xff] %v3086_v59 }
 0x147   :  { %v3092_v55 = vpop.f32.mrb[40].mxu0  ;;  %v3094_v53 = vpop.f32.mrb[40].mxu1 }
 0x148   :  { %3853 = vst [vmem:[#allocation56_spill] sm:$0xff] %v3092_v55  ;;  %3854 = vst [vmem:[#allocation57_spill] sm:$0xff] %v3094_v53  ;;  %v3100_v49 = vpop.f32.mrb[41].mxu0  ;;  %v3102_v63 = vpop.f32.mrb[41].mxu1 }
 0x149   :  { %3855 = vst [vmem:[#allocation58_spill] sm:$0xff] %v3100_v49  ;;  %3856 = vst [vmem:[#allocation59_spill] sm:$0xff] %v3102_v63 }
 0x14b   :  { %v3108_v59 = vpop.f32.mrb[42].mxu0  ;;  %v3110_v57 = vpop.f32.mrb[42].mxu1 }
 0x14c   :  { %3857 = vst [vmem:[#allocation60_spill] sm:$0xff] %v3108_v59  ;;  %3858 = vst [vmem:[#allocation61_spill] sm:$0xff] %v3110_v57  ;;  %v3116_v53 = vpop.f32.mrb[43].mxu0  ;;  %v3118_v3 = vpop.f32.mrb[43].mxu1 }
 0x14d   :  { %3859 = vst [vmem:[#allocation62_spill] sm:$0xff] %v3116_v53  ;;  %3860 = vst [vmem:[#allocation63_spill] sm:$0xff] %v3118_v3 }
 0x14f   :  { %v3124_v63 = vpop.f32.mrb[44].mxu0  ;;  %v3126_v61 = vpop.f32.mrb[44].mxu1 }
 0x150   :  { %3861 = vst [vmem:[#allocation64_spill] sm:$0xff] %v3124_v63  ;;  %3862 = vst [vmem:[#allocation65_spill] sm:$0xff] %v3126_v61  ;;  %v3132_v57 = vpop.f32.mrb[45].mxu0  ;;  %v3134_v7 = vpop.f32.mrb[45].mxu1 }
 0x151   :  { %3863 = vst [vmem:[#allocation66_spill] sm:$0xff] %v3132_v57  ;;  %3864 = vst [vmem:[#allocation67_spill] sm:$0xff] %v3134_v7 }
 0x153   :  { %v3140_v3 = vpop.f32.mrb[46].mxu0  ;;  %v3142_v1 = vpop.f32.mrb[46].mxu1 }
 0x154   :  { %3865 = vst [vmem:[#allocation68_spill] sm:$0xff] %v3140_v3  ;;  %3866 = vst [vmem:[#allocation69_spill] sm:$0xff] %v3142_v1  ;;  %v3148_v61 = vpop.f32.mrb[47].mxu0  ;;  %v3150_v11 = vpop.f32.mrb[47].mxu1 }
 0x155   :  { %3867 = vst [vmem:[#allocation70_spill] sm:$0xff] %v3148_v61  ;;  %3868 = vst [vmem:[#allocation71_spill] sm:$0xff] %v3150_v11 }
 0x157   :  { %v3156_v7 = vpop.f32.mrb[48].mxu0  ;;  %v3158_v5 = vpop.f32.mrb[48].mxu1 }
 0x158   :  { %3869 = vst [vmem:[#allocation72_spill] sm:$0xff] %v3156_v7  ;;  %3870 = vst [vmem:[#allocation73_spill] sm:$0xff] %v3158_v5  ;;  %v3164_v1 = vpop.f32.mrb[49].mxu0  ;;  %v3166_v15 = vpop.f32.mrb[49].mxu1 }
 0x159   :  { %3871 = vst [vmem:[#allocation74_spill] sm:$0xff] %v3164_v1  ;;  %3872 = vst [vmem:[#allocation75_spill] sm:$0xff] %v3166_v15 }
 0x15b   :  { %v3172_v11 = vpop.f32.mrb[50].mxu0  ;;  %v3174_v9 = vpop.f32.mrb[50].mxu1 }
 0x15c   :  { %v546_v61 = vpop.f32.mrb[51].mxu0  ;;  %v1046_v8 = vpop.f32.mrb[51].mxu1 }
 0x15f   :  { %v3176_v24 = vpop.f32.mrb[52].mxu0  ;;  %v3178_v7 = vpop.f32.mrb[52].mxu1 }
 0x160   :  { %v3180_v25 = vpop.f32.mrb[53].mxu0  ;;  %v3182_v5 = vpop.f32.mrb[53].mxu1 }
 0x163   :  { %v3184_v21 = vpop.f32.mrb[54].mxu0  ;;  %v3186_v28 = vpop.f32.mrb[54].mxu1 }
 0x164   :  { %v3188_v1 = vpop.f32.mrb[55].mxu0  ;;  %v3190_v29 = vpop.f32.mrb[55].mxu1 }
 0x167   :  { %v3192_v15 = vpop.f32.mrb[56].mxu0  ;;  %v3194_v13 = vpop.f32.mrb[56].mxu1 }
 0x168   :  { %v3196_v12 = vpop.f32.mrb[57].mxu0  ;;  %v3198_v20 = vpop.f32.mrb[57].mxu1 }
 0x16b   :  { %v3200_v3 = vpop.f32.mrb[58].mxu0  ;;  %v3202_v14 = vpop.f32.mrb[58].mxu1 }
 0x16c   :  { %v3204_v57 = vpop.f32.mrb[59].mxu0  ;;  %v3206_v4 = vpop.f32.mrb[59].mxu1 }
 0x16f   :  { %v3208_v63 = vpop.f32.mrb[60].mxu0  ;;  %v3210_v10 = vpop.f32.mrb[60].mxu1 }
 0x170   :  { %3873 = vst [vmem:[#allocation76_spill] sm:$0xff] %v3210_v10  ;;  %v3212_v53 = vpop.f32.mrb[61].mxu0  ;;  %v3214_v0 = vpop.f32.mrb[61].mxu1 }
 0x173   :  { %v3216_v59 = vpop.f32.mrb[62].mxu0  ;;  %v3218_v6 = vpop.f32.mrb[62].mxu1 }
 0x174   :  { %3874 = vst [vmem:[#allocation77_spill] sm:$0xff] %v3216_v59  ;;  %3875 = vst [vmem:[#allocation78_spill] sm:$0xff] %v3218_v6  ;;  %v3220_v49 = vpop.f32.mrb[63].mxu0  ;;  %v3222_v60 = vpop.f32.mrb[63].mxu1 }
 0x177   :  { %v3224_v55 = vpop.f32.mrb[64].mxu0  ;;  %v3226_v2 = vpop.f32.mrb[64].mxu1 }
 0x178   :  { %3876 = vst [vmem:[#allocation79_spill] sm:$0xff] %v3224_v55  ;;  %3877 = vst [vmem:[#allocation80_spill] sm:$0xff] %v3226_v2  ;;  %v3228_v45 = vpop.f32.mrb[65].mxu0  ;;  %v3230_v56 = vpop.f32.mrb[65].mxu1 }
 0x179   :  { %3878 = vst [vmem:[#allocation81_spill] sm:$0xff] %v3228_v45  ;;  %3879 = vst [vmem:[#allocation82_spill] sm:$0xff] %v3230_v56 }
 0x17b   :  { %v3232_v51 = vpop.f32.mrb[66].mxu0  ;;  %v3234_v62 = vpop.f32.mrb[66].mxu1 }
 0x17c   :  { %3880 = vst [vmem:[#allocation83_spill] sm:$0xff] %v3232_v51  ;;  %3881 = vst [vmem:[#allocation84_spill] sm:$0xff] %v3234_v62  ;;  %v3236_v41 = vpop.f32.mrb[67].mxu0  ;;  %v3238_v59 = vpop.f32.mrb[67].mxu1 }
 0x17d   :  { %3882 = vst [vmem:[#allocation85_spill] sm:$0xff] %v3236_v41  ;;  %3883 = vst [vmem:[#allocation86_spill] sm:$0xff] %v3238_v59 }
 0x17f   :  { %v3240_v6 = vpop.f32.mrb[68].mxu0  ;;  %v3242_v52 = vpop.f32.mrb[68].mxu1 }
 0x180   :  { %3884 = vst [vmem:[#allocation87_spill] sm:$0xff] %v3240_v6  ;;  %3885 = vst [vmem:[#allocation88_spill] sm:$0xff] %v3242_v52  ;;  %v3244_v47 = vpop.f32.mrb[69].mxu0  ;;  %v3246_v55 = vpop.f32.mrb[69].mxu1 }
 0x181   :  { %3886 = vst [vmem:[#allocation89_spill] sm:$0xff] %v3244_v47  ;;  %3887 = vst [vmem:[#allocation90_spill] sm:$0xff] %v3246_v55 }
 0x183   :  { %v3248_v2 = vpop.f32.mrb[70].mxu0  ;;  %v3250_v45 = vpop.f32.mrb[70].mxu1 }
 0x184   :  { %3888 = vst [vmem:[#allocation91_spill] sm:$0xff] %v3248_v2  ;;  %3889 = vst [vmem:[#allocation92_spill] sm:$0xff] %v3250_v45  ;;  %v3252_v56 = vpop.f32.mrb[71].mxu0  ;;  %v3254_v51 = vpop.f32.mrb[71].mxu1  ;;  %v3271_v45 = vld [vmem:[%s3723_s2] ss:$0 sm:$0xff] }
 0x185   :  { %3890 = vst [vmem:[#allocation93_spill] sm:$0xff] %v3252_v56  ;;  %3891 = vst [vmem:[#allocation94_spill] sm:$0xff] %v3254_v51 }
 0x187   :  { %v3256_v62 = vpop.f32.mrb[72].mxu0  ;;  %v3258_v41 = vpop.f32.mrb[72].mxu1 }
 0x188   :  { %3892 = vst [vmem:[#allocation95_spill] sm:$0xff] %v3256_v62  ;;  %3893 = vst [vmem:[#allocation96_spill] sm:$0xff] %v3258_v41  ;;  %v3260_v59 = vpop.f32.mrb[73].mxu0  ;;  %v3262_v6 = vpop.f32.mrb[73].mxu1  ;;  %v3898_v41 = vmax.f32 %v2876_v34, %v2968_v16  ;;  %v3903_v16 = vld [vmem:[#allocation2_spill] sm:$0xff] }
 0x189   :  { %3894 = vst [vmem:[#allocation97_spill] sm:$0xff] %v3260_v59  ;;  %3895 = vst [vmem:[#allocation98_spill] sm:$0xff] %v3262_v6  ;;  %v3899_v6 = vmax.f32 %v2878_v35, %v2970_v17  ;;  %v3904_v17 = vld [vmem:[#allocation39_spill] sm:$0xff] }
 0x18b   :  { %v1969_v52 = vpop.f32.mrb[74].mxu0  ;;  %v2119_v47 = vpop.f32.mrb[74].mxu1 }
 0x18c   :  { %v1345_v58 = vmax.f32 %v546_v61, %v1969_v52  ;;  %v1370_v55 = vmax.f32 %v1046_v8, %v2119_v47  ;;  %v3264_v10 = vpop.f32.mrb[75].mxu0  ;;  %v3266_v2 = vpop.f32.mrb[75].mxu1 }
 0x18d   :  { %3896 = vst [vmem:[#allocation99_spill] sm:$0xff] %v3264_v10  ;;  %3897 = vst [vmem:[#allocation100_spill] sm:$0xff] %v3266_v2 }
 0x18e   :  { %v1395_v62 = vmax.f32 %v3898_v41, %v1345_v58  ;;  %v1420_v59 = vmax.f32 %v3899_v6, %v1370_v55  ;;  %v3900_v55 = vmax.f32 %v2884_v38, %v2980_v22 }
 0x18f   :  { %v1972_v51 = vpop.f32.mrb[76].mxu0  ;;  %v2122_v52 = vpop.f32.mrb[76].mxu1 }
 0x190   :  { %v1452_v47 = vadd.f32 %v3271_v45, %v1395_v62  ;;  %v1477_v61 = vadd.f32 %v3271_v45, %v1420_v59  ;;  %v1347_v8 = vmax.f32 %v3180_v25, %v1972_v51  ;;  %v1372_v2 = vmax.f32 %v3182_v5, %v2122_v52  ;;  %v676_v10 = vpop.f32.mrb[77].mxu0  ;;  %v1176_v56 = vpop.f32.mrb[77].mxu1 }
 0x191   :  { %v1346_v34 = vmax.f32 %v3172_v11, %v676_v10  ;;  %v1371_v41 = vmax.f32 %v3174_v9, %v1176_v56  ;;  %v3901_v59 = vmax.f32 %v2886_v39, %v2982_v23  ;;  %v3902_v51 = vmax.f32 %v2872_v32, %v2988_v26 }
 0x192   :  { %v1502_v58 = vmax.f32 %v1452_v47, 0.0  ;;  %v1527_v35 = vmax.f32 %v1477_v61, 0.0  ;;  %v1397_v6 = vmax.f32 %v3900_v55, %v1347_v8  ;;  %v3905_v25 = vmax.f32 %v3903_v16, %v3904_v17 }
 0x193   :  { %v1422_v62 = vmax.f32 %v3901_v59, %v1372_v2  ;;  %v1396_v5 = vmax.f32 %v3902_v51, %v1346_v34  ;;  %v1975_v11 = vpop.f32.mrb[78].mxu0  ;;  %v2125_v56 = vpop.f32.mrb[78].mxu1  ;;  %v3906_v34 = vmax.f32 %v2892_v42, %v2996_v30  ;;  %v3910_v59 = vmax.f32 %v2880_v36, %v3004_v19  ;;  %v3911_v51 = vld [vmem:[#allocation3_spill] sm:$0xff] }
 0x194   :  { %v1421_v10 = vmax.f32 %v3905_v25, %v1371_v41  ;;  %1553 = vst.msk [vmem:[%s3724_s3] sm:$0xff] %vm1552_vm0, %v1502_v58  ;;  %1578 = vst.msk [vmem:[%s3724_s3 + $0xc8] sm:$0xff] %vm1552_vm0, %v1527_v35  ;;  %v1454_v38 = vadd.f32 %v3271_v45, %v1397_v6  ;;  %v1349_v39 = vmax.f32 %v3188_v1, %v1975_v11  ;;  %v686_v9 = vpop.f32.mrb[79].mxu0  ;;  %v1186_v22 = vpop.f32.mrb[79].mxu1  ;;  %v3907_v58 = vld [vmem:[#allocation5_spill] sm:$0xff]  ;;  %v3908_v1 = vld [vmem:[#allocation40_spill] sm:$0xff] }
 0x195   :  { %v1479_v32 = vadd.f32 %v3271_v45, %v1422_v62  ;;  %v1374_v2 = vmax.f32 %v3190_v29, %v2125_v56  ;;  %v1453_v23 = vadd.f32 %v3271_v45, %v1396_v5  ;;  %v1348_v52 = vmax.f32 %v3176_v24, %v686_v9  ;;  %v3912_v24 = vld [vmem:[#allocation41_spill] sm:$0xff]  ;;  %v3915_v9 = vld [vmem:[#allocation7_spill] sm:$0xff] }
 0x196   :  { %v1478_v26 = vadd.f32 %v3271_v45, %v1421_v10  ;;  %v1373_v47 = vmax.f32 %v3178_v7, %v1186_v22  ;;  %v1504_v61 = vmax.f32 %v1454_v38, 0.0  ;;  %v1399_v41 = vmax.f32 %v3906_v34, %v1349_v39  ;;  %v3916_v22 = vld [vmem:[#allocation42_spill] sm:$0xff]  ;;  %v3919_v34 = vld [vmem:[#allocation4_spill] sm:$0xff] }
 0x197   :  { %v1529_v8 = vmax.f32 %v1479_v32, 0.0  ;;  %v3909_v35 = vmax.f32 %v3907_v58, %v3908_v1  ;;  %v1503_v55 = vmax.f32 %v1453_v23, 0.0  ;;  %v1398_v62 = vmax.f32 %v3910_v59, %v1348_v52  ;;  %v1978_v16 = vpop.f32.mrb[80].mxu0  ;;  %v2128_v17 = vpop.f32.mrb[80].mxu1 }
 0x198   :  { %v1528_v6 = vmax.f32 %v1478_v26, 0.0  ;;  %v3913_v5 = vmax.f32 %v3911_v51, %v3912_v24  ;;  %1555 = vst.msk [vmem:[%s3724_s3 + $0x10] sm:$0xff] %vm1552_vm0, %v1504_v61  ;;  %v1456_v42 = vadd.f32 %v3271_v45, %v1399_v41  ;;  %v1351_v19 = vmax.f32 %v3196_v12, %v1978_v16  ;;  %v696_v25 = vpop.f32.mrb[81].mxu0  ;;  %v1196_v10 = vpop.f32.mrb[81].mxu1 }
 0x199   :  { %v1424_v29 = vmax.f32 %v3909_v35, %v1374_v2  ;;  %1580 = vst.msk [vmem:[%s3724_s3 + $0xd8] sm:$0xff] %vm1552_vm0, %v1529_v8  ;;  %v1376_v30 = vmax.f32 %v3198_v20, %v2128_v17  ;;  %1554 = vst.msk [vmem:[%s3724_s3 + $0x8] sm:$0xff] %vm1552_vm0, %v1503_v55  ;;  %v1455_v11 = vadd.f32 %v3271_v45, %v1398_v62 }
 0x19a   :  { %v1423_v7 = vmax.f32 %v3913_v5, %v1373_v47  ;;  %1579 = vst.msk [vmem:[%s3724_s3 + $0xd0] sm:$0xff] %vm1552_vm0, %v1528_v6  ;;  %v1350_v12 = vmax.f32 %v3184_v21, %v696_v25  ;;  %v1375_v20 = vmax.f32 %v3186_v28, %v1196_v10  ;;  %v1506_v38 = vmax.f32 %v1456_v42, 0.0  ;;  %v3920_v21 = vld [vmem:[#allocation43_spill] sm:$0xff]  ;;  %v3923_v5 = vld [vmem:[#allocation9_spill] sm:$0xff]  ;;  %v3927_v25 = vld [vmem:[#allocation6_spill] sm:$0xff] }
 0x19b   :  { %v1481_v36 = vadd.f32 %v3271_v45, %v1424_v29  ;;  %v3914_v39 = vmax.f32 %v2900_v46, %v3012_v27  ;;  %v3917_v23 = vmax.f32 %v3915_v9, %v3916_v22  ;;  %v1505_v52 = vmax.f32 %v1455_v11, 0.0  ;;  %v1981_v58 = vpop.f32.mrb[82].mxu0  ;;  %v2131_v1 = vpop.f32.mrb[82].mxu1 }
 0x19c   :  { %v1480_v56 = vadd.f32 %v3271_v45, %v1423_v7  ;;  %v3918_v61 = vmax.f32 %v2888_v40, %v3020_v31  ;;  %v3921_v41 = vmax.f32 %v3919_v34, %v3920_v21  ;;  %1557 = vst.msk [vmem:[%s3724_s3 + $0x20] sm:$0xff] %vm1552_vm0, %v1506_v38  ;;  %v1353_v27 = vmax.f32 %v3204_v57, %v1981_v58  ;;  %v706_v35 = vpop.f32.mrb[83].mxu0  ;;  %v1206_v29 = vpop.f32.mrb[83].mxu1  ;;  %v3924_v7 = vld [vmem:[#allocation44_spill] sm:$0xff] }
 0x19d   :  { %v1531_v32 = vmax.f32 %v1481_v36, 0.0  ;;  %v1401_v2 = vmax.f32 %v3914_v39, %v1351_v19  ;;  %v1426_v26 = vmax.f32 %v3917_v23, %v1376_v30  ;;  %v1378_v31 = vmax.f32 %v3206_v4, %v2131_v1  ;;  %1556 = vst.msk [vmem:[%s3724_s3 + $0x18] sm:$0xff] %vm1552_vm0, %v1505_v52  ;;  %v3931_v23 = vld [vmem:[#allocation12_spill] sm:$0xff] }
 0x19e   :  { %v1530_v47 = vmax.f32 %v1480_v56, 0.0  ;;  %v1400_v8 = vmax.f32 %v3918_v61, %v1350_v12  ;;  %v1425_v28 = vmax.f32 %v3921_v41, %v1375_v20  ;;  %v1352_v57 = vmax.f32 %v3192_v15, %v706_v35  ;;  %v3928_v15 = vld [vmem:[#allocation45_spill] sm:$0xff]  ;;  %v3935_v41 = vld [vmem:[#allocation8_spill] sm:$0xff] }
 0x19f   :  { %1582 = vst.msk [vmem:[%s3724_s3 + $0xe8] sm:$0xff] %vm1552_vm0, %v1531_v32  ;;  %v1458_v46 = vadd.f32 %v3271_v45, %v1401_v2  ;;  %v1483_v40 = vadd.f32 %v3271_v45, %v1426_v26  ;;  %v1377_v4 = vmax.f32 %v3194_v13, %v1206_v29  ;;  %v3922_v51 = vmax.f32 %v2908_v50, %v3028_v18  ;;  %v1984_v11 = vpop.f32.mrb[84].mxu0  ;;  %v2134_v56 = vpop.f32.mrb[84].mxu1  ;;  %v3932_v26 = vld [vmem:[#allocation46_spill] sm:$0xff]  ;;  %v3938_v35 = vld [vmem:[#allocation76_spill] sm:$0xff] }
 0x1a0   :  { %1581 = vst.msk [vmem:[%s3724_s3 + $0xe0] sm:$0xff] %vm1552_vm0, %v1530_v47  ;;  %v1457_v55 = vadd.f32 %v3271_v45, %v1400_v8  ;;  %v1482_v6 = vadd.f32 %v3271_v45, %v1425_v28  ;;  %v3925_v16 = vmax.f32 %v3923_v5, %v3924_v7  ;;  %v3926_v19 = vmax.f32 %v2896_v44, %v3036_v33  ;;  %v716_v12 = vpop.f32.mrb[85].mxu0  ;;  %v1216_v20 = vpop.f32.mrb[85].mxu1 }
 0x1a1   :  { %v1508_v59 = vmax.f32 %v1458_v46, 0.0  ;;  %v1533_v62 = vmax.f32 %v1483_v40, 0.0  ;;  %v1403_v24 = vmax.f32 %v3922_v51, %v1353_v27  ;;  %v3929_v10 = vmax.f32 %v3927_v25, %v3928_v15  ;;  %v3943_v51 = vld [vmem:[#allocation49_spill] sm:$0xff] }
 0x1a2   :  { %v1428_v17 = vmax.f32 %v3925_v16, %v1378_v31  ;;  %v1507_v42 = vmax.f32 %v1457_v55, 0.0  ;;  %v1532_v36 = vmax.f32 %v1482_v6, 0.0  ;;  %v1402_v30 = vmax.f32 %v3926_v19, %v1352_v57  ;;  %v3939_v6 = vld [vmem:[#allocation15_spill] sm:$0xff]  ;;  %v3940_v57 = vld [vmem:[#allocation48_spill] sm:$0xff] }
 0x1a3   :  { %v1427_v13 = vmax.f32 %v3929_v10, %v1377_v4  ;;  %1559 = vst.msk [vmem:[%s3724_s3 + $0x30] sm:$0xff] %vm1552_vm0, %v1508_v59  ;;  %1584 = vst.msk [vmem:[%s3724_s3 + $0xf8] sm:$0xff] %vm1552_vm0, %v1533_v62  ;;  %v1460_v50 = vadd.f32 %v3271_v45, %v1403_v24  ;;  %v1355_v44 = vmax.f32 %v3212_v53, %v1984_v11  ;;  %v1987_v58 = vpop.f32.mrb[86].mxu0  ;;  %v2137_v1 = vpop.f32.mrb[86].mxu1  ;;  %v3942_v62 = vld [vmem:[#allocation16_spill] sm:$0xff] }
 0x1a4   :  { %v1485_v33 = vadd.f32 %v3271_v45, %v1428_v17  ;;  %v1380_v18 = vmax.f32 %v3214_v0, %v2134_v56  ;;  %1558 = vst.msk [vmem:[%s3724_s3 + $0x28] sm:$0xff] %vm1552_vm0, %v1507_v42  ;;  %1583 = vst.msk [vmem:[%s3724_s3 + $0xf0] sm:$0xff] %vm1552_vm0, %v1532_v36  ;;  %v1459_v38 = vadd.f32 %v3271_v45, %v1402_v30  ;;  %v726_v46 = vpop.f32.mrb[87].mxu0  ;;  %v1226_v40 = vpop.f32.mrb[87].mxu1  ;;  %v3945_v17 = vld [vmem:[#allocation10_spill] sm:$0xff]  ;;  %v3948_v30 = vld [vmem:[#allocation11_spill] sm:$0xff] }
 0x1a5   :  { %v1484_v32 = vadd.f32 %v3271_v45, %v1427_v13  ;;  %v1354_v53 = vmax.f32 %v3200_v3, %v716_v12  ;;  %v1379_v0 = vmax.f32 %v3202_v14, %v1216_v20  ;;  %v1510_v39 = vmax.f32 %v1460_v50, 0.0  ;;  %v3936_v3 = vld [vmem:[#allocation47_spill] sm:$0xff]  ;;  %v3946_v42 = vld [vmem:[#allocation50_spill] sm:$0xff]  ;;  %v3951_v50 = vld [vmem:[#allocation81_spill] sm:$0xff] }
 0x1a6   :  { %v1535_v2 = vmax.f32 %v1485_v33, 0.0  ;;  %v3930_v9 = vmax.f32 %v2916_v54, %v3044_v43  ;;  %v3933_v52 = vmax.f32 %v3931_v23, %v3932_v26  ;;  %v1509_v61 = vmax.f32 %v1459_v38, 0.0  ;;  %v3955_v23 = vld [vmem:[#allocation19_spill] sm:$0xff]  ;;  %v3956_v26 = vld [vmem:[#allocation52_spill] sm:$0xff] }
 0x1a7   :  { %v1534_v8 = vmax.f32 %v1484_v32, 0.0  ;;  %v3934_v34 = vmax.f32 %v2904_v48, %v3052_v37  ;;  %v3937_v28 = vmax.f32 %v3935_v41, %v3936_v3  ;;  %1561 = vst.msk [vmem:[%s3724_s3 + $0x40] sm:$0xff] %vm1552_vm0, %v1510_v39  ;;  %v1357_v48 = vmax.f32 %v3220_v49, %v1987_v58  ;;  %v1990_v10 = vpop.f32.mrb[88].mxu0  ;;  %v2140_v13 = vpop.f32.mrb[88].mxu1  ;;  %v3954_v39 = vld [vmem:[#allocation78_spill] sm:$0xff] }
 0x1a8   :  { %v1405_v22 = vmax.f32 %v3930_v9, %v1355_v44  ;;  %v1430_v47 = vmax.f32 %v3933_v52, %v1380_v18  ;;  %1586 = vst.msk [vmem:[%s3724_s3 + $0x108] sm:$0xff] %vm1552_vm0, %v1535_v2  ;;  %v1382_v54 = vmax.f32 %v3222_v60, %v2137_v1  ;;  %1560 = vst.msk [vmem:[%s3724_s3 + $0x38] sm:$0xff] %vm1552_vm0, %v1509_v61  ;;  %v3952_v44 = vld [vmem:[#allocation82_spill] sm:$0xff]  ;;  %v736_v12 = vpop.f32.mrb[89].mxu0  ;;  %v1236_v20 = vpop.f32.mrb[89].mxu1  ;;  %v3958_v61 = vld [vmem:[#allocation20_spill] sm:$0xff] }
 0x1a9   :  { %v1404_v21 = vmax.f32 %v3934_v34, %v1354_v53  ;;  %v1429_v14 = vmax.f32 %v3937_v28, %v1379_v0  ;;  %1585 = vst.msk [vmem:[%s3724_s3 + $0x100] sm:$0xff] %vm1552_vm0, %v1534_v8  ;;  %v1356_v49 = vmax.f32 %v3208_v63, %v726_v46  ;;  %v1381_v60 = vmax.f32 %v3938_v35, %v1226_v40  ;;  %v3949_v63 = vld [vmem:[#allocation51_spill] sm:$0xff]  ;;  %v3953_v53 = vld [vmem:[#allocation77_spill] sm:$0xff] }
 0x1aa   :  { %v1462_v43 = vadd.f32 %v3271_v45, %v1405_v22  ;;  %v1487_v37 = vadd.f32 %v3271_v45, %v1430_v47  ;;  %v3941_v4 = vmax.f32 %v3939_v6, %v3940_v57  ;;  %v3944_v24 = vmax.f32 %v3942_v62, %v3943_v51  ;;  %v3959_v8 = vld [vmem:[#allocation53_spill] sm:$0xff]  ;;  %v3970_v51 = vld [vmem:[#allocation80_spill] sm:$0xff] }
 0x1ab   :  { %v1461_v27 = vadd.f32 %v3271_v45, %v1404_v21  ;;  %v1486_v31 = vadd.f32 %v3271_v45, %v1429_v14  ;;  %v3947_v36 = vmax.f32 %v3945_v17, %v3946_v42  ;;  %v3950_v25 = vmax.f32 %v3948_v30, %v3949_v63  ;;  %v3961_v28 = vld [vmem:[#allocation13_spill] sm:$0xff]  ;;  %v3962_v14 = vld [vmem:[#allocation54_spill] sm:$0xff]  ;;  %v1993_v46 = vpop.f32.mrb[90].mxu0  ;;  %v2143_v40 = vpop.f32.mrb[90].mxu1  ;;  %v3972_v17 = vld [vmem:[#allocation56_spill] sm:$0xff] }
 0x1ac   :  { %v1512_v29 = vmax.f32 %v1462_v43, 0.0  ;;  %v1537_v55 = vmax.f32 %v1487_v37, 0.0  ;;  %v1407_v59 = vmax.f32 %v3941_v4, %v1357_v48  ;;  %v1432_v5 = vmax.f32 %v3944_v24, %v1382_v54  ;;  %v3964_v43 = vld [vmem:[#allocation14_spill] sm:$0xff]  ;;  %v3965_v37 = vld [vmem:[#allocation55_spill] sm:$0xff]  ;;  %v1246_v6 = vpop.f32.mrb[91].mxu1  ;;  %v3975_v30 = vld [vmem:[#allocation57_spill] sm:$0xff] }
 0x1ad   :  { %v1511_v7 = vmax.f32 %v1461_v27, 0.0  ;;  %v1536_v16 = vmax.f32 %v1486_v31, 0.0  ;;  %v1406_v19 = vmax.f32 %v3947_v36, %v1356_v49  ;;  %v1431_v15 = vmax.f32 %v3950_v25, %v1381_v60  ;;  %v3967_v49 = vld [vmem:[#allocation85_spill] sm:$0xff]  ;;  %v3968_v60 = vld [vmem:[#allocation86_spill] sm:$0xff] }
 0x1ae   :  { %1563 = vst.msk [vmem:[%s3724_s3 + $0x50] sm:$0xff] %vm1552_vm0, %v1512_v29  ;;  %1588 = vst.msk [vmem:[%s3724_s3 + $0x118] sm:$0xff] %vm1552_vm0, %v1537_v55  ;;  %v1464_v11 = vadd.f32 %v3271_v45, %v1407_v59  ;;  %v1489_v56 = vadd.f32 %v3271_v45, %v1432_v5  ;;  %v1359_v33 = vmax.f32 %v3951_v50, %v1990_v10  ;;  %v746_v55 = vpop.f32.mrb[91].mxu0  ;;  %v3969_v59 = vld [vmem:[#allocation79_spill] sm:$0xff] }
 0x1af   :  { %v1384_v18 = vmax.f32 %v3952_v44, %v2140_v13  ;;  %1562 = vst.msk [vmem:[%s3724_s3 + $0x48] sm:$0xff] %vm1552_vm0, %v1511_v7  ;;  %1587 = vst.msk [vmem:[%s3724_s3 + $0x110] sm:$0xff] %vm1552_vm0, %v1536_v16  ;;  %v1463_v38 = vadd.f32 %v3271_v45, %v1406_v19  ;;  %v1488_v32 = vadd.f32 %v3271_v45, %v1431_v15  ;;  %v3971_v16 = vld [vmem:[#allocation23_spill] sm:$0xff]  ;;  %v3974_v19 = vld [vmem:[#allocation24_spill] sm:$0xff] }
 0x1b0   :  { %v1358_v0 = vmax.f32 %v3953_v53, %v736_v12  ;;  %v1383_v2 = vmax.f32 %v3954_v39, %v1236_v20  ;;  %v1514_v9 = vmax.f32 %v1464_v11, 0.0  ;;  %v1539_v22 = vmax.f32 %v1489_v56, 0.0  ;;  %v3977_v13 = vld [vmem:[#allocation17_spill] sm:$0xff]  ;;  %v3978_v11 = vld [vmem:[#allocation58_spill] sm:$0xff]  ;;  %v3981_v44 = vld [vmem:[#allocation59_spill] sm:$0xff]  ;;  %v1996_v20 = vpop.f32.mrb[92].mxu0 }
 0x1b1   :  { %v3957_v52 = vmax.f32 %v3955_v23, %v3956_v26  ;;  %v3960_v34 = vmax.f32 %v3958_v61, %v3959_v8  ;;  %v1513_v41 = vmax.f32 %v1463_v38, 0.0  ;;  %v1538_v3 = vmax.f32 %v1488_v32, 0.0  ;;  %v2146_v38 = vpop.f32.mrb[92].mxu1  ;;  %v3986_v8 = vld [vmem:[#allocation84_spill] sm:$0xff] }
 0x1b2   :  { %v3963_v58 = vmax.f32 %v3961_v28, %v3962_v14  ;;  %v3966_v48 = vmax.f32 %v3964_v43, %v3965_v37  ;;  %1565 = vst.msk [vmem:[%s3724_s3 + $0x60] sm:$0xff] %vm1552_vm0, %v1514_v9  ;;  %1590 = vst.msk [vmem:[%s3724_s3 + $0x128] sm:$0xff] %vm1552_vm0, %v1539_v22  ;;  %v1361_v35 = vmax.f32 %v3967_v49, %v1993_v46  ;;  %v756_v22 = vpop.f32.mrb[93].mxu0  ;;  %v1256_v23 = vpop.f32.mrb[93].mxu1  ;;  %v3988_v28 = vld [vmem:[#allocation60_spill] sm:$0xff]  ;;  %v3991_v43 = vld [vmem:[#allocation61_spill] sm:$0xff] }
 0x1b3   :  { %v1409_v47 = vmax.f32 %v3957_v52, %v1359_v33  ;;  %v1434_v21 = vmax.f32 %v3960_v34, %v1384_v18  ;;  %v1386_v29 = vmax.f32 %v3968_v60, %v2143_v40  ;;  %1564 = vst.msk [vmem:[%s3724_s3 + $0x58] sm:$0xff] %vm1552_vm0, %v1513_v41  ;;  %1589 = vst.msk [vmem:[%s3724_s3 + $0x120] sm:$0xff] %vm1552_vm0, %v1538_v3  ;;  %v3980_v33 = vld [vmem:[#allocation18_spill] sm:$0xff]  ;;  %v3987_v3 = vld [vmem:[#allocation27_spill] sm:$0xff] }
 0x1b4   :  { %v1408_v1 = vmax.f32 %v3963_v58, %v1358_v0  ;;  %v1433_v54 = vmax.f32 %v3966_v48, %v1383_v2  ;;  %v1360_v62 = vmax.f32 %v3969_v59, %v746_v55  ;;  %v1385_v24 = vmax.f32 %v3970_v51, %v1246_v6  ;;  %v3983_v0 = vld [vmem:[#allocation89_spill] sm:$0xff]  ;;  %v3984_v2 = vld [vmem:[#allocation90_spill] sm:$0xff]  ;;  %v3997_v60 = vld [vmem:[#allocation63_spill] sm:$0xff]  ;;  %v1999_v6 = vpop.f32.mrb[94].mxu0 }
 0x1b5   :  { %v1466_v27 = vadd.f32 %v3271_v45, %v1409_v47  ;;  %v1491_v31 = vadd.f32 %v3271_v45, %v1434_v21  ;;  %v3973_v42 = vmax.f32 %v3971_v16, %v3972_v17  ;;  %v3976_v63 = vmax.f32 %v3974_v19, %v3975_v30  ;;  %v3985_v47 = vld [vmem:[#allocation83_spill] sm:$0xff]  ;;  %v3993_v40 = vld [vmem:[#allocation21_spill] sm:$0xff]  ;;  %v4002_v30 = vld [vmem:[#allocation88_spill] sm:$0xff] }
 0x1b6   :  { %v1465_v57 = vadd.f32 %v3271_v45, %v1408_v1  ;;  %v1490_v4 = vadd.f32 %v3271_v45, %v1433_v54  ;;  %v3979_v56 = vmax.f32 %v3977_v13, %v3978_v11  ;;  %v3982_v18 = vmax.f32 %v3980_v33, %v3981_v44  ;;  %v3990_v1 = vld [vmem:[#allocation28_spill] sm:$0xff]  ;;  %v4007_v33 = vld [vmem:[#allocation65_spill] sm:$0xff] }
 0x1b7   :  { %v1516_v5 = vmax.f32 %v1466_v27, 0.0  ;;  %v1541_v7 = vmax.f32 %v1491_v31, 0.0  ;;  %v1411_v36 = vmax.f32 %v3973_v42, %v1361_v35  ;;  %v1436_v25 = vmax.f32 %v3976_v63, %v1386_v29  ;;  %v3994_v27 = vld [vmem:[#allocation62_spill] sm:$0xff]  ;;  %v4004_v13 = vld [vmem:[#allocation64_spill] sm:$0xff] }
 0x1b8   :  { %v1515_v15 = vmax.f32 %v1465_v57, 0.0  ;;  %v1540_v10 = vmax.f32 %v1490_v4, 0.0  ;;  %v1410_v50 = vmax.f32 %v3979_v56, %v1360_v62  ;;  %v1435_v12 = vmax.f32 %v3982_v18, %v1385_v24  ;;  %v3996_v35 = vld [vmem:[#allocation22_spill] sm:$0xff]  ;;  %v2149_v57 = vpop.f32.mrb[94].mxu1  ;;  %v3999_v62 = vld [vmem:[#allocation93_spill] sm:$0xff] }
 0x1b9   :  { %1567 = vst.msk [vmem:[%s3724_s3 + $0x70] sm:$0xff] %vm1552_vm0, %v1516_v5  ;;  %1592 = vst.msk [vmem:[%s3724_s3 + $0x138] sm:$0xff] %vm1552_vm0, %v1541_v7  ;;  %v1468_v32 = vadd.f32 %v3271_v45, %v1411_v36  ;;  %v1493_v53 = vadd.f32 %v3271_v45, %v1436_v25  ;;  %v1363_v39 = vmax.f32 %v3983_v0, %v1996_v20  ;;  %v4000_v24 = vld [vmem:[#allocation94_spill] sm:$0xff]  ;;  %v766_v7 = vpop.f32.mrb[95].mxu0  ;;  %v1266_v16 = vpop.f32.mrb[95].mxu1  ;;  %v4001_v36 = vld [vmem:[#allocation87_spill] sm:$0xff] }
 0x1ba   :  { %v1388_v9 = vmax.f32 %v3984_v2, %v2146_v38  ;;  %1566 = vst.msk [vmem:[%s3724_s3 + $0x68] sm:$0xff] %vm1552_vm0, %v1515_v15  ;;  %1591 = vst.msk [vmem:[%s3724_s3 + $0x130] sm:$0xff] %vm1552_vm0, %v1540_v10  ;;  %v1467_v26 = vadd.f32 %v3271_v45, %v1410_v50  ;;  %v1492_v52 = vadd.f32 %v3271_v45, %v1435_v12  ;;  %v4003_v10 = vld [vmem:[#allocation31_spill] sm:$0xff]  ;;  %v4006_v50 = vld [vmem:[#allocation32_spill] sm:$0xff] }
 0x1bb   :  { %v1362_v61 = vmax.f32 %v3985_v47, %v756_v22  ;;  %v1387_v34 = vmax.f32 %v3986_v8, %v1256_v23  ;;  %v1518_v21 = vmax.f32 %v1468_v32, 0.0  ;;  %v1543_v41 = vmax.f32 %v1493_v53, 0.0  ;;  %v4009_v38 = vld [vmem:[#allocation25_spill] sm:$0xff]  ;;  %v4010_v32 = vld [vmem:[#allocation66_spill] sm:$0xff]  ;;  %v4013_v2 = vld [vmem:[#allocation67_spill] sm:$0xff]  ;;  %v2002_v23 = vpop.f32.mrb[96].mxu0 }
 0x1bc   :  { %v3989_v14 = vmax.f32 %v3987_v3, %v3988_v28  ;;  %v3992_v37 = vmax.f32 %v3990_v1, %v3991_v43  ;;  %v1517_v54 = vmax.f32 %v1467_v26, 0.0  ;;  %v1542_v46 = vmax.f32 %v1492_v52, 0.0  ;;  %v2152_v26 = vpop.f32.mrb[96].mxu1  ;;  %v4018_v43 = vld [vmem:[#allocation92_spill] sm:$0xff] }
 0x1bd   :  { %v3995_v31 = vmax.f32 %v3993_v40, %v3994_v27  ;;  %v3998_v29 = vmax.f32 %v3996_v35, %v3997_v60  ;;  %1569 = vst.msk [vmem:[%s3724_s3 + $0x80] sm:$0xff] %vm1552_vm0, %v1518_v21  ;;  %1594 = vst.msk [vmem:[%s3724_s3 + $0x148] sm:$0xff] %vm1552_vm0, %v1543_v41  ;;  %v1365_v51 = vmax.f32 %v3999_v62, %v1999_v6  ;;  %v776_v41 = vpop.f32.mrb[97].mxu0  ;;  %v1276_v3 = vpop.f32.mrb[97].mxu1  ;;  %v4020_v40 = vld [vmem:[#allocation68_spill] sm:$0xff]  ;;  %v4023_v35 = vld [vmem:[#allocation69_spill] sm:$0xff] }
 0x1be   :  { %v1413_v58 = vmax.f32 %v3989_v14, %v1363_v39  ;;  %v1438_v48 = vmax.f32 %v3992_v37, %v1388_v9  ;;  %v1390_v5 = vmax.f32 %v4000_v24, %v2149_v57  ;;  %1568 = vst.msk [vmem:[%s3724_s3 + $0x78] sm:$0xff] %vm1552_vm0, %v1517_v54  ;;  %1593 = vst.msk [vmem:[%s3724_s3 + $0x140] sm:$0xff] %vm1552_vm0, %v1542_v46  ;;  %v4012_v39 = vld [vmem:[#allocation26_spill] sm:$0xff]  ;;  %v4019_v46 = vld [vmem:[#allocation35_spill] sm:$0xff] }
 0x1bf   :  { %v1412_v49 = vmax.f32 %v3995_v31, %v1362_v61  ;;  %v1437_v55 = vmax.f32 %v3998_v29, %v1387_v34  ;;  %v1364_v19 = vmax.f32 %v4001_v36, %v766_v7  ;;  %v1389_v63 = vmax.f32 %v4002_v30, %v1266_v16  ;;  %v4015_v61 = vld [vmem:[#allocation97_spill] sm:$0xff]  ;;  %v4016_v34 = vld [vmem:[#allocation98_spill] sm:$0xff]  ;;  %v4029_v24 = vld [vmem:[#allocation71_spill] sm:$0xff]  ;;  %v2005_v16 = vpop.f32.mrb[98].mxu0 }
 0x1c0   :  { %v1470_v4 = vadd.f32 %v3271_v45, %v1413_v58  ;;  %v1495_v59 = vadd.f32 %v3271_v45, %v1438_v48  ;;  %v4005_v11 = vmax.f32 %v4003_v10, %v4004_v13  ;;  %v4008_v44 = vmax.f32 %v4006_v50, %v4007_v33  ;;  %v4017_v58 = vld [vmem:[#allocation91_spill] sm:$0xff]  ;;  %v4025_v57 = vld [vmem:[#allocation29_spill] sm:$0xff]  ;;  %v4034_v33 = vld [vmem:[#allocation96_spill] sm:$0xff] }
 0x1c1   :  { %v1469_v17 = vadd.f32 %v3271_v45, %v1412_v49  ;;  %v1494_v42 = vadd.f32 %v3271_v45, %v1437_v55  ;;  %v4011_v53 = vmax.f32 %v4009_v38, %v4010_v32  ;;  %v4014_v9 = vmax.f32 %v4012_v39, %v4013_v2  ;;  %v4022_v49 = vld [vmem:[#allocation36_spill] sm:$0xff]  ;;  %v4039_v39 = vld [vmem:[#allocation73_spill] sm:$0xff] }
 0x1c2   :  { %v1520_v25 = vmax.f32 %v1470_v4, 0.0  ;;  %v1545_v15 = vmax.f32 %v1495_v59, 0.0  ;;  %v1415_v56 = vmax.f32 %v4005_v11, %v1365_v51  ;;  %v1440_v18 = vmax.f32 %v4008_v44, %v1390_v5  ;;  %v4026_v4 = vld [vmem:[#allocation70_spill] sm:$0xff]  ;;  %v4036_v38 = vld [vmem:[#allocation72_spill] sm:$0xff] }
 0x1c3   :  { %v1519_v12 = vmax.f32 %v1469_v17, 0.0  ;;  %v1544_v20 = vmax.f32 %v1494_v42, 0.0  ;;  %v1414_v0 = vmax.f32 %v4011_v53, %v1364_v19  ;;  %v1439_v22 = vmax.f32 %v4014_v9, %v1389_v63  ;;  %v4028_v51 = vld [vmem:[#allocation30_spill] sm:$0xff]  ;;  %v2155_v17 = vpop.f32.mrb[98].mxu1  ;;  %v4031_v19 = vld [vmem:[#allocation99_spill] sm:$0xff]  ;;  %v4032_v63 = vld [vmem:[#allocation100_spill] sm:$0xff] }
 0x1c4   :  { %1571 = vst.msk [vmem:[%s3724_s3 + $0x90] sm:$0xff] %vm1552_vm0, %v1520_v25  ;;  %1596 = vst.msk [vmem:[%s3724_s3 + $0x158] sm:$0xff] %vm1552_vm0, %v1545_v15  ;;  %v1472_v52 = vadd.f32 %v3271_v45, %v1415_v56  ;;  %v1497_v47 = vadd.f32 %v3271_v45, %v1440_v18  ;;  %v1367_v8 = vmax.f32 %v4015_v61, %v2002_v23  ;;  %v786_v15 = vpop.f32.mrb[99].mxu0  ;;  %v1286_v10 = vpop.f32.mrb[99].mxu1  ;;  %v4033_v56 = vld [vmem:[#allocation95_spill] sm:$0xff] }
 0x1c5   :  { %v1392_v21 = vmax.f32 %v4016_v34, %v2152_v26  ;;  %1570 = vst.msk [vmem:[%s3724_s3 + $0x88] sm:$0xff] %vm1552_vm0, %v1519_v12  ;;  %1595 = vst.msk [vmem:[%s3724_s3 + $0x150] sm:$0xff] %vm1552_vm0, %v1544_v20  ;;  %v1471_v28 = vadd.f32 %v3271_v45, %v1414_v0  ;;  %v1496_v14 = vadd.f32 %v3271_v45, %v1439_v22  ;;  %v4035_v20 = vld [vmem:[#allocation37_spill] sm:$0xff]  ;;  %v4038_v0 = vld [vmem:[#allocation38_spill] sm:$0xff] }
 0x1c6   :  { %v1366_v1 = vmax.f32 %v4017_v58, %v776_v41  ;;  %v1391_v37 = vmax.f32 %v4018_v43, %v1276_v3  ;;  %v1522_v48 = vmax.f32 %v1472_v52, 0.0  ;;  %v1547_v54 = vmax.f32 %v1497_v47, 0.0  ;;  %v4041_v26 = vld [vmem:[#allocation33_spill] sm:$0xff]  ;;  %v4042_v52 = vld [vmem:[#allocation74_spill] sm:$0xff]  ;;  %v4045_v34 = vld [vmem:[#allocation75_spill] sm:$0xff] }
 0x1c7   :  { %v4021_v27 = vmax.f32 %v4019_v46, %v4020_v40  ;;  %v4024_v60 = vmax.f32 %v4022_v49, %v4023_v35  ;;  %v1521_v55 = vmax.f32 %v1471_v28, 0.0  ;;  %v1546_v6 = vmax.f32 %v1496_v14, 0.0 }
 0x1c8   :  { %v4027_v59 = vmax.f32 %v4025_v57, %v4026_v4  ;;  %v4030_v5 = vmax.f32 %v4028_v51, %v4029_v24  ;;  %1573 = vst.msk [vmem:[%s3724_s3 + $0xa0] sm:$0xff] %vm1552_vm0, %v1522_v48  ;;  %1598 = vst.msk [vmem:[%s3724_s3 + $0x168] sm:$0xff] %vm1552_vm0, %v1547_v54  ;;  %v1369_v30 = vmax.f32 %v4031_v19, %v2005_v16 }
 0x1c9   :  { %v1417_v31 = vmax.f32 %v4021_v27, %v1367_v8  ;;  %v1442_v29 = vmax.f32 %v4024_v60, %v1392_v21  ;;  %v1394_v25 = vmax.f32 %v4032_v63, %v2155_v17  ;;  %1572 = vst.msk [vmem:[%s3724_s3 + $0x98] sm:$0xff] %vm1552_vm0, %v1521_v55  ;;  %1597 = vst.msk [vmem:[%s3724_s3 + $0x160] sm:$0xff] %vm1552_vm0, %v1546_v6  ;;  %v4044_v8 = vld [vmem:[#allocation34_spill] sm:$0xff] }
 0x1ca   :  { %v1416_v62 = vmax.f32 %v4027_v59, %v1366_v1  ;;  %v1441_v7 = vmax.f32 %v4030_v5, %v1391_v37  ;;  %v1368_v50 = vmax.f32 %v4033_v56, %v786_v15  ;;  %v1393_v44 = vmax.f32 %v4034_v33, %v1286_v10 }
 0x1cb   :  { %v1474_v42 = vadd.f32 %v3271_v45, %v1417_v31  ;;  %v1499_v36 = vadd.f32 %v3271_v45, %v1442_v29  ;;  %v4037_v32 = vmax.f32 %v4035_v20, %v4036_v38  ;;  %v4040_v2 = vmax.f32 %v4038_v0, %v4039_v39 }
 0x1cc   :  { %v1473_v13 = vadd.f32 %v3271_v45, %v1416_v62  ;;  %v1498_v11 = vadd.f32 %v3271_v45, %v1441_v7  ;;  %v4043_v47 = vmax.f32 %v4041_v26, %v4042_v52  ;;  %v4046_v21 = vmax.f32 %v4044_v8, %v4045_v34 }
 0x1cd   :  { %v1524_v18 = vmax.f32 %v1474_v42, 0.0  ;;  %v1549_v12 = vmax.f32 %v1499_v36, 0.0  ;;  %v1419_v53 = vmax.f32 %v4037_v32, %v1369_v30  ;;  %v1444_v9 = vmax.f32 %v4040_v2, %v1394_v25 }
 0x1ce   :  { %v1523_v22 = vmax.f32 %v1473_v13, 0.0  ;;  %v1548_v23 = vmax.f32 %v1498_v11, 0.0  ;;  %v1418_v61 = vmax.f32 %v4043_v47, %v1368_v50  ;;  %v1443_v41 = vmax.f32 %v4046_v21, %v1393_v44 }
 0x1cf   :  { %1575 = vst.msk [vmem:[%s3724_s3 + $0xb0] sm:$0xff] %vm1552_vm0, %v1524_v18  ;;  %1600 = vst.msk [vmem:[%s3724_s3 + $0x178] sm:$0xff] %vm1552_vm0, %v1549_v12  ;;  %v1476_v3 = vadd.f32 %v3271_v45, %v1419_v53  ;;  %v1501_v28 = vadd.f32 %v3271_v45, %v1444_v9 }
 0x1d0   :  { %1574 = vst.msk [vmem:[%s3724_s3 + $0xa8] sm:$0xff] %vm1552_vm0, %v1523_v22  ;;  %1599 = vst.msk [vmem:[%s3724_s3 + $0x170] sm:$0xff] %vm1552_vm0, %v1548_v23  ;;  %v1475_v14 = vadd.f32 %v3271_v45, %v1418_v61  ;;  %v1500_v58 = vadd.f32 %v3271_v45, %v1443_v41 }
 0x1d1   :  { %v1526_v1 = vmax.f32 %v1476_v3, 0.0  ;;  %v1551_v43 = vmax.f32 %v1501_v28, 0.0 }
 0x1d2   :  { %v1525_v37 = vmax.f32 %v1475_v14, 0.0  ;;  %v1550_v48 = vmax.f32 %v1500_v58, 0.0 }
 0x1d3   :  { %1577 = vst.msk [vmem:[%s3724_s3 + $0xc0] sm:$0xff] %vm1552_vm0, %v1526_v1  ;;  %1602 = vst.msk [vmem:[%s3724_s3 + $0x188] sm:$0xff] %vm1552_vm0, %v1551_v43 }
 0x1d4   :  { %1576 = vst.msk [vmem:[%s3724_s3 + $0xb8] sm:$0xff] %vm1552_vm0, %v1525_v37  ;;  %1601 = vst.msk [vmem:[%s3724_s3 + $0x180] sm:$0xff] %vm1552_vm0, %v1550_v48 }

// kernel: net_forward.3
= control target key start
LH: loop header
LB: loop body
LE: loop exit
PB: predicated region body
PF: predicated region fallthrough
CT: control target
= control target key end

     0   :  { %v1505_v3 = vmov 0.0|0.0   ;;  %s2434_s0 = inlined_call_operand.vmem [shape: f32[2,4,32,256], index: 0, kind: input, shape index: {}]   ;;  %s2435_s1 = inlined_call_operand.vmem [shape: f32[256,20], index: 1, kind: input, shape index: {}]   ;;  %s2436_s2 = inlined_call_operand.vmem [shape: f32[1,20], index: 2, kind: input, shape index: {}]   ;;  %s2437_s3 = inlined_call_operand.vmem [shape: f32[512,50], index: 3, kind: input, shape index: {}]   ;;  %s2438_s4 = inlined_call_operand.vmem [shape: f32[1,50], index: 4, kind: input, shape index: {}]   ;;  %s2439_s5 = inlined_call_operand.vmem [shape: f32[50,10], index: 5, kind: input, shape index: {}]   ;;  %s2440_s6 = inlined_call_operand.vmem [shape: f32[1,10], index: 6, kind: input, shape index: {}]   ;;  %s2441_s7 = inlined_call_operand.hbm [shape: f32[2,10], index: 7, kind: output, shape index: {}]  }
   0x1   :  { %v91_v0 = vld [vmem:[%s2435_s1] sm:$0xff]  ;;  %v92_v1 = vld [vmem:[%s2435_s1 + $0x8] sm:$0xff]  ;;  %v93_v2 = vld [vmem:[%s2435_s1 + $0x10] sm:$0xff]  ;;  %1294 = vmatprep.subr.bf16.mxu0 %v1505_v3  ;;  %1415 = vmatprep.subr.bf16.mxu1 %v1505_v3 }
   0x2   :  { %v1295_v4 = vpack.c.bf16 %v92_v1, %v91_v0  ;;  %v94_v5 = vld [vmem:[%s2435_s1 + $0x18] sm:$0xff]  ;;  %v95_v7 = vld [vmem:[%s2435_s1 + $0x20] sm:$0xff]  ;;  %v96_v8 = vld [vmem:[%s2435_s1 + $0x28] sm:$0xff] }
   0x3   :  { %v1298_v6 = vpack.c.bf16 %v94_v5, %v93_v2  ;;  %v1301_v9 = vpack.c.bf16 %v96_v8, %v95_v7  ;;  %v97_v10 = vld [vmem:[%s2435_s1 + $0x30] sm:$0xff]  ;;  %v98_v11 = vld [vmem:[%s2435_s1 + $0x38] sm:$0xff]  ;;  %v28_v12 = vld [vmem:[%s2434_s0 + $0x8] sm:$0xff] }
   0x4   :  { %1296 = vmatpush1.bf16.msra.mxu0 %v1295_v4  ;;  %1431 = vmatpush1.bf16.msra.mxu1 %v1295_v4  ;;  %v1304_v13 = vpack.c.bf16 %v98_v11, %v97_v10  ;;  %v99_v14 = vld [vmem:[%s2435_s1 + $0x40] sm:$0xff]  ;;  %v100_v15 = vld [vmem:[%s2435_s1 + $0x48] sm:$0xff]  ;;  %v101_v17 = vld [vmem:[%s2435_s1 + $0x50] sm:$0xff] }
   0x5   :  { %1297 = vmatprep.subr.bf16.mxu0 %v1505_v3  ;;  %1416 = vmatprep.subr.bf16.mxu1 %v1505_v3  ;;  %v1307_v16 = vpack.c.bf16 %v100_v15, %v99_v14  ;;  %v102_v18 = vld [vmem:[%s2435_s1 + $0x58] sm:$0xff]  ;;  %v103_v21 = vld [vmem:[%s2435_s1 + $0x60] sm:$0xff]  ;;  %v104_v22 = vld [vmem:[%s2435_s1 + $0x68] sm:$0xff] }
   0x6   :  { %187 = vmatprep.mubr.f32.mxu0 %v28_v12  ;;  %v74_v19 = vld [vmem:[%s2434_s0 + $0x178] sm:$0xff]  ;;  %v1310_v20 = vpack.c.bf16 %v102_v18, %v101_v17  ;;  %v1313_v23 = vpack.c.bf16 %v104_v22, %v103_v21  ;;  %v105_v24 = vld [vmem:[%s2435_s1 + $0x70] sm:$0xff]  ;;  %v107_v27 = vld [vmem:[%s2435_s1 + $0x80] sm:$0xff] }
   0x7   :  { %302 = vmatprep.mubr.f32.mxu1 %v74_v19  ;;  %v106_v25 = vld [vmem:[%s2435_s1 + $0x78] sm:$0xff]  ;;  %v108_v28 = vld [vmem:[%s2435_s1 + $0x88] sm:$0xff]  ;;  %v109_v30 = vld [vmem:[%s2435_s1 + $0x90] sm:$0xff] }
   0x8   :  { %1299 = vmatpush1.bf16.msra.mxu0 %v1298_v6  ;;  %1432 = vmatpush1.bf16.msra.mxu1 %v1298_v6  ;;  %v1316_v26 = vpack.c.bf16 %v106_v25, %v105_v24  ;;  %v1319_v29 = vpack.c.bf16 %v108_v28, %v107_v27  ;;  %v110_v31 = vld [vmem:[%s2435_s1 + $0x98] sm:$0xff] }
   0x9   :  { %1300 = vmatprep.subr.bf16.mxu0 %v1505_v3  ;;  %1417 = vmatprep.subr.bf16.mxu1 %v1505_v3 }
   0xc   :  { %1302 = vmatpush1.bf16.msra.mxu0 %v1301_v9  ;;  %1433 = vmatpush1.bf16.msra.mxu1 %v1301_v9 }
   0xd   :  { %1303 = vmatprep.subr.bf16.mxu0 %v1505_v3  ;;  %1418 = vmatprep.subr.bf16.mxu1 %v1505_v3 }
  0x10   :  { %1305 = vmatpush1.bf16.msra.mxu0 %v1304_v13  ;;  %1434 = vmatpush1.bf16.msra.mxu1 %v1304_v13 }
  0x11   :  { %1306 = vmatprep.subr.bf16.mxu0 %v1505_v3  ;;  %1419 = vmatprep.subr.bf16.mxu1 %v1505_v3 }
  0x14   :  { %1308 = vmatpush1.bf16.msra.mxu0 %v1307_v16  ;;  %1435 = vmatpush1.bf16.msra.mxu1 %v1307_v16 }
  0x15   :  { %1309 = vmatprep.subr.bf16.mxu0 %v1505_v3  ;;  %1420 = vmatprep.subr.bf16.mxu1 %v1505_v3 }
  0x18   :  { %1311 = vmatpush1.bf16.msra.mxu0 %v1310_v20  ;;  %1436 = vmatpush1.bf16.msra.mxu1 %v1310_v20 }
  0x19   :  { %1312 = vmatprep.subr.bf16.mxu0 %v1505_v3  ;;  %1421 = vmatprep.subr.bf16.mxu1 %v1505_v3 }
  0x1c   :  { %1314 = vmatpush1.bf16.msra.mxu0 %v1313_v23  ;;  %1437 = vmatpush1.bf16.msra.mxu1 %v1313_v23 }
  0x1d   :  { %1315 = vmatprep.subr.bf16.mxu0 %v1505_v3  ;;  %1422 = vmatprep.subr.bf16.mxu1 %v1505_v3 }
  0x20   :  { %1317 = vmatpush1.bf16.msra.mxu0 %v1316_v26  ;;  %1438 = vmatpush1.bf16.msra.mxu1 %v1316_v26 }
  0x21   :  { %1318 = vmatprep.subr.bf16.mxu0 %v1505_v3  ;;  %1423 = vmatprep.subr.bf16.mxu1 %v1505_v3 }
  0x22   :  { %12 = vsyncpa [#allocation4], 0  ;;  %v1322_v32 = vpack.c.bf16 %v110_v31, %v109_v30  ;;  %v111_v33 = vld [vmem:[%s2435_s1 + $0xa0] sm:$0xff]  ;;  %v112_v34 = vld [vmem:[%s2435_s1 + $0xa8] sm:$0xff]  ;;  %vm417_vm0 = vcmask 1041409   ;;  %vm419_vm1 = vcmask 1043459  }
  0x23   :  { %v1325_v35 = vpack.c.bf16 %v112_v34, %v111_v33  ;;  %v113_v36 = vld [vmem:[%s2435_s1 + $0xb0] sm:$0xff]  ;;  %v114_v37 = vld [vmem:[%s2435_s1 + $0xb8] sm:$0xff]  ;;  %v115_v39 = vld [vmem:[%s2435_s1 + $0xc0] sm:$0xff]  ;;  %vm421_vm2 = vcmask 1045509   ;;  %vm423_vm3 = vcmask 1047559   ;;  %s1509_s27 = smov 60  }
  0x24   :  { %1320 = vmatpush1.bf16.msra.mxu0 %v1319_v29  ;;  %1439 = vmatpush1.bf16.msra.mxu1 %v1319_v29  ;;  %v1328_v38 = vpack.c.bf16 %v114_v37, %v113_v36  ;;  %v116_v40 = vld [vmem:[%s2435_s1 + $0xc8] sm:$0xff]  ;;  %v117_v42 = vld [vmem:[%s2435_s1 + $0xd0] sm:$0xff]  ;;  %v118_v43 = vld [vmem:[%s2435_s1 + $0xd8] sm:$0xff]  ;;  %s1510_s28 = smov 40   ;;  %s1511_s29 = smov 100   ;;  %vm426_vm4 = vcmask 156672  }
  0x25   :  { %1321 = vmatprep.subr.bf16.mxu0 %v1505_v3  ;;  %1424 = vmatprep.subr.bf16.mxu1 %v1505_v3  ;;  %v1331_v41 = vpack.c.bf16 %v116_v40, %v115_v39  ;;  %v1334_v44 = vpack.c.bf16 %v118_v43, %v117_v42  ;;  %v119_v45 = vld [vmem:[%s2435_s1 + $0xe0] sm:$0xff]  ;;  %v120_v46 = vld [vmem:[%s2435_s1 + $0xe8] sm:$0xff]  ;;  %v121_v48 = vld [vmem:[%s2435_s1 + $0xf0] sm:$0xff]  ;;  %s1512_s30 = smov 80   ;;  %s1513_s8 = smov 120   ;;  %vm438_vm5 = vcmask 320672  }
  0x26   :  { %v1337_v47 = vpack.c.bf16 %v120_v46, %v119_v45  ;;  %v122_v49 = vld [vmem:[%s2435_s1 + $0xf8] sm:$0xff]  ;;  %v27_v51 = vld [vmem:[%s2434_s0] sm:$0xff]  ;;  %v73_v52 = vld [vmem:[%s2434_s0 + $0x170] sm:$0xff]  ;;  %s1514_s9 = smov 12   ;;  %s1515_s10 = smov 32   ;;  %vm452_vm6 = vcmask 484672  }
  0x27   :  { %v1340_v50 = vpack.c.bf16 %v122_v49, %v121_v48  ;;  %v30_v53 = vld [vmem:[%s2434_s0 + $0x18] sm:$0xff]  ;;  %v76_v54 = vld [vmem:[%s2434_s0 + $0x188] sm:$0xff]  ;;  %v29_v55 = vld [vmem:[%s2434_s0 + $0x10] sm:$0xff]  ;;  %s1516_s11 = smov 52   ;;  %s1517_s12 = smov 92   ;;  %vm464_vm7 = vcmask 648672  }
  0x28   :  { %1323 = vmatpush1.bf16.msra.mxu0 %v1322_v32  ;;  %1440 = vmatpush1.bf16.msra.mxu1 %v1322_v32  ;;  %v75_v56 = vld [vmem:[%s2434_s0 + $0x180] sm:$0xff]  ;;  %v32_v57 = vld [vmem:[%s2434_s0 + $0x28] sm:$0xff]  ;;  %v78_v58 = vld [vmem:[%s2434_s0 + $0x198] sm:$0xff]  ;;  %s1518_s13 = smov 4   ;;  %s1519_s14 = smov 112   ;;  %vm492_vm8 = vcmask 812672  }
  0x29   :  { %1324 = vmatprep.subr.bf16.mxu0 %v1505_v3  ;;  %1425 = vmatprep.subr.bf16.mxu1 %v1505_v3  ;;  %v31_v59 = vld [vmem:[%s2434_s0 + $0x20] sm:$0xff]  ;;  %v77_v60 = vld [vmem:[%s2434_s0 + $0x190] sm:$0xff]  ;;  %v34_v61 = vld [vmem:[%s2434_s0 + $0x38] sm:$0xff]  ;;  %s1520_s15 = smov 72   ;;  %s1521_s22 = smov 84   ;;  %vm504_vm9 = vcmask 976672  }
  0x2a   :  { %v80_v62 = vld [vmem:[%s2434_s0 + $0x1a8] sm:$0xff]  ;;  %v33_v63 = vld [vmem:[%s2434_s0 + $0x30] sm:$0xff]  ;;  %v79_v0 = vld [vmem:[%s2434_s0 + $0x1a0] sm:$0xff]  ;;  %s1526_s23 = smov 104   ;;  %s1529_s16 = smov 56   ;;  %vm521_vm10 = vcmask 1042368  }
  0x2b   :  { %v36_v1 = vld [vmem:[%s2434_s0 + $0x48] sm:$0xff]  ;;  %v82_v2 = vld [vmem:[%s2434_s0 + $0x1b8] sm:$0xff]  ;;  %v35_v4 = vld [vmem:[%s2434_s0 + $0x40] sm:$0xff]  ;;  %s1530_s17 = smov 76   ;;  %s1531_s26 = smov 96   ;;  %vm522_vm11 = vcmask 93186  }
  0x2c   :  { %1326 = vmatpush1.bf16.msra.mxu0 %v1325_v35  ;;  %1441 = vmatpush1.bf16.msra.mxu1 %v1325_v35  ;;  %v81_v5 = vld [vmem:[%s2434_s0 + $0x1b0] sm:$0xff]  ;;  %v38_v6 = vld [vmem:[%s2434_s0 + $0x58] sm:$0xff]  ;;  %v84_v7 = vld [vmem:[%s2434_s0 + $0x1c8] sm:$0xff]  ;;  %vm518_vm12 = vcmask 982016   ;;  %vm535_vm14 = vcmask 255072   ;;  %vm563_vm15 = vcmask 419072  }
  0x2d   :  { %1327 = vmatprep.subr.bf16.mxu0 %v1505_v3  ;;  %1426 = vmatprep.subr.bf16.mxu1 %v1505_v3  ;;  %v37_v8 = vld [vmem:[%s2434_s0 + $0x50] sm:$0xff]  ;;  %v83_v9 = vld [vmem:[%s2434_s0 + $0x1c0] sm:$0xff]  ;;  %v40_v10 = vld [vmem:[%s2434_s0 + $0x68] sm:$0xff] }
  0x2e   :  { %v86_v11 = vld [vmem:[%s2434_s0 + $0x1d8] sm:$0xff]  ;;  %v39_v12 = vld [vmem:[%s2434_s0 + $0x60] sm:$0xff]  ;;  %v85_v13 = vld [vmem:[%s2434_s0 + $0x1d0] sm:$0xff] }
  0x2f   :  { %v42_v14 = vld [vmem:[%s2434_s0 + $0x78] sm:$0xff]  ;;  %v88_v15 = vld [vmem:[%s2434_s0 + $0x1e8] sm:$0xff]  ;;  %v41_v16 = vld [vmem:[%s2434_s0 + $0x70] sm:$0xff] }
  0x30   :  { %1329 = vmatpush1.bf16.msra.mxu0 %v1328_v38  ;;  %1442 = vmatpush1.bf16.msra.mxu1 %v1328_v38  ;;  %v87_v17 = vld [vmem:[%s2434_s0 + $0x1e0] sm:$0xff]  ;;  %v44_v18 = vld [vmem:[%s2434_s0 + $0x88] sm:$0xff]  ;;  %v90_v19 = vld [vmem:[%s2434_s0 + $0x1f8] sm:$0xff] }
  0x31   :  { %1330 = vmatprep.subr.bf16.mxu0 %v1505_v3  ;;  %1427 = vmatprep.subr.bf16.mxu1 %v1505_v3  ;;  %v43_v20 = vld [vmem:[%s2434_s0 + $0x80] sm:$0xff]  ;;  %v89_v21 = vld [vmem:[%s2434_s0 + $0x1f0] sm:$0xff]  ;;  %v46_v22 = vld [vmem:[%s2434_s0 + $0x98] sm:$0xff] }
  0x32   :  { %v45_v23 = vld [vmem:[%s2434_s0 + $0x90] sm:$0xff]  ;;  %v48_v24 = vld [vmem:[%s2434_s0 + $0xa8] sm:$0xff]  ;;  %v47_v25 = vld [vmem:[%s2434_s0 + $0xa0] sm:$0xff] }
  0x33   :  { %v50_v26 = vld [vmem:[%s2434_s0 + $0xb8] sm:$0xff]  ;;  %v49_v27 = vld [vmem:[%s2434_s0 + $0xb0] sm:$0xff]  ;;  %v52_v28 = vld [vmem:[%s2434_s0 + $0xc8] sm:$0xff] }
  0x34   :  { %1332 = vmatpush1.bf16.msra.mxu0 %v1331_v41  ;;  %1443 = vmatpush1.bf16.msra.mxu1 %v1331_v41  ;;  %v51_v29 = vld [vmem:[%s2434_s0 + $0xc0] sm:$0xff]  ;;  %v54_v30 = vld [vmem:[%s2434_s0 + $0xd8] sm:$0xff]  ;;  %v53_v31 = vld [vmem:[%s2434_s0 + $0xd0] sm:$0xff] }
  0x35   :  { %1333 = vmatprep.subr.bf16.mxu0 %v1505_v3  ;;  %1428 = vmatprep.subr.bf16.mxu1 %v1505_v3  ;;  %v56_v32 = vld [vmem:[%s2434_s0 + $0xe8] sm:$0xff]  ;;  %v55_v33 = vld [vmem:[%s2434_s0 + $0xe0] sm:$0xff]  ;;  %v58_v34 = vld [vmem:[%s2434_s0 + $0xf8] sm:$0xff] }
  0x36   :  { %v57_v35 = vld [vmem:[%s2434_s0 + $0xf0] sm:$0xff]  ;;  %v60_v36 = vld [vmem:[%s2434_s0 + $0x108] sm:$0xff]  ;;  %v59_v37 = vld [vmem:[%s2434_s0 + $0x100] sm:$0xff] }
  0x37   :  { %v62_v38 = vld [vmem:[%s2434_s0 + $0x118] sm:$0xff]  ;;  %v61_v39 = vld [vmem:[%s2434_s0 + $0x110] sm:$0xff]  ;;  %v64_v40 = vld [vmem:[%s2434_s0 + $0x128] sm:$0xff] }
  0x38   :  { %1335 = vmatpush1.bf16.msra.mxu0 %v1334_v44  ;;  %1444 = vmatpush1.bf16.msra.mxu1 %v1334_v44  ;;  %v63_v41 = vld [vmem:[%s2434_s0 + $0x120] sm:$0xff]  ;;  %v66_v42 = vld [vmem:[%s2434_s0 + $0x138] sm:$0xff]  ;;  %v65_v43 = vld [vmem:[%s2434_s0 + $0x130] sm:$0xff] }
  0x39   :  { %1336 = vmatprep.subr.bf16.mxu0 %v1505_v3  ;;  %1429 = vmatprep.subr.bf16.mxu1 %v1505_v3  ;;  %v68_v44 = vld [vmem:[%s2434_s0 + $0x148] sm:$0xff]  ;;  %v67_v45 = vld [vmem:[%s2434_s0 + $0x140] sm:$0xff]  ;;  %v70_v46 = vld [vmem:[%s2434_s0 + $0x158] sm:$0xff] }
  0x3a   :  { %v72_v48 = vld [vmem:[%s2434_s0 + $0x168] sm:$0xff]  ;;  %v71_v49 = vld [vmem:[%s2434_s0 + $0x160] sm:$0xff]  ;;  %vm523_vm13 = vmor %vm522_vm11, %vm521_vm10  ;;  %vm700_vm10 = vcmask 681472   ;;  %vm741_vm11 = vcmask 1042400  }
  0x3c   :  { %1338 = vmatpush1.bf16.msra.mxu0 %v1337_v47  ;;  %1445 = vmatpush1.bf16.msra.mxu1 %v1337_v47  ;;  %v69_v47 = vld [vmem:[%s2434_s0 + $0x150] sm:$0xff] }
  0x3d   :  { %1339 = vmatprep.subr.bf16.mxu0 %v1505_v3  ;;  %1430 = vmatprep.subr.bf16.mxu1 %v1505_v3 }
  0x40   :  { %1341 = vmatpush1.bf16.msra.mxu0 %v1340_v50  ;;  %1446 = vmatpush1.bf16.msra.mxu1 %v1340_v50  ;;  %v1506_v50 = vmov 0.0  }
  0x41   :  { %395 = vst [vmem:[#allocation2] sm:$0xff] %v1506_v50 }
  0x43   :  { %188 = vmatmul.mubr.f32.vlgmr.msra.gmra.mrb[0].mxu0 %v27_v51  ;;  %303 = vmatmul.mubr.f32.vlgmr.msra.gmra.mrb[0].mxu1 %v73_v52 }
  0x44   :  { %192 = vmatprep.mubr.f32.mxu0 %v30_v53  ;;  %307 = vmatprep.mubr.f32.mxu1 %v76_v54 }
  0x47   :  { %193 = vmatmul.mubr.f32.gmra.mrb[2].mxu0 %v29_v55  ;;  %308 = vmatmul.mubr.f32.gmra.mrb[2].mxu1 %v75_v56 }
  0x48   :  { %197 = vmatprep.mubr.f32.mxu0 %v32_v57  ;;  %312 = vmatprep.mubr.f32.mxu1 %v78_v58 }
  0x4b   :  { %198 = vmatmul.mubr.f32.gmra.mrb[4].mxu0 %v31_v59  ;;  %313 = vmatmul.mubr.f32.gmra.mrb[4].mxu1 %v77_v60 }
  0x4c   :  { %202 = vmatprep.mubr.f32.mxu0 %v34_v61  ;;  %317 = vmatprep.mubr.f32.mxu1 %v80_v62 }
  0x4f   :  { %203 = vmatmul.mubr.f32.gmra.mrb[6].mxu0 %v33_v63  ;;  %318 = vmatmul.mubr.f32.gmra.mrb[6].mxu1 %v79_v0 }
  0x50   :  { %207 = vmatprep.mubr.f32.mxu0 %v36_v1  ;;  %322 = vmatprep.mubr.f32.mxu1 %v82_v2 }
  0x53   :  { %208 = vmatmul.mubr.f32.gmra.mrb[8].mxu0 %v35_v4  ;;  %323 = vmatmul.mubr.f32.gmra.mrb[8].mxu1 %v81_v5 }
  0x54   :  { %212 = vmatprep.mubr.f32.mxu0 %v38_v6  ;;  %327 = vmatprep.mubr.f32.mxu1 %v84_v7 }
  0x57   :  { %213 = vmatmul.mubr.f32.gmra.mrb[10].mxu0 %v37_v8  ;;  %328 = vmatmul.mubr.f32.gmra.mrb[10].mxu1 %v83_v9 }
  0x58   :  { %217 = vmatprep.mubr.f32.mxu0 %v40_v10  ;;  %332 = vmatprep.mubr.f32.mxu1 %v86_v11 }
  0x5b   :  { %218 = vmatmul.mubr.f32.gmra.mrb[12].mxu0 %v39_v12  ;;  %333 = vmatmul.mubr.f32.gmra.mrb[12].mxu1 %v85_v13 }
  0x5c   :  { %222 = vmatprep.mubr.f32.mxu0 %v42_v14  ;;  %337 = vmatprep.mubr.f32.mxu1 %v88_v15 }
  0x5f   :  { %223 = vmatmul.mubr.f32.gmra.mrb[14].mxu0 %v41_v16  ;;  %338 = vmatmul.mubr.f32.gmra.mrb[14].mxu1 %v87_v17 }
  0x60   :  { %227 = vmatprep.mubr.f32.mxu0 %v44_v18  ;;  %342 = vmatprep.mubr.f32.mxu1 %v90_v19 }
  0x63   :  { %228 = vmatmul.mubr.f32.gmra.mrb[16].mxu0 %v43_v20  ;;  %343 = vmatmul.mubr.f32.gmra.mrb[16].mxu1 %v89_v21 }
  0x64   :  { %232 = vmatprep.mubr.f32.mxu0 %v46_v22 }
  0x67   :  { %233 = vmatmul.mubr.f32.gmra.mrb[18].mxu0 %v45_v23 }
  0x68   :  { %237 = vmatprep.mubr.f32.mxu0 %v48_v24 }
  0x6b   :  { %238 = vmatmul.mubr.f32.gmra.mrb[20].mxu0 %v47_v25 }
  0x6c   :  { %242 = vmatprep.mubr.f32.mxu0 %v50_v26 }
  0x6f   :  { %243 = vmatmul.mubr.f32.gmra.mrb[22].mxu0 %v49_v27 }
  0x70   :  { %247 = vmatprep.mubr.f32.mxu0 %v52_v28 }
  0x73   :  { %248 = vmatmul.mubr.f32.gmra.mrb[24].mxu0 %v51_v29 }
  0x74   :  { %252 = vmatprep.mubr.f32.mxu0 %v54_v30 }
  0x77   :  { %253 = vmatmul.mubr.f32.gmra.mrb[26].mxu0 %v53_v31 }
  0x78   :  { %257 = vmatprep.mubr.f32.mxu0 %v56_v32 }
  0x7b   :  { %258 = vmatmul.mubr.f32.gmra.mrb[28].mxu0 %v55_v33 }
  0x7c   :  { %262 = vmatprep.mubr.f32.mxu0 %v58_v34 }
  0x7f   :  { %263 = vmatmul.mubr.f32.gmra.mrb[30].mxu0 %v57_v35 }
  0x80   :  { %267 = vmatprep.mubr.f32.mxu0 %v60_v36 }
  0x83   :  { %268 = vmatmul.mubr.f32.gmra.mrb[32].mxu0 %v59_v37 }
  0x84   :  { %272 = vmatprep.mubr.f32.mxu0 %v62_v38 }
  0x87   :  { %273 = vmatmul.mubr.f32.gmra.mrb[34].mxu0 %v61_v39 }
  0x88   :  { %277 = vmatprep.mubr.f32.mxu0 %v64_v40 }
  0x8b   :  { %278 = vmatmul.mubr.f32.gmra.mrb[36].mxu0 %v63_v41 }
  0x8c   :  { %282 = vmatprep.mubr.f32.mxu0 %v66_v42 }
  0x8f   :  { %283 = vmatmul.mubr.f32.gmra.mrb[38].mxu0 %v65_v43 }
  0x90   :  { %287 = vmatprep.mubr.f32.mxu0 %v68_v44 }
  0x93   :  { %288 = vmatmul.mubr.f32.gmra.mrb[40].mxu0 %v67_v45 }
  0x94   :  { %292 = vmatprep.mubr.f32.mxu0 %v70_v46 }
  0x97   :  { %293 = vmatmul.mubr.f32.gmra.mrb[42].mxu0 %v69_v47 }
  0x98   :  { %297 = vmatprep.mubr.f32.mxu0 %v72_v48 }
  0x9b   :  { %298 = vmatmul.mubr.f32.gmra.mrb[44].mxu0 %v71_v49 }
 0x116   :  { %v189_v51 = vpop.f32.mrb[0].mxu0  ;;  %v1895_v52 = vpop.f32.mrb[0].mxu1 }
 0x117   :  { %v191_v53 = vpop.f32.mrb[1].mxu0  ;;  %v306_v54 = vpop.f32.mrb[1].mxu1 }
 0x11a   :  { %v194_v55 = vpop.f32.mrb[2].mxu0  ;;  %v1897_v56 = vpop.f32.mrb[2].mxu1 }
 0x11b   :  { %v196_v57 = vpop.f32.mrb[3].mxu0  ;;  %v311_v58 = vpop.f32.mrb[3].mxu1 }
 0x11c   :  { %v1507_v58 = vmov 1983009808  }
 0x11e   :  { %v199_v59 = vpop.f32.mrb[4].mxu0  ;;  %v1899_v60 = vpop.f32.mrb[4].mxu1 }
 0x11f   :  { %v201_v61 = vpop.f32.mrb[5].mxu0  ;;  %v316_v62 = vpop.f32.mrb[5].mxu1 }
 0x120   :  { %v401_v61 = vlaneseq }
 0x122   :  { %v204_v63 = vpop.f32.mrb[6].mxu0  ;;  %v1901_v0 = vpop.f32.mrb[6].mxu1 }
 0x123   :  { %v206_v1 = vpop.f32.mrb[7].mxu0  ;;  %v321_v2 = vpop.f32.mrb[7].mxu1 }
 0x126   :  { %v209_v4 = vpop.f32.mrb[8].mxu0  ;;  %v1903_v5 = vpop.f32.mrb[8].mxu1 }
 0x127   :  { %v348_v6 = vmax.f32 %v189_v51, %v209_v4  ;;  %v211_v7 = vpop.f32.mrb[9].mxu0  ;;  %v326_v8 = vpop.f32.mrb[9].mxu1  ;;  %v402_v4 = vshrl.u32 %v401_v61, 7 }
 0x12a   :  { %v214_v9 = vpop.f32.mrb[10].mxu0  ;;  %v1905_v10 = vpop.f32.mrb[10].mxu1 }
 0x12b   :  { %v349_v11 = vmax.f32 %v194_v55, %v214_v9  ;;  %v216_v12 = vpop.f32.mrb[11].mxu0  ;;  %v360_v13 = vmax.f32 %v1897_v56, %v1905_v10  ;;  %v331_v14 = vpop.f32.mrb[11].mxu1  ;;  %v1921_v55 = vld [vmem:[%s2436_s2] ss:$0 sm:$0xff]  ;;  %s1508_s2 = smov 20  }
 0x12e   :  { %v219_v15 = vpop.f32.mrb[12].mxu0  ;;  %v1909_v16 = vpop.f32.mrb[12].mxu1 }
 0x12f   :  { %v350_v17 = vmax.f32 %v199_v59, %v219_v15  ;;  %v221_v18 = vpop.f32.mrb[13].mxu0  ;;  %v361_v19 = vmax.f32 %v1899_v60, %v1909_v16  ;;  %v336_v20 = vpop.f32.mrb[13].mxu1  ;;  %v399_v59 = vunpack.c.l.s4 %v1507_v58 }
 0x131   :  { %v400_v2 = vunpack.c.0.s8 %v399_v59 }
 0x132   :  { %v224_v21 = vpop.f32.mrb[14].mxu0  ;;  %v1913_v22 = vpop.f32.mrb[14].mxu1 }
 0x133   :  { %v351_v23 = vmax.f32 %v204_v63, %v224_v21  ;;  %v226_v24 = vpop.f32.mrb[15].mxu0  ;;  %v362_v25 = vmax.f32 %v1901_v0, %v1913_v22  ;;  %v341_v26 = vpop.f32.mrb[15].mxu1 }
 0x136   :  { %v229_v27 = vpop.f32.mrb[16].mxu0  ;;  %v344_v28 = vpop.f32.mrb[16].mxu1 }
 0x137   :  { %v231_v29 = vpop.f32.mrb[17].mxu0  ;;  %v363_v30 = vmax.f32 %v1903_v5, %v344_v28  ;;  %v346_v31 = vpop.f32.mrb[17].mxu1 }
 0x13a   :  { %v234_v32 = vpop.f32.mrb[18].mxu0 }
 0x13b   :  { %v236_v33 = vpop.f32.mrb[19].mxu0 }
 0x13e   :  { %v239_v34 = vpop.f32.mrb[20].mxu0 }
 0x13f   :  { %v241_v35 = vpop.f32.mrb[21].mxu0 }
 0x142   :  { %v244_v36 = vpop.f32.mrb[22].mxu0 }
 0x143   :  { %v246_v37 = vpop.f32.mrb[23].mxu0 }
 0x146   :  { %v249_v38 = vpop.f32.mrb[24].mxu0 }
 0x147   :  { %v356_v39 = vmax.f32 %v229_v27, %v249_v38  ;;  %v251_v40 = vpop.f32.mrb[25].mxu0 }
 0x149   :  { %v364_v41 = vmax.f32 %v348_v6, %v356_v39 }
 0x14a   :  { %v254_v42 = vpop.f32.mrb[26].mxu0 }
 0x14b   :  { %v357_v43 = vmax.f32 %v234_v32, %v254_v42  ;;  %v256_v44 = vpop.f32.mrb[27].mxu0  ;;  %v379_v1 = vadd.f32 %v1921_v55, %v364_v41 }
 0x14d   :  { %v365_v45 = vmax.f32 %v349_v11, %v357_v43  ;;  %v387_v8 = vmax.f32 %v379_v1, 0.0  ;;  %v1926_v11 = vsub.s32 %v400_v2, %v402_v4 }
 0x14e   :  { %v259_v46 = vpop.f32.mrb[28].mxu0 }
 0x14f   :  { %v358_v47 = vmax.f32 %v239_v34, %v259_v46  ;;  %v261_v48 = vpop.f32.mrb[29].mxu0  ;;  %v380_v5 = vadd.f32 %v1921_v55, %v365_v45  ;;  %v1931_v20 = vrot.slane %v387_v8, %v1926_v11 }
 0x151   :  { %v366_v49 = vmax.f32 %v350_v17, %v358_v47  ;;  %v388_v12 = vmax.f32 %v380_v5, 0.0  ;;  %v466_v17 = vcombine.high %v387_v8, %v387_v8  ;;  %v1942_v32 = vcombine.high %v1931_v20, %v1931_v20 }
 0x152   :  { %v264_v51 = vpop.f32.mrb[30].mxu0  ;;  %v428_v43 = vrot.slane %v1931_v20, 1 }
 0x153   :  { %v359_v53 = vmax.f32 %v244_v36, %v264_v51  ;;  %v266_v54 = vpop.f32.mrb[31].mxu0  ;;  %v381_v9 = vadd.f32 %v1921_v55, %v366_v49  ;;  %v603_v21 = vcombine.high %v388_v12, %v388_v12  ;;  %v1935_v27 = vrot.slane %v466_v17, %v1926_v11 }
 0x154   :  { %v1938_v29 = vrot.slane %v388_v12, %v1926_v11  ;;  %v454_v47 = vrot.slane %v1942_v32, 1 }
 0x155   :  { %v367_v57 = vmax.f32 %v351_v23, %v359_v53  ;;  %v389_v18 = vmax.f32 %v381_v9, 0.0  ;;  %v1945_v33 = vrot.slane %v603_v21, %v1926_v11  ;;  %v494_v56 = vrot.slane %v1935_v27, 1 }
 0x156   :  { %v269_v62 = vpop.f32.mrb[32].mxu0  ;;  %v1961_v40 = vcombine.high %v1938_v29, %v1938_v29  ;;  %v565_v10 = vrot.slane %v1938_v29, 1 }
 0x157   :  { %v271_v63 = vpop.f32.mrb[33].mxu0  ;;  %v745_v28 = vcombine.high %v389_v18, %v389_v18  ;;  %v382_v34 = vadd.f32 %v1921_v55, %v367_v57  ;;  %v1950_v38 = vrot.slane %v389_v18, %v1926_v11  ;;  %v1969_v44 = vcombine.high %v1945_v33, %v1945_v33 }
 0x158   :  { %v636_v4 = vrot.slane %v1945_v33, 1 }
 0x159   :  { %v1953_v39 = vrot.slane %v745_v28, %v1926_v11  ;;  %v390_v45 = vmax.f32 %v382_v34, 0.0  ;;  %v702_v63 = vrot.slane %v1950_v38, 1  ;;  %v662_v5 = vrot.slane %v1969_v44, 1 }
 0x15a   :  { %v274_v6 = vpop.f32.mrb[34].mxu0 }
 0x15b   :  { %v276_v7 = vpop.f32.mrb[35].mxu0  ;;  %v1983_v57 = vcombine.high %v1953_v39, %v1953_v39  ;;  %v819_v1 = vrot.slane %v390_v45, %v1926_v11 }
 0x15d   :  { %v799_v12 = vrot.slane %v1983_v57, 1 }
 0x15e   :  { %v1928_v14 = vpop.f32.mrb[36].mxu0 }
 0x15f   :  { %v281_v15 = vpop.f32.mrb[37].mxu0 }
 0x162   :  { %v284_v23 = vpop.f32.mrb[38].mxu0 }
 0x163   :  { %v355_v24 = vmax.f32 %v284_v23, %v1895_v52  ;;  %v286_v26 = vpop.f32.mrb[39].mxu0 }
 0x165   :  { %v371_v31 = vmax.f32 %v355_v24, %v363_v30  ;;  %v1957_v30 = vcombine.high %v1935_v27, %v1935_v27 }
 0x166   :  { %v289_v35 = vpop.f32.mrb[40].mxu0 }
 0x167   :  { %v386_v52 = vadd.f32 %v1921_v55, %v371_v31  ;;  %v352_v36 = vmax.f32 %v269_v62, %v289_v35  ;;  %v291_v37 = vpop.f32.mrb[41].mxu0  ;;  %v525_v54 = vrot.slane %v1957_v30, 1  ;;  %v591_v62 = vrot.slane %v1961_v40, 1 }
 0x169   :  { %v394_v41 = vmax.f32 %v386_v52, 0.0  ;;  %v368_v42 = vmax.f32 %v352_v36, %v360_v13  ;;  %v1978_v13 = vcombine.high %v1950_v38, %v1950_v38 }
 0x16a   :  { %v294_v46 = vpop.f32.mrb[42].mxu0 }
 0x16b   :  { %v826_v48 = vrot.slane %v394_v41, %v1926_v11  ;;  %v383_v49 = vadd.f32 %v1921_v55, %v368_v42  ;;  %v353_v51 = vmax.f32 %v274_v6, %v294_v46  ;;  %v296_v53 = vpop.f32.mrb[43].mxu0  ;;  %v728_v16 = vrot.slane %v1978_v13, 1 }
 0x16d   :  { %v1985_v58 = vrot.slane %v826_v48, 7  ;;  %v391_v59 = vmax.f32 %v383_v49, 0.0  ;;  %v369_v61 = vmax.f32 %v353_v51, %v361_v19  ;;  %v773_v19 = vrot.slane %v1953_v39, 1 }
 0x16e   :  { %v299_v2 = vpop.f32.mrb[44].mxu0 }
 0x16f   :  { %v411_v6 = vrot.slane %v391_v59, %v1926_v11  ;;  %v474_v7 = vcombine.high %v391_v59, %v391_v59  ;;  %v384_v8 = vadd.f32 %v1921_v55, %v369_v61  ;;  %v354_v9 = vmax.f32 %v1928_v14, %v299_v2  ;;  %v301_v60 = vpop.f32.mrb[45].mxu0 }
 0x170   :  { %v830_v15 = vsel %vm417_vm0, %v1985_v58, %v819_v1 }
 0x171   :  { %v481_v17 = vrot.slane %v474_v7, %v1926_v11  ;;  %v392_v18 = vmax.f32 %v384_v8, 0.0  ;;  %v370_v21 = vmax.f32 %v354_v9, %v362_v25  ;;  %v431_v23 = vsel %vm417_vm0, %v411_v6, %v428_v43 }
 0x172   :  { %v432_v14 = vsel %vm419_vm1, %v411_v6, %v431_v23  ;;  %v441_v24 = vcombine.high %v411_v6, %v411_v6  ;;  %v2011_v26 = vsel %vm419_vm1, %v1985_v58, %v830_v15  ;;  %v2013_v28 = vrot.slane %v411_v6, 7 }
 0x173   :  { %v552_v31 = vrot.slane %v392_v18, %v1926_v11  ;;  %v611_v34 = vcombine.high %v392_v18, %v392_v18  ;;  %v385_v35 = vadd.f32 %v1921_v55, %v370_v21  ;;  %v433_v52 = vsel %vm421_vm2, %v411_v6, %v432_v14 }
 0x174   :  { %v434_v0 = vsel %vm423_vm3, %v411_v6, %v433_v52  ;;  %v457_v22 = vsel %vm417_vm0, %v441_v24, %v454_v47  ;;  %v444_v25 = vrot.slane %v441_v24, 7  ;;  %v497_v36 = vsel %vm417_vm0, %v481_v17, %v494_v56 }
 0x175   :  { %v2022_v37 = vrot.slane %v611_v34, %v1926_v11  ;;  %v393_v41 = vmax.f32 %v385_v35, 0.0  ;;  %435 = vrot.lane.b32.xlu0 %v434_v0, %s1508_s2  ;;  %v458_v42 = vsel %vm419_vm1, %v441_v24, %v457_v22  ;;  %v498_v43 = vsel %vm419_vm1, %v481_v17, %v497_v36  ;;  %s1522_s2 = smov 44  }
 0x176   :  { %v459_v55 = vsel %vm421_vm2, %v441_v24, %v458_v42  ;;  %v445_v45 = vsel %vm417_vm0, %v444_v25, %v1942_v32  ;;  %v499_v46 = vsel %vm421_vm2, %v481_v17, %v498_v43  ;;  %v484_v47 = vrot.slane %v481_v17, 7 }
 0x177   :  { %v2031_v48 = vrot.slane %v393_v41, %v1926_v11  ;;  %v753_v49 = vcombine.high %v393_v41, %v393_v41  ;;  %v460_v51 = vsel %vm423_vm3, %v441_v24, %v459_v55  ;;  %v446_v53 = vsel %vm419_vm1, %v444_v25, %v445_v45 }
 0x178   :  { %461 = vrot.lane.b32.xlu1 %v460_v51, %s1509_s27  ;;  %v447_v56 = vsel %vm421_vm2, %v444_v25, %v446_v53  ;;  %v500_v59 = vsel %vm423_vm3, %v481_v17, %v499_v46  ;;  %v485_v32 = vsel %vm417_vm0, %v484_v47, %v1935_v27  ;;  %v507_v61 = vcombine.high %v481_v17, %v481_v17 }
 0x179   :  { %v2040_v1 = vrot.slane %v753_v49, %v1926_v11  ;;  %v448_v2 = vsel %vm423_vm3, %v444_v25, %v447_v56  ;;  %v486_v6 = vsel %vm419_vm1, %v484_v47, %v485_v32  ;;  %v555_v7 = vrot.slane %v552_v31, 7 }
 0x17a   :  { %449 = vrot.lane.b32.xlu0 %v448_v2, %s1510_s28  ;;  %v487_v8 = vsel %vm421_vm2, %v484_v47, %v486_v6  ;;  %v510_v9 = vrot.slane %v507_v61, 7  ;;  %v528_v60 = vsel %vm417_vm0, %v507_v61, %v525_v54  ;;  %v568_v27 = vsel %vm417_vm0, %v552_v31, %v565_v10 }
 0x17b   :  { %v488_v15 = vsel %vm423_vm3, %v484_v47, %v487_v8  ;;  %v529_v17 = vsel %vm419_vm1, %v507_v61, %v528_v60  ;;  %v556_v18 = vsel %vm417_vm0, %v555_v7, %v1938_v29  ;;  %v569_v21 = vsel %vm419_vm1, %v552_v31, %v568_v27 }
 0x17c   :  { %501 = vrot.lane.b32.xlu1 %v500_v59, %s1511_s29  ;;  %v511_v23 = vsel %vm417_vm0, %v510_v9, %v1957_v30  ;;  %v530_v54 = vsel %vm421_vm2, %v507_v61, %v529_v17  ;;  %v557_v14 = vsel %vm419_vm1, %v555_v7, %v556_v18  ;;  %v570_v10 = vsel %vm421_vm2, %v552_v31, %v569_v21  ;;  %s1527_s29 = smov 16  }
 0x17d   :  { %v512_v24 = vsel %vm419_vm1, %v510_v9, %v511_v23  ;;  %v531_v34 = vsel %vm423_vm3, %v507_v61, %v530_v54  ;;  %v558_v35 = vsel %vm421_vm2, %v555_v7, %v557_v14  ;;  %v571_v29 = vsel %vm423_vm3, %v552_v31, %v570_v10 }
 0x17e   :  { %489 = vrot.lane.b32.xlu0 %v488_v15, %s1512_s30  ;;  %v513_v52 = vsel %vm421_vm2, %v510_v9, %v512_v24  ;;  %v559_v30 = vsel %vm423_vm3, %v555_v7, %v558_v35  ;;  %v578_v0 = vcombine.high %v552_v31, %v552_v31  ;;  %v639_v22 = vsel %vm417_vm0, %v2022_v37, %v636_v4  ;;  %s1528_s30 = smov 36  }
 0x17f   :  { %v514_v25 = vsel %vm423_vm3, %v510_v9, %v513_v52  ;;  %v640_v36 = vsel %vm419_vm1, %v2022_v37, %v639_v22  ;;  %v621_v41 = vrot.slane %v2022_v37, 7  ;;  %v705_v42 = vsel %vm417_vm0, %v2031_v48, %v702_v63 }
 0x180   :  { %515 = vrot.lane.b32.xlu1 %v514_v25, %s1513_s8  ;;  %v594_v31 = vsel %vm417_vm0, %v578_v0, %v591_v62  ;;  %v641_v4 = vsel %vm421_vm2, %v2022_v37, %v640_v36  ;;  %v581_v43 = vrot.slane %v578_v0, 7  ;;  %v706_v55 = vsel %vm419_vm1, %v2031_v48, %v705_v42 }
 0x181   :  { %v595_v45 = vsel %vm419_vm1, %v578_v0, %v594_v31  ;;  %v642_v46 = vsel %vm423_vm3, %v2022_v37, %v641_v4  ;;  %v622_v63 = vsel %vm417_vm0, %v621_v41, %v1945_v33  ;;  %v707_v47 = vsel %vm421_vm2, %v2031_v48, %v706_v55 }
 0x182   :  { %532 = vrot.lane.b32.xlu0 %v531_v34, %s1514_s9  ;;  %v596_v62 = vsel %vm421_vm2, %v578_v0, %v595_v45  ;;  %v623_v49 = vsel %vm419_vm1, %v621_v41, %v622_v63  ;;  %v582_v51 = vsel %vm417_vm0, %v581_v43, %v1961_v40  ;;  %v2099_v53 = vsel %vm423_vm3, %v2031_v48, %v707_v47 }
 0x183   :  { %v597_v56 = vsel %vm423_vm3, %v578_v0, %v596_v62  ;;  %v624_v33 = vsel %vm421_vm2, %v621_v41, %v623_v49  ;;  %v583_v59 = vsel %vm419_vm1, %v581_v43, %v582_v51  ;;  %v649_v32 = vcombine.high %v2022_v37, %v2022_v37  ;;  %v841_v62 = vld [vmem:[%s2437_s3 + $0x8] sm:$0xff]  ;;  %v858_v49 = vld [vmem:[%s2437_s3 + $0x90] sm:$0xff]  ;;  %v859_v51 = vld [vmem:[%s2437_s3 + $0x98] sm:$0xff] }
 0x184   :  { %560 = vrot.lane.b32.xlu1 %v559_v30, %s1515_s10  ;;  %v625_v61 = vsel %vm423_vm3, %v621_v41, %v624_v33  ;;  %v584_v2 = vsel %vm421_vm2, %v581_v43, %v583_v59  ;;  %v715_v40 = vcombine.high %v2031_v48, %v2031_v48  ;;  %v692_v6 = vrot.slane %v2031_v48, 7 }
 0x185   :  { %v585_v7 = vsel %vm423_vm3, %v581_v43, %v584_v2  ;;  %v665_v8 = vsel %vm417_vm0, %v649_v32, %v662_v5  ;;  %v652_v9 = vrot.slane %v649_v32, 7  ;;  %v763_v37 = vrot.slane %v2040_v1, 7 }
 0x186   :  { %572 = vrot.lane.b32.xlu0 %v571_v29, %s1516_s11  ;;  %v666_v60 = vsel %vm419_vm1, %v649_v32, %v665_v8  ;;  %v731_v27 = vsel %vm417_vm0, %v715_v40, %v728_v16  ;;  %v693_v48 = vsel %vm417_vm0, %v692_v6, %v1950_v38  ;;  %v718_v15 = vrot.slane %v715_v40, 7 }
 0x187   :  { %v667_v17 = vsel %vm421_vm2, %v649_v32, %v666_v60  ;;  %v653_v5 = vsel %vm417_vm0, %v652_v9, %v1969_v44  ;;  %v732_v18 = vsel %vm419_vm1, %v715_v40, %v731_v27  ;;  %v694_v21 = vsel %vm419_vm1, %v692_v6, %v693_v48  ;;  %v862_v60 = vld [vmem:[%s2437_s3 + $0xb0] sm:$0xff]  ;;  %v863_v27 = vld [vmem:[%s2437_s3 + $0xb8] sm:$0xff] }
 0x188   :  { %598 = vrot.lane.b32.xlu1 %v597_v56, %s1517_s12  ;;  %v668_v23 = vsel %vm423_vm3, %v649_v32, %v667_v17  ;;  %v654_v54 = vsel %vm419_vm1, %v652_v9, %v653_v5  ;;  %v733_v16 = vsel %vm421_vm2, %v715_v40, %v732_v18  ;;  %v695_v38 = vsel %vm421_vm2, %v692_v6, %v694_v21  ;;  %v842_v32 = vld [vmem:[%s2437_s3 + $0x10] sm:$0xff]  ;;  %s1523_s12 = smov 24   ;;  %v847_v5 = vld [vmem:[%s2437_s3 + $0x38] sm:$0xff]  ;;  %v864_v18 = vld [vmem:[%s2437_s3 + $0xc0] sm:$0xff] }
 0x189   :  { %v655_v14 = vsel %vm421_vm2, %v652_v9, %v654_v54  ;;  %v734_v10 = vsel %vm423_vm3, %v715_v40, %v733_v16  ;;  %v2134_v44 = vsel %vm423_vm3, %v692_v6, %v695_v38  ;;  %v719_v24 = vsel %vm417_vm0, %v718_v15, %v1978_v13  ;;  %v861_v6 = vld [vmem:[%s2437_s3 + $0xa8] sm:$0xff]  ;;  %v846_v17 = vld [vmem:[%s2437_s3 + $0x30] sm:$0xff]  ;;  %v848_v16 = vld [vmem:[%s2437_s3 + $0x40] sm:$0xff] }
 0x18a   :  { %643 = vrot.lane.b32.xlu0 %v642_v46, %s1518_s13  ;;  %v656_v34 = vsel %vm423_vm3, %v652_v9, %v655_v14  ;;  %v720_v35 = vsel %vm419_vm1, %v718_v15, %v719_v24  ;;  %v764_v29 = vsel %vm417_vm0, %v763_v37, %v1953_v39  ;;  %v776_v52 = vsel %vm417_vm0, %v2040_v1, %v773_v19  ;;  %v856_v46 = vld [vmem:[%s2437_s3 + $0x80] sm:$0xff]  ;;  %s1524_s13 = smov 124   ;;  %v865_v21 = vld [vmem:[%s2437_s3 + $0xc8] sm:$0xff]  ;;  %v866_v14 = vld [vmem:[%s2437_s3 + $0xd0] sm:$0xff] }
 0x18b   :  { %v721_v30 = vsel %vm421_vm2, %v718_v15, %v720_v35  ;;  %v765_v0 = vsel %vm419_vm1, %v763_v37, %v764_v29  ;;  %v777_v13 = vsel %vm419_vm1, %v2040_v1, %v776_v52  ;;  %v786_v22 = vcombine.high %v2040_v1, %v2040_v1  ;;  %v844_v9 = vld [vmem:[%s2437_s3 + $0x20] sm:$0xff]  ;;  %v849_v38 = vld [vmem:[%s2437_s3 + $0x48] sm:$0xff]  ;;  %v851_v35 = vld [vmem:[%s2437_s3 + $0x58] sm:$0xff] }
 0x18c   :  { %626 = vrot.lane.b32.xlu1 %v625_v61, %s1519_s14  ;;  %v722_v25 = vsel %vm423_vm3, %v718_v15, %v721_v30  ;;  %v766_v36 = vsel %vm421_vm2, %v763_v37, %v765_v0  ;;  %v778_v39 = vsel %vm421_vm2, %v2040_v1, %v777_v13  ;;  %v832_v19 = vsel %vm421_vm2, %v1985_v58, %v2011_v26  ;;  %v843_v61 = vld [vmem:[%s2437_s3 + $0x18] sm:$0xff]  ;;  %v868_v29 = vld [vmem:[%s2437_s3 + $0xe0] sm:$0xff]  ;;  %v869_v52 = vld [vmem:[%s2437_s3 + $0xe8] sm:$0xff] }
 0x18d   :  { %v767_v41 = vsel %vm423_vm3, %v763_v37, %v766_v36  ;;  %v2162_v42 = vsel %vm423_vm3, %v2040_v1, %v778_v39  ;;  %v789_v31 = vrot.slane %v786_v22, 7  ;;  %v802_v4 = vsel %vm417_vm0, %v786_v22, %v799_v12  ;;  %v845_v37 = vld [vmem:[%s2437_s3 + $0x28] sm:$0xff]  ;;  %v852_v13 = vld [vmem:[%s2437_s3 + $0x60] sm:$0xff]  ;;  %v871_v36 = vld [vmem:[%s2437_s3 + $0xf8] sm:$0xff] }
 0x18e   :  { %586 = vrot.lane.b32.xlu0 %v585_v7, %s1520_s15  ;;  %v803_v43 = vsel %vm419_vm1, %v786_v22, %v802_v4  ;;  %v2170_v55 = vsel %vm423_vm3, %v1985_v58, %v832_v19  ;;  %v418_v26 = vsel %vm417_vm0, %v2013_v28, %v1931_v20  ;;  %v857_v58 = vld [vmem:[%s2437_s3 + $0x88] sm:$0xff]  ;;  %v840_v20 = vld [vmem:[%s2437_s3] sm:$0xff]  ;;  %v1346_v40 = vpack.c.bf16 %v859_v51, %v858_v49 }
 0x18f   :  { %v790_v1 = vsel %vm417_vm0, %v789_v31, %v1983_v57  ;;  %v804_v45 = vsel %vm421_vm2, %v786_v22, %v803_v43  ;;  %v420_v12 = vsel %vm419_vm1, %v2013_v28, %v418_v26  ;;  %v1342_v59 = vpack.c.bf16 %v857_v58, %v856_v46  ;;  %v889_v4 = vld [vmem:[%s2437_s3 + $0x188] sm:$0xff] }
 0x190   :  { %709 = vrot.lane.b32.xlu1 %v2099_v53, %s1521_s22  ;;  %v791_v57 = vsel %vm419_vm1, %v789_v31, %v790_v1  ;;  %v805_v63 = vsel %vm423_vm3, %v786_v22, %v804_v45  ;;  %v422_v47 = vsel %vm421_vm2, %v2013_v28, %v420_v12  ;;  %v1344_v2 = vpack.c.bf16 %v841_v62, %v840_v20  ;;  %s1525_s22 = smov 64   ;;  %v853_v22 = vld [vmem:[%s2437_s3 + $0x68] sm:$0xff] }
 0x191   :  { %v792_v53 = vsel %vm421_vm2, %v789_v31, %v791_v57  ;;  %v424_v56 = vsel %vm423_vm3, %v2013_v28, %v422_v47  ;;  %v860_v28 = vld [vmem:[%s2437_s3 + $0xa0] sm:$0xff]  ;;  %1343 = vmatprep.subr.bf16.mxu1 %v1342_v59  ;;  %v1348_v7 = vpack.c.bf16 %v843_v61, %v842_v32  ;;  %v1352_v48 = vpack.c.bf16 %v845_v37, %v844_v9 }
 0x192   :  { %669 = vrot.lane.b32.xlu0 %v668_v23, %s1522_s2  ;;  %v793_v33 = vsel %vm423_vm3, %v789_v31, %v792_v53  ;;  %427 = vst.msk [vmem:[#allocation2] sm:$0x3] %vm426_vm4, %v424_v56  ;;  %1345 = vmatpush3.bf16.msra.mxu1 %v1344_v2  ;;  %v1350_v8 = vpack.c.bf16 %v861_v6, %v860_v28  ;;  %v888_v31 = vld [vmem:[%s2437_s3 + $0x180] sm:$0xff]  ;;  %vm575_vm0 = vcmask 583072   ;;  %vm632_vm1 = vcmask 1042304  }
 0x193   :  { %1347 = vmatprep.subr.bf16.mxu1 %v1346_v40  ;;  %v1354_v15 = vpack.c.bf16 %v863_v27, %v862_v60  ;;  %v1356_v23 = vpack.c.bf16 %v847_v5, %v846_v17  ;;  %v1358_v54 = vpack.c.bf16 %v865_v21, %v864_v18  ;;  %v1366_v0 = vpack.c.bf16 %v869_v52, %v868_v29  ;;  %v872_v17 = vld [vmem:[%s2437_s3 + $0x100] sm:$0xff]  ;;  %v873_v5 = vld [vmem:[%s2437_s3 + $0x108] sm:$0xff] }
 0x194   :  { %657 = vrot.lane.b32.xlu1 %v656_v34, %s1523_s12  ;;  %v850_v34 = vld [vmem:[%s2437_s3 + $0x50] sm:$0xff]  ;;  %v1368_v39 = vpack.c.bf16 %v853_v22, %v852_v13  ;;  %vm633_vm2 = vcmask 27650   ;;  %vm629_vm3 = vcmask 916480   ;;  %vm589_vm4 = vcmask 747072   ;;  %v893_v29 = vld [vmem:[%s2437_s3 + $0x1a8] sm:$0xff]  ;;  %v895_v22 = vld [vmem:[%s2437_s3 + $0x1b8] sm:$0xff] }
 0x195   :  { %v1364_v30 = vpack.c.bf16 %v851_v35, %v850_v34  ;;  %v892_v35 = vld [vmem:[%s2437_s3 + $0x1a0] sm:$0xff]  ;;  %v894_v13 = vld [vmem:[%s2437_s3 + $0x1b0] sm:$0xff] }
 0x196   :  { %735 = vrot.lane.b32.xlu0 %v734_v10, %s1524_s13  ;;  %1349 = vmatpush3.bf16.msra.mxu1 %v1348_v7  ;;  %v867_v10 = vld [vmem:[%s2437_s3 + $0xd8] sm:$0xff]  ;;  %v1382_v52 = vpack.c.bf16 %v893_v29, %v892_v35 }
 0x197   :  { %1351 = vmatprep.subr.bf16.mxu1 %v1350_v8  ;;  %v1362_v24 = vpack.c.bf16 %v867_v10, %v866_v14 }
 0x198   :  { %697 = vrot.lane.b32.xlu1 %v2134_v44, %s1525_s22  ;;  %v1360_v44 = vpack.c.bf16 %v849_v38, %v848_v16  ;;  %v1376_v38 = vpack.c.bf16 %v873_v5, %v872_v17  ;;  %v1195_v17 = vld [vmem:[%s2438_s4] ss:$0 sm:$0xff]  ;;  %s1533_s4 = smov [#allocation3]  }
 0x19a   :  { %723 = vrot.lane.b32.xlu0 %v722_v25, %s1526_s23  ;;  %1353 = vmatpush3.bf16.msra.mxu1 %v1352_v48  ;;  %v870_v25 = vld [vmem:[%s2437_s3 + $0xf0] sm:$0xff] }
 0x19b   :  { %1355 = vmatprep.subr.bf16.mxu1 %v1354_v15  ;;  %v1370_v19 = vpack.c.bf16 %v871_v36, %v870_v25  ;;  %v1386_v36 = vpack.c.bf16 %v895_v22, %v894_v13 }
 0x19c   :  { %768 = vrot.lane.b32.xlu1 %v767_v41, %s1527_s29  ;;  %v854_v41 = vld [vmem:[%s2437_s3 + $0x70] sm:$0xff] }
 0x19e   :  { %780 = vrot.lane.b32.xlu0 %v2162_v42, %s1528_s30  ;;  %1357 = vmatpush3.bf16.msra.mxu1 %v1356_v23  ;;  %v855_v42 = vld [vmem:[%s2437_s3 + $0x78] sm:$0xff]  ;;  %v890_v23 = vld [vmem:[%s2437_s3 + $0x190] sm:$0xff] }
 0x19f   :  { %1359 = vmatprep.subr.bf16.mxu1 %v1358_v54  ;;  %v1372_v43 = vpack.c.bf16 %v855_v42, %v854_v41  ;;  %v891_v54 = vld [vmem:[%s2437_s3 + $0x198] sm:$0xff]  ;;  %v896_v41 = vld [vmem:[%s2437_s3 + $0x1c0] sm:$0xff]  ;;  %v897_v42 = vld [vmem:[%s2437_s3 + $0x1c8] sm:$0xff] }
 0x1a0   :  { %794 = vrot.lane.b32.xlu1 %v793_v33, %s1529_s16  ;;  %v1378_v10 = vpack.c.bf16 %v891_v54, %v890_v23 }
 0x1a2   :  { %806 = vrot.lane.b32.xlu0 %v805_v63, %s1530_s17  ;;  %1361 = vmatpush3.bf16.msra.mxu1 %v1360_v44  ;;  %v874_v44 = vld [vmem:[%s2437_s3 + $0x110] sm:$0xff] }
 0x1a3   :  { %1363 = vmatprep.subr.bf16.mxu1 %v1362_v24  ;;  %v875_v24 = vld [vmem:[%s2437_s3 + $0x118] sm:$0xff] }
 0x1a4   :  { %834 = vrot.lane.b32.xlu1 %v2170_v55, %s1531_s26  ;;  %v1374_v55 = vpack.c.bf16 %v889_v4, %v888_v31  ;;  %v1390_v4 = vpack.c.bf16 %v897_v42, %v896_v41 }
 0x1a6   :  { %1365 = vmatpush3.bf16.msra.mxu1 %v1364_v30  ;;  %v876_v30 = vld [vmem:[%s2437_s3 + $0x120] sm:$0xff] }
 0x1a7   :  { %1367 = vmatprep.subr.bf16.mxu1 %v1366_v0  ;;  %v877_v0 = vld [vmem:[%s2437_s3 + $0x128] sm:$0xff] }
 0x1a8   :  { %v1384_v25 = vpack.c.bf16 %v877_v0, %v876_v30 }
 0x1aa   :  { %1369 = vmatpush3.bf16.msra.mxu1 %v1368_v39  ;;  %v878_v39 = vld [vmem:[%s2437_s3 + $0x130] sm:$0xff] }
 0x1ab   :  { %1371 = vmatprep.subr.bf16.mxu1 %v1370_v19  ;;  %v879_v19 = vld [vmem:[%s2437_s3 + $0x138] sm:$0xff] }
 0x1ac   :  { %v1388_v31 = vpack.c.bf16 %v879_v19, %v878_v39 }
 0x1ae   :  { %1373 = vmatpush3.bf16.msra.mxu1 %v1372_v43  ;;  %v880_v43 = vld [vmem:[%s2437_s3 + $0x140] sm:$0xff] }
 0x1af   :  { %1375 = vmatprep.subr.bf16.mxu1 %v1374_v55  ;;  %v881_v55 = vld [vmem:[%s2437_s3 + $0x148] sm:$0xff] }
 0x1e7   :  { %v436_v26 = vpop.permute.xlu0 %435 }
 0x1e8   :  { %439 = vst.msk [vmem:[#allocation2] sm:$0x3] %vm438_vm5, %v436_v26  ;;  %vm601_vm5 = vcmask 911072   ;;  %v898_v26 = vld [vmem:[%s2437_s3 + $0x1d0] sm:$0xff] }
 0x1ea   :  { %v462_v1 = vpop.permute.xlu1 %461 }
 0x1ec   :  { %v450_v45 = vpop.permute.xlu0 %449 }
 0x1ed   :  { %453 = vst.msk [vmem:[#allocation2] sm:$0x3] %vm452_vm6, %v450_v45  ;;  %vm634_vm6 = vmor %vm633_vm2, %vm632_vm1  ;;  %vm771_vm1 = vcmask 287872   ;;  %vm783_vm2 = vcmask 451872   ;;  %v1392_v45 = vpack.c.bf16 %v881_v55, %v880_v43 }
 0x1ee   :  { %v502_v12 = vpop.permute.xlu1 %501  ;;  %465 = vst.msk [vmem:[#allocation2] sm:$0x3] %vm464_vm7, %v462_v1  ;;  %vm646_vm7 = vcmask 189472   ;;  %v899_v1 = vld [vmem:[%s2437_s3 + $0x1d8] sm:$0xff] }
 0x1f0   :  { %v490_v46 = vpop.permute.xlu0 %489 }
 0x1f1   :  { %493 = vst.msk [vmem:[#allocation2] sm:$0x3] %vm492_vm8, %v490_v46  ;;  %vm660_vm8 = vcmask 353472   ;;  %v882_v46 = vld [vmem:[%s2437_s3 + $0x150] sm:$0xff] }
 0x1f2   :  { %505 = vst.msk [vmem:[#allocation2] sm:$0x3] %vm504_vm9, %v502_v12  ;;  %v516_v58 = vpop.permute.xlu1 %515  ;;  %vm672_vm9 = vcmask 517472   ;;  %v1394_v12 = vpack.c.bf16 %v899_v1, %v898_v26 }
 0x1f3   :  { %v517_v20 = vrot.slane %v516_v58, 6 }
 0x1f4   :  { %v533_v57 = vpop.permute.xlu0 %532 }
 0x1f5   :  { %v519_v63 = vsel %vm518_vm12, %v517_v20, %v516_v58  ;;  %vm742_vm12 = vcmask 125954   ;;  %v883_v58 = vld [vmem:[%s2437_s3 + $0x158] sm:$0xff]  ;;  %v900_v20 = vld [vmem:[%s2437_s3 + $0x1e0] sm:$0xff] }
 0x1f6   :  { %524 = vst.msk [vmem:[#allocation2] sm:$0xf] %vm523_vm13, %v519_v63  ;;  %v561_v47 = vpop.permute.xlu1 %560  ;;  %vm712_vm13 = vcmask 845472   ;;  %v1396_v63 = vpack.c.bf16 %v883_v58, %v882_v46 }
 0x1f7   :  { %536 = vst.msk [vmem:[#allocation2 + $0x2] sm:$0x3] %vm535_vm14, %v533_v57  ;;  %vm738_vm14 = vcmask 1014784   ;;  %v901_v57 = vld [vmem:[%s2437_s3 + $0x1e8] sm:$0xff] }
 0x1f8   :  { %564 = vst.msk [vmem:[#allocation2 + $0x2] sm:$0x3] %vm563_vm15, %v561_v47  ;;  %v573_v62 = vpop.permute.xlu0 %572  ;;  %vm726_vm15 = vcmask 1009472   ;;  %v1398_v47 = vpack.c.bf16 %v901_v57, %v900_v20 }
 0x1f9   :  { %576 = vst.msk [vmem:[#allocation2 + $0x2] sm:$0x3] %vm575_vm0, %v573_v62  ;;  %vm743_vm0 = vmor %vm742_vm12, %vm741_vm11  ;;  %v884_v62 = vld [vmem:[%s2437_s3 + $0x160] sm:$0xff] }
 0x1fa   :  { %v599_v49 = vpop.permute.xlu1 %598 }
 0x1fc   :  { %v644_v51 = vpop.permute.xlu0 %643 }
 0x1fe   :  { %v627_v53 = vpop.permute.xlu1 %626 }
 0x1ff   :  { %v628_v56 = vrot.slane %v627_v53, 6 }
 0x200   :  { %v587_v33 = vpop.permute.xlu0 %586 }
 0x201   :  { %v630_v59 = vsel %vm629_vm3, %v628_v56, %v627_v53  ;;  %590 = vst.msk [vmem:[#allocation2 + $0x2] sm:$0x3] %vm589_vm4, %v587_v33  ;;  %vm797_vm3 = vcmask 615872   ;;  %vm809_vm4 = vcmask 779872   ;;  %v903_v53 = vld [vmem:[%s2437_s3 + $0x1f8] sm:$0xff] }
 0x202   :  { %602 = vst.msk [vmem:[#allocation2 + $0x2] sm:$0x3] %vm601_vm5, %v599_v49  ;;  %v710_v32 = vpop.permute.xlu1 %709  ;;  %vm837_vm5 = vcmask 943872   ;;  %v885_v49 = vld [vmem:[%s2437_s3 + $0x168] sm:$0xff] }
 0x203   :  { %635 = vst.msk [vmem:[#allocation2 + $0x2] sm:$0xf] %vm634_vm6, %v630_v59  ;;  %v1400_v56 = vpack.c.bf16 %v885_v49, %v884_v62  ;;  %v886_v59 = vld [vmem:[%s2437_s3 + $0x170] sm:$0xff]  ;;  %vm1532_vm6 = vmmov 0  }
 0x204   :  { %v670_v61 = vpop.permute.xlu0 %669  ;;  %647 = vst.msk [vmem:[#allocation2 + $0x4] sm:$0x3] %vm646_vm7, %v644_v51  ;;  %v902_v51 = vld [vmem:[%s2437_s3 + $0x1f0] sm:$0xff]  ;;  %vm1092_vm7 = vcmask 1041408  }
 0x205   :  { %v1402_v33 = vpack.c.bf16 %v903_v53, %v902_v51 }
 0x206   :  { %v658_v2 = vpop.permute.xlu1 %657 }
 0x207   :  { %661 = vst.msk [vmem:[#allocation2 + $0x4] sm:$0x3] %vm660_vm8, %v658_v2  ;;  %v1074_v2 = vld [vmem:[%s2439_s5] sm:$0xff]  ;;  %vm1088_vm8 = vcmask 408576  }
 0x208   :  { %v736_v40 = vpop.permute.xlu0 %735  ;;  %673 = vst.msk [vmem:[#allocation2 + $0x4] sm:$0x3] %vm672_vm9, %v670_v61  ;;  %vm1166_vm9 = vcmask 74752  }
 0x209   :  { %v737_v28 = vrot.slane %v736_v40, 6 }
 0x20a   :  { %v698_v6 = vpop.permute.xlu1 %697 }
 0x20b   :  { %701 = vst.msk [vmem:[#allocation2 + $0x4] sm:$0x3] %vm700_vm10, %v698_v6  ;;  %v739_v8 = vsel %vm738_vm14, %v737_v28, %v736_v40  ;;  %v1075_v40 = vld [vmem:[%s2439_s5 + $0x8] sm:$0xff]  ;;  %v1076_v28 = vld [vmem:[%s2439_s5 + $0x10] sm:$0xff] }
 0x20c   :  { %v724_v7 = vpop.permute.xlu0 %723  ;;  %713 = vst.msk [vmem:[#allocation2 + $0x4] sm:$0x3] %vm712_vm13, %v710_v32  ;;  %v887_v32 = vld [vmem:[%s2437_s3 + $0x178] sm:$0xff]  ;;  %v1407_v6 = vpack.c.bf16 %v1075_v40, %v1074_v2 }
 0x20d   :  { %727 = vst.msk [vmem:[#allocation2 + $0x4] sm:$0x3] %vm726_vm15, %v724_v7  ;;  %v1404_v61 = vpack.c.bf16 %v887_v32, %v886_v59  ;;  %v1077_v7 = vld [vmem:[%s2439_s5 + $0x18] sm:$0xff] }
 0x20e   :  { %744 = vst.msk [vmem:[#allocation2 + $0x4] sm:$0xf] %vm743_vm0, %v739_v8  ;;  %v769_v9 = vpop.permute.xlu1 %768  ;;  %v1410_v8 = vpack.c.bf16 %v1077_v7, %v1076_v28 }
 0x20f   :  { %772 = vst.msk [vmem:[#allocation2 + $0x6] sm:$0x3] %vm771_vm1, %v769_v9  ;;  %v1078_v9 = vld [vmem:[%s2439_s5 + $0x20] sm:$0xff] }
 0x210   :  { %v781_v37 = vpop.permute.xlu0 %780 }
 0x211   :  { %784 = vst.msk [vmem:[#allocation2 + $0x6] sm:$0x3] %vm783_vm2, %v781_v37  ;;  %v1079_v37 = vld [vmem:[%s2439_s5 + $0x28] sm:$0xff] }
 0x212   :  { %v795_v60 = vpop.permute.xlu1 %794 }
 0x213   :  { %798 = vst.msk [vmem:[#allocation2 + $0x6] sm:$0x3] %vm797_vm3, %v795_v60  ;;  %v1413_v60 = vpack.c.bf16 %v1079_v37, %v1078_v9 }
 0x214   :  { %v807_v27 = vpop.permute.xlu0 %806 }
 0x215   :  { %810 = vst.msk [vmem:[#allocation2 + $0x6] sm:$0x3] %vm809_vm4, %v807_v27  ;;  %v1080_v27 = vld [vmem:[%s2439_s5 + $0x30] sm:$0x3]  ;;  %s1186_s5 = sshll.u32 %s1533_s4, 4  ;;  %s1187_s5 = int_to_ptr.vmem [resolvable:$true] %s1186_s5 }
 0x216   :  { %v835_v48 = vpop.permute.xlu1 %834  ;;  %p1486_p1 = scmp.lt.s32.totalorder %s1187_s5, %s1187_s5 }
 0x217   :  { %838 = vst.msk [vmem:[#allocation2 + $0x6] sm:$0x3] %vm837_vm5, %v835_v48 }
 0x21e   :  { %v839_v15 = vld [vmem:[#allocation2] sm:$0xff] }
 0x21f   :  { %v919_v18 = vrot.slane %v839_v15, %v1926_v11  ;;  %v912_v21 = vcombine.high %v839_v15, %v839_v15 }
 0x221   :  { %v927_v16 = vcombine.high %v919_v18, %v919_v18  ;;  %v926_v14 = vrot.slane %v912_v21, %v1926_v11  ;;  %v1380_v11 = vpack.c.bf16 %v875_v24, %v874_v44 }
 0x223   :  { %997 = vmatprep.mubr.f32.mxu1 %v927_v16  ;;  %v928_v34 = vcombine.high %v926_v14, %v926_v14  ;;  %v1196_v16 = vld [vmem:[%s2440_s6] ss:$0 sm:$0xff]  ;;  %s1481_s6 = scalar_lea.vmem %s1187_s5, 32 }
 0x224   :  { %998 = vmatmul.mubr.f32.vlgmr.msra.gmra.mrb[18].mxu1 %v919_v18  ;;  %p1482_p0 = scmp.ne.s32.totalorder %s1187_s5, %s1481_s6  ;;  %p1487_p2 = scmp.lt.s32.totalorder %s1481_s6, %s1481_s6 }
 0x225   :  { %1377 = vmatpush3.bf16.msra.mxu1 %v1376_v38  ;;  %1067 = vmatprep.mubr.f32.mxu1 %v928_v34 }
 0x226   :  { %1379 = vmatprep.subr.bf16.mxu1 %v1378_v10  ;;  %p1488_p3 = por %p1487_p2, %p1486_p1 }
 0x228   :  { %p1489_p4 = pnand %p1488_p3, %p1482_p0 }
 0x229   :  { %1381 = vmatpush3.bf16.msra.mxu1 %v1380_v11 }
 0x22a   :  { %1383 = vmatprep.subr.bf16.mxu1 %v1382_v52 }
 0x22d   :  { %1385 = vmatpush3.bf16.msra.mxu1 %v1384_v25 }
 0x22e   :  { %1387 = vmatprep.subr.bf16.mxu1 %v1386_v36 }
 0x231   :  { %1389 = vmatpush3.bf16.msra.mxu1 %v1388_v31 }
 0x232   :  { %1391 = vmatprep.subr.bf16.mxu1 %v1390_v4 }
 0x235   :  { %1393 = vmatpush3.bf16.msra.mxu1 %v1392_v45 }
 0x236   :  { %1395 = vmatprep.subr.bf16.mxu1 %v1394_v12 }
 0x239   :  { %1397 = vmatpush3.bf16.msra.mxu1 %v1396_v63 }
 0x23a   :  { %1399 = vmatprep.subr.bf16.mxu1 %v1398_v47 }
 0x23d   :  { %1401 = vmatpush3.bf16.msra.mxu1 %v1400_v56 }
 0x23e   :  { %1403 = vmatprep.subr.bf16.mxu1 %v1402_v33 }
 0x241   :  { %1405 = vmatpush3.bf16.msra.mxu1 %v1404_v61 }
 0x242   :  { %1406 = vmatprep.subr.bf16.mxu1 %v1505_v3 }
 0x244   :  { %1068 = vmatmul.mubr.f32.vlgmr.msra.gmra.mrb[20].mxu1 %v926_v14 }
 0x245   :  { %1408 = vmatpush3.bf16.msra.mxu1 %v1407_v6  ;;  %1291 = vmatprep.mubr.msk.f32.mxu1 %vm1532_vm6, %v1506_v50 }
 0x246   :  { %1409 = vmatprep.subr.bf16.mxu1 %v1505_v3 }
 0x249   :  { %1411 = vmatpush3.bf16.msra.mxu1 %v1410_v8 }
 0x24a   :  { %1412 = vmatprep.subr.bf16.mxu1 %v1505_v3 }
 0x24d   :  { %1414 = vmatpush3.bf16.msra.mxu1 %v1413_v60 }
 0x24e   :  { %1289 = vmatprep.subr.mxu1 %v1506_v50 }
 0x251   :  { %1290 = vmatpush3.msk.msra.mxu1 %vm1092_vm7, %v1080_v27 }
 0x2f7   :  { %v1231_v3 = vpop.f32.mrb[18].mxu1 }
 0x2f8   :  { %v1232_v48 = vpop.f32.mrb[19].mxu1 }
 0x2f9   :  { %v1233_v15 = vadd.f32 %v1232_v48, %v1231_v3 }
 0x2fb   :  { %v1000_v21 = vadd.f32 %v1233_v15, %v1195_v17 }
 0x317   :  { %v1266_v5 = vpop.f32.mrb[20].mxu1 }
 0x318   :  { %v1267_v18 = vpop.f32.mrb[21].mxu1 }
 0x319   :  { %v1268_v23 = vadd.f32 %v1267_v18, %v1266_v5 }
 0x31b   :  { %v1070_v54 = vadd.f32 %v1268_v23, %v1000_v21 }
 0x31d   :  { %v1073_v50 = vmax.f32 %v1070_v54, 0.0 }
 0x31f   :  { %1292 = vmatmul.mubr.msk.f32.vlgmr.msra.gmra.mrb[22].mxu1 %vm1088_vm8, %v1073_v50 }
 0x3f2   :  { %v1162_v38 = vpop.f32.mrb[22].mxu1 }
 0x3f3   :  { %v1163_v14 = vadd.f32 %v1196_v16, %v1162_v38  ;;  %v1293_v10 = vpop.f32.mrb[23].mxu1 }
 0x3f5   :  { %v1167_v44 = vsel %vm1166_vm9, %v1163_v14, -inf }
 0x3f6   :  { %1168 = vmax.xlane.f32.xlu0 %v1167_v44 }
 0x483   :  { %v1169_v24 = vpop.xlane.xlu0 %1168 }
 0x484   :  { %v1170_v34 = vsub.f32 %v1163_v14, %v1169_v24 }
 0x486   :  { %v1171_v35 = vmul.f32 1.442695, %v1170_v34 }
 0x488   :  { %1477 = vpow2.f32 %v1171_v35 }
 0x492   :  { %v1478_v29 = vpop.eup %1477 }
 0x493   :  { %v1173_v11 = vsel %vm1166_vm9, %v1478_v29, 0.0 }
 0x494   :  { %1174 = vadd.xlane.f32.xlu1 %v1173_v11 }
 0x521   :  { %v1175_v52 = vpop.xlane.xlu1 %1174 }
 0x522   :  { %1479 = vlog2.f32 %v1175_v52 }
 0x52c   :  { %v1480_v30 = vpop.eup %1479 }
 0x52d   :  { %v1177_v0 = vmul.f32 0.6931472, %v1480_v30 }
 0x52f   :  { %v1178_v13 = vsub.f32 %v1170_v34, %v1177_v0 }
 0x531   :  { %1179 = vst.msk [vmem:[#allocation3] sm:$0x3] %vm1166_vm9, %v1178_v13 }
 0x532   :  { %1492 = shalt.err (!%p1489_p4)
}
 0x533   :  { %s1493_s18 = scalar_lea.hbm %s2441_s7, 32 }
 0x534   :  { %p1494_p5 = scmp.ne.s32.totalorder %s2441_s7, %s1493_s18  ;;  %p1497_p6 = scmp.lt.u32.totalorder %s1493_s18, %s2441_s7 }
 0x536   :  { %p1499_p7 = pnand %p1497_p6, %p1494_p5 }
 0x538   :  { %1502 = shalt.err (!%p1499_p7)
}
 0x539   :  { %1189 = dma.vmem_to_hbm [thread:$0]  %s1187_s5, 32, %s2441_s7, [#allocation4]  }
 0x53a   :  { %1503 = dma.done.wait [#allocation4], 32  }
 0x53b   :  { %1504 = vsyncadd [#allocation4], 4294967264 }
 0x53c   :  { %1193 = vsyncpa [#allocation4], 1 }

</bundles_post_ra>
